<compile_context>
chip_gen: v5e
topology: v5e:2x2
jax: 0.10.0
libtpu: 0.0.40
codegen_flags: <defaults>
</compile_context>

<pallas_src>
import functools

import numpy as np
import jax
import jax.numpy as jnp
from jax.experimental import pallas as pl
from jax.experimental.pallas import tpu as pltpu


# ----------------------------- kernel ---------------------------------------


def _shift_lanes_zero(a, s, length):
    """b[:, p] = a[:, p + s] if 0 <= p + s < length else 0 (static shift s)."""
    if s == 0:
        return a
    zeros = jnp.zeros((a.shape[0], abs(s)), a.dtype)
    if s > 0:
        return jnp.concatenate([a[:, s:], zeros], axis=1)
    return jnp.concatenate([zeros, a[:, : length + s]], axis=1)


def _gam_kernel(x_ref, w1_ref, b1_ref, w2_ref, b2_ref,
                cw1_ref, cb1_ref, cw2_ref, cb2_ref, o_ref,
                *, h, w, ksize, pad):
    p = h * w
    f32 = jnp.float32
    x = x_ref[0]                                            # (C, P), P on lanes

    # ---- channel attention: per-pixel MLP over channels (no sigmoid in this
    # variant, matching the reference module) --------------------------------
    hid = jnp.dot(w1_ref[...], x, preferred_element_type=f32) + b1_ref[...]
    hid = jnp.maximum(hid, 0.0)
    att = jnp.dot(w2_ref[...], hid, preferred_element_type=f32) + b2_ref[...]
    xa = x * att                                            # channel-gated input

    # Column coordinate of every flattened-spatial lane + per-dw validity masks.
    # Hoisted: computed once, shared by both convs (not re-derived per tap).
    col = jax.lax.broadcasted_iota(jnp.int32, (1, p), 1) % w
    col_masks = {}
    for kw in range(ksize):
        dw = kw - pad
        if dw != 0:
            col_masks[dw] = (col + dw >= 0) & (col + dw < w)

    def conv7x7(inp, w_taps_ref, b_ref):
        # inp: (Cin, P); w_taps_ref: (K, Cout, K*Cin); returns (Cout, P) f32.
        #
        # Kernel-width im2col: stack[kw*Cin + cin, (r, c)] = inp[cin, (r, c+dw)]
        # (zero where c+dw out of range).  A pure row shift of this stack by
        # dh*w (zero filled) then yields inp[cin, (r+dh, c+dw)] with correct
        # zero padding on both axes, so each kernel row is one matmul.
        c_out = w_taps_ref.shape[1]
        slabs = []
        for kw in range(ksize):
            dw = kw - pad
            s = _shift_lanes_zero(inp, dw, p)
            if dw != 0:
                s = jnp.where(col_masks[dw], s, 0.0)
            slabs.append(s)
        stack = jnp.concatenate(slabs, axis=0)              # (K*Cin, P)

        acc = jnp.zeros((c_out, p), f32)
        for kh in range(ksize):
            dh = kh - pad
            shifted = _shift_lanes_zero(stack, dh * w, p)   # pure row shift
            acc = acc + jnp.dot(w_taps_ref[kh], shifted,
                                preferred_element_type=f32)
        return acc + b_ref[...]

    # ---- spatial attention: conv1(+folded BN)+ReLU, conv2(+folded BN+shuffle),
    # sigmoid, final gating ---------------------------------------------------
    y1 = jnp.maximum(conv7x7(xa, cw1_ref, cb1_ref), 0.0)
    y2 = conv7x7(y1, cw2_ref, cb2_ref)
    s_att = jax.nn.sigmoid(y2)

    o_ref[0] = (xa * s_att).astype(o_ref.dtype)


# ----------------------------- wrapper / glue --------------------------------


def _grouped_to_dense(wg, groups):
    """(Cout, Cin//groups, kh, kw) grouped weight -> block-diagonal dense weight."""
    c_out, cin_g, kh, kw = wg.shape
    cout_g = c_out // groups
    dense = jnp.zeros((c_out, cin_g * groups, kh, kw), wg.dtype)
    for g in range(groups):
        dense = dense.at[g * cout_g:(g + 1) * cout_g,
                         g * cin_g:(g + 1) * cin_g].set(
            wg[g * cout_g:(g + 1) * cout_g])
    return dense


def _fold_conv_bn(w_dense, b, gamma, beta, mean, var, eps=1e-5):
    """Fold inference-mode BatchNorm into conv weight/bias."""
    scale = gamma / jnp.sqrt(var + eps)
    w_eff = w_dense * scale[:, None, None, None]
    b_eff = (b - mean) * scale + beta
    return w_eff, b_eff


def _shuffle_perm(c, groups):
    """channel_shuffle(x, groups): out[:, c] = in[:, perm[c]]."""
    return np.array([(ci % groups) * (c // groups) + ci // groups
                     for ci in range(c)], dtype=np.int32)


def gam_attention(x, params, *, rate=4, group=True):
    """GAMAttention forward. x: (N, C1, H, W) float32."""
    n, c1, h, w = x.shape
    p = h * w
    c_mid = int(c1 / rate)
    assert c1 % rate == 0

    groups = rate if group else 1
    dw1 = _grouped_to_dense(params["conv1_w"], groups) if group else params["conv1_w"]
    dw2 = _grouped_to_dense(params["conv2_w"], groups) if group else params["conv2_w"]
    w_eff1, b_eff1 = _fold_conv_bn(dw1, params["conv1_b"], params["bn1_gamma"],
                                   params["bn1_beta"], params["bn1_mean"],
                                   params["bn1_var"])
    w_eff2, b_eff2 = _fold_conv_bn(dw2, params["conv2_b"], params["bn2_gamma"],
                                   params["bn2_beta"], params["bn2_mean"],
                                   params["bn2_var"])
    c2 = w_eff2.shape[0]
    assert c2 == c1, "final gating x * spatial_att requires c2 == c1"
    assert c2 % 4 == 0

    # channel_shuffle(groups=4) is a pure output-channel permutation applied after
    # an elementwise sigmoid, so fold it into conv2's weights/bias.
    perm = _shuffle_perm(c2, 4)
    w_eff2 = w_eff2[perm]
    b_eff2 = b_eff2[perm]

    ksize = w_eff1.shape[-1]
    pad = ksize // 2

    # Per-kernel-row weight slabs: (K, Cout, K*Cin), contraction index = kw*Cin+cin
    # (matches the kernel's kernel-width im2col stack layout).
    cw1 = jnp.transpose(w_eff1, (2, 0, 3, 1)).reshape(ksize, c_mid, ksize * c1)
    cw2 = jnp.transpose(w_eff2, (2, 0, 3, 1)).reshape(ksize, c2, ksize * c_mid)
    cb1 = b_eff1.reshape(c_mid, 1)
    cb2 = b_eff2.reshape(c2, 1)
    b1r = params["fc1_b"].reshape(c_mid, 1)
    b2r = params["fc2_b"].reshape(c1, 1)

    x_flat = x.reshape(n, c1, p)      # free view: spatial -> lane dimension

    kernel = functools.partial(_gam_kernel, h=h, w=w, ksize=ksize, pad=pad)

    # Note: the weight/bias index_maps are constant (grid-invariant); their blocks
    # are tiny, so default double-buffering is an acceptable (minor) cost.
    out = pl.pallas_call(
        kernel,
        out_shape=jax.ShapeDtypeStruct((n, c2, p), x.dtype),
        grid_spec=pltpu.PrefetchScalarGridSpec(
            num_scalar_prefetch=0,
            grid=(n,),
            in_specs=[
                pl.BlockSpec((1, c1, p), lambda b: (b, 0, 0)),
                pl.BlockSpec((c_mid, c1), lambda b: (0, 0)),
                pl.BlockSpec((c_mid, 1), lambda b: (0, 0)),
                pl.BlockSpec((c1, c_mid), lambda b: (0, 0)),
                pl.BlockSpec((c1, 1), lambda b: (0, 0)),
                pl.BlockSpec((ksize, c_mid, ksize * c1), lambda b: (0, 0, 0)),
                pl.BlockSpec((c_mid, 1), lambda b: (0, 0)),
                pl.BlockSpec((ksize, c2, ksize * c_mid), lambda b: (0, 0, 0)),
                pl.BlockSpec((c2, 1), lambda b: (0, 0)),
            ],
            out_specs=pl.BlockSpec((1, c2, p), lambda b: (b, 0, 0)),
        ),
        compiler_params=pltpu.CompilerParams(
            dimension_semantics=("parallel",)),
    )(x_flat, params["fc1_w"], b1r, params["fc2_w"], b2r, cw1, cb1, cw2, cb2)

    return out.reshape(n, c2, h, w)


# ----------------------------- pure-JAX reference -----------------------------


def _reference(x, params, *, rate=4, group=True, eps=1e-5):
    n, c1, h, w = x.shape
    groups = rate if group else 1

    # channel attention
    xp = jnp.transpose(x, (0, 2, 3, 1)).reshape(n, h * w, c1)
    hid = jnp.maximum(xp @ params["fc1_w"].T + params["fc1_b"], 0.0)
    att = hid @ params["fc2_w"].T + params["fc2_b"]
    att = jnp.transpose(att.reshape(n, h, w, c1), (0, 3, 1, 2))
    x1 = x * att

    def conv_bn(inp, wk, b, gamma, beta, mean, var, relu):
        pad = wk.shape[-1] // 2
        y = jax.lax.conv_general_dilated(
            inp, wk, window_strides=(1, 1), padding=((pad, pad), (pad, pad)),
            dimension_numbers=("NCHW", "OIHW", "NCHW"),
            feature_group_count=groups)
        y = y + b[None, :, None, None]
        y = ((y - mean[None, :, None, None])
             / jnp.sqrt(var[None, :, None, None] + eps)
             * gamma[None, :, None, None] + beta[None, :, None, None])
        return jnp.maximum(y, 0.0) if relu else y

    y1 = conv_bn(x1, params["conv1_w"], params["conv1_b"], params["bn1_gamma"],
                 params["bn1_beta"], params["bn1_mean"], params["bn1_var"], True)
    y2 = conv_bn(y1, params["conv2_w"], params["conv2_b"], params["bn2_gamma"],
                 params["bn2_beta"], params["bn2_mean"], params["bn2_var"], False)
    s = jax.nn.sigmoid(y2)
    c2 = s.shape[1]
    s = s.reshape(n, 4, c2 // 4, h, w).transpose(0, 2, 1, 3, 4).reshape(n, c2, h, w)
    return x1 * s


# ----------------------------- test ------------------------------------------


if __name__ == "__main__":
    key = jax.random.PRNGKey(0)
    ks = jax.random.split(key, 17)

    # Grouped 7x7 convs with rate=4 require c1 divisible by 16 -> use 16 channels.
    N, C1, C2, H, W = 2, 16, 16, 16, 16
    RATE = 4
    C_MID = C1 // RATE
    KS = 7

    def u(k, shape, bound):
        return jax.random.uniform(k, shape, minval=-bound, maxval=bound,
                                  dtype=jnp.float32)

    x = jax.random.normal(ks[0], (N, C1, H, W), dtype=jnp.float32)

    lin1_b = 1.0 / np.sqrt(C1)
    lin2_b = 1.0 / np.sqrt(C_MID)
    cv1_b = 1.0 / np.sqrt((C1 // RATE) * KS * KS)
    cv2_b = 1.0 / np.sqrt((C_MID // RATE) * KS * KS)

    params = {
        "fc1_w": u(ks[1], (C_MID, C1), lin1_b),
        "fc1_b": u(ks[2], (C_MID,), lin1_b),
        "fc2_w": u(ks[3], (C1, C_MID), lin2_b),
        "fc2_b": u(ks[4], (C1,), lin2_b),
        "conv1_w": u(ks[5], (C_MID, C1 // RATE, KS, KS), cv1_b),
        "conv1_b": u(ks[6], (C_MID,), cv1_b),
        "conv2_w": u(ks[7], (C2, C_MID // RATE, KS, KS), cv2_b),
        "conv2_b": u(ks[8], (C2,), cv2_b),
        "bn1_gamma": jax.random.uniform(ks[9], (C_MID,), minval=0.5, maxval=1.5),
        "bn1_beta": 0.1 * jax.random.normal(ks[10], (C_MID,)),
        "bn1_mean": 0.1 * jax.random.normal(ks[11], (C_MID,)),
        "bn1_var": jax.random.uniform(ks[12], (C_MID,), minval=0.5, maxval=1.5),
        "bn2_gamma": jax.random.uniform(ks[13], (C2,), minval=0.5, maxval=1.5),
        "bn2_beta": 0.1 * jax.random.normal(ks[14], (C2,)),
        "bn2_mean": 0.1 * jax.random.normal(ks[15], (C2,)),
        "bn2_var": jax.random.uniform(ks[16], (C2,), minval=0.5, maxval=1.5),
    }

    out = gam_attention(x, params, rate=RATE, group=True)
    out = jax.block_until_ready(out)

    ref = _reference(x, params, rate=RATE, group=True)
    assert out.shape == ref.shape == (N, C2, H, W)
    max_err = float(jnp.max(jnp.abs(out - ref)))
    assert jnp.allclose(out, ref, atol=1e-3, rtol=1e-3), max_err

    print("KERNEL_OK")
</pallas_src>

<mosaic_0001>
module attributes {stable_mosaic.version = 11 : i64} {
  func.func @_gam_kernel(%arg0: i32, %arg1: memref<1x16x256xf32, #tpu.memory_space<vmem>>, %arg2: memref<4x16xf32, #tpu.memory_space<vmem>>, %arg3: memref<4x1xf32, #tpu.memory_space<vmem>>, %arg4: memref<16x4xf32, #tpu.memory_space<vmem>>, %arg5: memref<16x1xf32, #tpu.memory_space<vmem>>, %arg6: memref<7x4x112xf32, #tpu.memory_space<vmem>>, %arg7: memref<4x1xf32, #tpu.memory_space<vmem>>, %arg8: memref<7x16x28xf32, #tpu.memory_space<vmem>>, %arg9: memref<16x1xf32, #tpu.memory_space<vmem>>, %arg10: memref<1x16x256xf32, #tpu.memory_space<vmem>>) attributes {dimension_semantics = [#tpu.dimension_semantics<parallel>], iteration_bounds = array<i64: 2>, scalar_prefetch = 0 : i64, scratch_operands = 0 : i64, tpu.core_type = #tpu.core_type<tc>, window_params = [{transform_indices = @transform_0, window_bounds = array<i64: 1, 16, 256>}, {pipeline_mode = #tpu.pipeline_mode<synchronous>, transform_indices = @transform_1, window_bounds = array<i64: 4, 16>}, {pipeline_mode = #tpu.pipeline_mode<synchronous>, transform_indices = @transform_2, window_bounds = array<i64: 4, 1>}, {pipeline_mode = #tpu.pipeline_mode<synchronous>, transform_indices = @transform_3, window_bounds = array<i64: 16, 4>}, {pipeline_mode = #tpu.pipeline_mode<synchronous>, transform_indices = @transform_4, window_bounds = array<i64: 16, 1>}, {pipeline_mode = #tpu.pipeline_mode<synchronous>, transform_indices = @transform_5, window_bounds = array<i64: 7, 4, 112>}, {pipeline_mode = #tpu.pipeline_mode<synchronous>, transform_indices = @transform_6, window_bounds = array<i64: 4, 1>}, {pipeline_mode = #tpu.pipeline_mode<synchronous>, transform_indices = @transform_7, window_bounds = array<i64: 7, 16, 28>}, {pipeline_mode = #tpu.pipeline_mode<synchronous>, transform_indices = @transform_8, window_bounds = array<i64: 16, 1>}, {transform_indices = @transform_9, window_bounds = array<i64: 1, 16, 256>}]} {
    %c0 = arith.constant 0 : index
    %c0_0 = arith.constant 0 : index
    %c0_1 = arith.constant 0 : index
    %0 = vector.load %arg1[%c0, %c0_0, %c0_1] : memref<1x16x256xf32, #tpu.memory_space<vmem>>, vector<1x16x256xf32>
    %1 = vector.shape_cast %0 : vector<1x16x256xf32> to vector<16x256xf32>
    %c0_2 = arith.constant 0 : index
    %c0_3 = arith.constant 0 : index
    %2 = vector.load %arg2[%c0_2, %c0_3] : memref<4x16xf32, #tpu.memory_space<vmem>>, vector<4x16xf32>
    %cst = arith.constant dense<0.000000e+00> : vector<4x256xf32>
    %3 = tpu.matmul %2, %1, %cst {dimension_numbers = #tpu.dot_dimension_numbers<[1], [0], [0], [1], [0, 0, 1, 1], [], []>} : vector<4x16xf32>, vector<16x256xf32>, vector<4x256xf32> -> vector<4x256xf32>
    %c0_4 = arith.constant 0 : index
    %c0_5 = arith.constant 0 : index
    %4 = vector.load %arg3[%c0_4, %c0_5] : memref<4x1xf32, #tpu.memory_space<vmem>>, vector<4x1xf32>
    %5 = vector.broadcast %4 : vector<4x1xf32> to vector<4x256xf32>
    %6 = arith.addf %3, %5 : vector<4x256xf32>
    %cst_6 = arith.constant 0.000000e+00 : f32
    %7 = vector.broadcast %cst_6 : f32 to vector<4x256xf32>
    %8 = arith.maximumf %6, %7 : vector<4x256xf32>
    %c0_7 = arith.constant 0 : index
    %c0_8 = arith.constant 0 : index
    %9 = vector.load %arg4[%c0_7, %c0_8] : memref<16x4xf32, #tpu.memory_space<vmem>>, vector<16x4xf32>
    %cst_9 = arith.constant dense<0.000000e+00> : vector<16x256xf32>
    %10 = tpu.matmul %9, %8, %cst_9 {dimension_numbers = #tpu.dot_dimension_numbers<[1], [0], [0], [1], [0, 0, 1, 1], [], []>} : vector<16x4xf32>, vector<4x256xf32>, vector<16x256xf32> -> vector<16x256xf32>
    %c0_10 = arith.constant 0 : index
    %c0_11 = arith.constant 0 : index
    %11 = vector.load %arg5[%c0_10, %c0_11] : memref<16x1xf32, #tpu.memory_space<vmem>>, vector<16x1xf32>
    %12 = vector.broadcast %11 : vector<16x1xf32> to vector<16x256xf32>
    %13 = arith.addf %10, %12 : vector<16x256xf32>
    %14 = arith.mulf %1, %13 : vector<16x256xf32>
    %15 = tpu.iota {dimensions = array<i32: 1>} : vector<1x256xi32>
    %c16_i32 = arith.constant 16 : i32
    %c0_i32 = arith.constant 0 : i32
    %16 = arith.cmpi eq, %c16_i32, %c0_i32 : i32
    %c1_i32 = arith.constant 1 : i32
    %17 = arith.select %16, %c1_i32, %c16_i32 : i32
    %18 = vector.broadcast %17 : i32 to vector<1x256xi32>
    %19 = arith.remsi %15, %18 : vector<1x256xi32>
    %c0_i32_12 = arith.constant 0 : i32
    %20 = vector.broadcast %c0_i32_12 : i32 to vector<1x256xi32>
    %21 = arith.cmpi ne, %19, %20 : vector<1x256xi32>
    %c0_i32_13 = arith.constant 0 : i32
    %22 = vector.broadcast %c0_i32_13 : i32 to vector<1x256xi32>
    %23 = arith.cmpi slt, %19, %22 : vector<1x256xi32>
    %c0_i32_14 = arith.constant 0 : i32
    %24 = arith.cmpi slt, %17, %c0_i32_14 : i32
    %25 = vector.broadcast %24 : i1 to vector<1x256xi1>
    %26 = vector.broadcast %25 : vector<1x256xi1> to vector<1x256xi1>
    %27 = arith.xori %23, %26 : vector<1x256xi1>
    %28 = arith.andi %27, %21 : vector<1x256xi1>
    %29 = vector.broadcast %17 : i32 to vector<1x256xi32>
    %30 = arith.addi %19, %29 : vector<1x256xi32>
    %31 = arith.select %28, %30, %19 : vector<1x256xi1>, vector<1x256xi32>
    %c-3_i32 = arith.constant -3 : i32
    %32 = vector.broadcast %c-3_i32 : i32 to vector<1x256xi32>
    %33 = arith.addi %31, %32 : vector<1x256xi32>
    %c0_i32_15 = arith.constant 0 : i32
    %34 = vector.broadcast %c0_i32_15 : i32 to vector<1x256xi32>
    %35 = arith.cmpi sge, %33, %34 : vector<1x256xi32>
    %c-3_i32_16 = arith.constant -3 : i32
    %36 = vector.broadcast %c-3_i32_16 : i32 to vector<1x256xi32>
    %37 = arith.addi %31, %36 : vector<1x256xi32>
    %c16_i32_17 = arith.constant 16 : i32
    %38 = vector.broadcast %c16_i32_17 : i32 to vector<1x256xi32>
    %39 = arith.cmpi slt, %37, %38 : vector<1x256xi32>
    %40 = arith.andi %35, %39 : vector<1x256xi1>
    %c-2_i32 = arith.constant -2 : i32
    %41 = vector.broadcast %c-2_i32 : i32 to vector<1x256xi32>
    %42 = arith.addi %31, %41 : vector<1x256xi32>
    %c0_i32_18 = arith.constant 0 : i32
    %43 = vector.broadcast %c0_i32_18 : i32 to vector<1x256xi32>
    %44 = arith.cmpi sge, %42, %43 : vector<1x256xi32>
    %c-2_i32_19 = arith.constant -2 : i32
    %45 = vector.broadcast %c-2_i32_19 : i32 to vector<1x256xi32>
    %46 = arith.addi %31, %45 : vector<1x256xi32>
    %c16_i32_20 = arith.constant 16 : i32
    %47 = vector.broadcast %c16_i32_20 : i32 to vector<1x256xi32>
    %48 = arith.cmpi slt, %46, %47 : vector<1x256xi32>
    %49 = arith.andi %44, %48 : vector<1x256xi1>
    %c-1_i32 = arith.constant -1 : i32
    %50 = vector.broadcast %c-1_i32 : i32 to vector<1x256xi32>
    %51 = arith.addi %31, %50 : vector<1x256xi32>
    %c0_i32_21 = arith.constant 0 : i32
    %52 = vector.broadcast %c0_i32_21 : i32 to vector<1x256xi32>
    %53 = arith.cmpi sge, %51, %52 : vector<1x256xi32>
    %c-1_i32_22 = arith.constant -1 : i32
    %54 = vector.broadcast %c-1_i32_22 : i32 to vector<1x256xi32>
    %55 = arith.addi %31, %54 : vector<1x256xi32>
    %c16_i32_23 = arith.constant 16 : i32
    %56 = vector.broadcast %c16_i32_23 : i32 to vector<1x256xi32>
    %57 = arith.cmpi slt, %55, %56 : vector<1x256xi32>
    %58 = arith.andi %53, %57 : vector<1x256xi1>
    %c1_i32_24 = arith.constant 1 : i32
    %59 = vector.broadcast %c1_i32_24 : i32 to vector<1x256xi32>
    %60 = arith.addi %31, %59 : vector<1x256xi32>
    %c0_i32_25 = arith.constant 0 : i32
    %61 = vector.broadcast %c0_i32_25 : i32 to vector<1x256xi32>
    %62 = arith.cmpi sge, %60, %61 : vector<1x256xi32>
    %c1_i32_26 = arith.constant 1 : i32
    %63 = vector.broadcast %c1_i32_26 : i32 to vector<1x256xi32>
    %64 = arith.addi %31, %63 : vector<1x256xi32>
    %c16_i32_27 = arith.constant 16 : i32
    %65 = vector.broadcast %c16_i32_27 : i32 to vector<1x256xi32>
    %66 = arith.cmpi slt, %64, %65 : vector<1x256xi32>
    %67 = arith.andi %62, %66 : vector<1x256xi1>
    %c2_i32 = arith.constant 2 : i32
    %68 = vector.broadcast %c2_i32 : i32 to vector<1x256xi32>
    %69 = arith.addi %31, %68 : vector<1x256xi32>
    %c0_i32_28 = arith.constant 0 : i32
    %70 = vector.broadcast %c0_i32_28 : i32 to vector<1x256xi32>
    %71 = arith.cmpi sge, %69, %70 : vector<1x256xi32>
    %c2_i32_29 = arith.constant 2 : i32
    %72 = vector.broadcast %c2_i32_29 : i32 to vector<1x256xi32>
    %73 = arith.addi %31, %72 : vector<1x256xi32>
    %c16_i32_30 = arith.constant 16 : i32
    %74 = vector.broadcast %c16_i32_30 : i32 to vector<1x256xi32>
    %75 = arith.cmpi slt, %73, %74 : vector<1x256xi32>
    %76 = arith.andi %71, %75 : vector<1x256xi1>
    %c3_i32 = arith.constant 3 : i32
    %77 = vector.broadcast %c3_i32 : i32 to vector<1x256xi32>
    %78 = arith.addi %31, %77 : vector<1x256xi32>
    %c0_i32_31 = arith.constant 0 : i32
    %79 = vector.broadcast %c0_i32_31 : i32 to vector<1x256xi32>
    %80 = arith.cmpi sge, %78, %79 : vector<1x256xi32>
    %c3_i32_32 = arith.constant 3 : i32
    %81 = vector.broadcast %c3_i32_32 : i32 to vector<1x256xi32>
    %82 = arith.addi %31, %81 : vector<1x256xi32>
    %c16_i32_33 = arith.constant 16 : i32
    %83 = vector.broadcast %c16_i32_33 : i32 to vector<1x256xi32>
    %84 = arith.cmpi slt, %82, %83 : vector<1x256xi32>
    %85 = arith.andi %80, %84 : vector<1x256xi1>
    %cst_34 = arith.constant 0.000000e+00 : f32
    %86 = vector.broadcast %cst_34 : f32 to vector<16x3xf32>
    %87 = vector.extract_strided_slice %14 {offsets = [0, 0], sizes = [16, 253], strides = [1, 1]} : vector<16x256xf32> to vector<16x253xf32>
    %88 = tpu.concatenate %86, %87 in 1 : vector<16x3xf32>, vector<16x253xf32> -> vector<16x256xf32>
    %cst_35 = arith.constant 0.000000e+00 : f32
    %89 = vector.shape_cast %40 : vector<1x256xi1> to vector<1x256xi1>
    %90 = vector.broadcast %89 : vector<1x256xi1> to vector<16x256xi1>
    %91 = vector.broadcast %cst_35 : f32 to vector<16x256xf32>
    %92 = arith.select %90, %88, %91 : vector<16x256xi1>, vector<16x256xf32>
    %cst_36 = arith.constant 0.000000e+00 : f32
    %93 = vector.broadcast %cst_36 : f32 to vector<16x2xf32>
    %94 = vector.extract_strided_slice %14 {offsets = [0, 0], sizes = [16, 254], strides = [1, 1]} : vector<16x256xf32> to vector<16x254xf32>
    %95 = tpu.concatenate %93, %94 in 1 : vector<16x2xf32>, vector<16x254xf32> -> vector<16x256xf32>
    %cst_37 = arith.constant 0.000000e+00 : f32
    %96 = vector.shape_cast %49 : vector<1x256xi1> to vector<1x256xi1>
    %97 = vector.broadcast %96 : vector<1x256xi1> to vector<16x256xi1>
    %98 = vector.broadcast %cst_37 : f32 to vector<16x256xf32>
    %99 = arith.select %97, %95, %98 : vector<16x256xi1>, vector<16x256xf32>
    %cst_38 = arith.constant 0.000000e+00 : f32
    %100 = vector.broadcast %cst_38 : f32 to vector<16x1xf32>
    %101 = vector.extract_strided_slice %14 {offsets = [0, 0], sizes = [16, 255], strides = [1, 1]} : vector<16x256xf32> to vector<16x255xf32>
    %102 = tpu.concatenate %100, %101 in 1 : vector<16x1xf32>, vector<16x255xf32> -> vector<16x256xf32>
    %cst_39 = arith.constant 0.000000e+00 : f32
    %103 = vector.shape_cast %58 : vector<1x256xi1> to vector<1x256xi1>
    %104 = vector.broadcast %103 : vector<1x256xi1> to vector<16x256xi1>
    %105 = vector.broadcast %cst_39 : f32 to vector<16x256xf32>
    %106 = arith.select %104, %102, %105 : vector<16x256xi1>, vector<16x256xf32>
    %cst_40 = arith.constant 0.000000e+00 : f32
    %107 = vector.broadcast %cst_40 : f32 to vector<16x1xf32>
    %108 = vector.extract_strided_slice %14 {offsets = [0, 1], sizes = [16, 255], strides = [1, 1]} : vector<16x256xf32> to vector<16x255xf32>
    %109 = tpu.concatenate %108, %107 in 1 : vector<16x255xf32>, vector<16x1xf32> -> vector<16x256xf32>
    %cst_41 = arith.constant 0.000000e+00 : f32
    %110 = vector.shape_cast %67 : vector<1x256xi1> to vector<1x256xi1>
    %111 = vector.broadcast %110 : vector<1x256xi1> to vector<16x256xi1>
    %112 = vector.broadcast %cst_41 : f32 to vector<16x256xf32>
    %113 = arith.select %111, %109, %112 : vector<16x256xi1>, vector<16x256xf32>
    %cst_42 = arith.constant 0.000000e+00 : f32
    %114 = vector.broadcast %cst_42 : f32 to vector<16x2xf32>
    %115 = vector.extract_strided_slice %14 {offsets = [0, 2], sizes = [16, 254], strides = [1, 1]} : vector<16x256xf32> to vector<16x254xf32>
    %116 = tpu.concatenate %115, %114 in 1 : vector<16x254xf32>, vector<16x2xf32> -> vector<16x256xf32>
    %cst_43 = arith.constant 0.000000e+00 : f32
    %117 = vector.shape_cast %76 : vector<1x256xi1> to vector<1x256xi1>
    %118 = vector.broadcast %117 : vector<1x256xi1> to vector<16x256xi1>
    %119 = vector.broadcast %cst_43 : f32 to vector<16x256xf32>
    %120 = arith.select %118, %116, %119 : vector<16x256xi1>, vector<16x256xf32>
    %cst_44 = arith.constant 0.000000e+00 : f32
    %121 = vector.broadcast %cst_44 : f32 to vector<16x3xf32>
    %122 = vector.extract_strided_slice %14 {offsets = [0, 3], sizes = [16, 253], strides = [1, 1]} : vector<16x256xf32> to vector<16x253xf32>
    %123 = tpu.concatenate %122, %121 in 1 : vector<16x253xf32>, vector<16x3xf32> -> vector<16x256xf32>
    %cst_45 = arith.constant 0.000000e+00 : f32
    %124 = vector.shape_cast %85 : vector<1x256xi1> to vector<1x256xi1>
    %125 = vector.broadcast %124 : vector<1x256xi1> to vector<16x256xi1>
    %126 = vector.broadcast %cst_45 : f32 to vector<16x256xf32>
    %127 = arith.select %125, %123, %126 : vector<16x256xi1>, vector<16x256xf32>
    %128 = tpu.concatenate %92, %99, %106, %14, %113, %120, %127 in 0 : vector<16x256xf32>, vector<16x256xf32>, vector<16x256xf32>, vector<16x256xf32>, vector<16x256xf32>, vector<16x256xf32>, vector<16x256xf32> -> vector<112x256xf32>
    %cst_46 = arith.constant 0.000000e+00 : f32
    %129 = vector.broadcast %cst_46 : f32 to vector<4x256xf32>
    %cst_47 = arith.constant 0.000000e+00 : f32
    %130 = vector.broadcast %cst_47 : f32 to vector<112x48xf32>
    %131 = vector.extract_strided_slice %128 {offsets = [0, 0], sizes = [112, 208], strides = [1, 1]} : vector<112x256xf32> to vector<112x208xf32>
    %132 = tpu.concatenate %130, %131 in 1 : vector<112x48xf32>, vector<112x208xf32> -> vector<112x256xf32>
    %c0_48 = arith.constant 0 : index
    %c0_49 = arith.constant 0 : index
    %c0_50 = arith.constant 0 : index
    %133 = vector.load %arg6[%c0_48, %c0_49, %c0_50] : memref<7x4x112xf32, #tpu.memory_space<vmem>>, vector<1x4x112xf32>
    %134 = vector.shape_cast %133 : vector<1x4x112xf32> to vector<4x112xf32>
    %cst_51 = arith.constant dense<0.000000e+00> : vector<4x256xf32>
    %135 = tpu.matmul %134, %132, %cst_51 {dimension_numbers = #tpu.dot_dimension_numbers<[1], [0], [0], [1], [0, 0, 1, 1], [], []>} : vector<4x112xf32>, vector<112x256xf32>, vector<4x256xf32> -> vector<4x256xf32>
    %136 = arith.addf %129, %135 : vector<4x256xf32>
    %cst_52 = arith.constant 0.000000e+00 : f32
    %137 = vector.broadcast %cst_52 : f32 to vector<112x32xf32>
    %138 = vector.extract_strided_slice %128 {offsets = [0, 0], sizes = [112, 224], strides = [1, 1]} : vector<112x256xf32> to vector<112x224xf32>
    %139 = tpu.concatenate %137, %138 in 1 : vector<112x32xf32>, vector<112x224xf32> -> vector<112x256xf32>
    %c1 = arith.constant 1 : index
    %c0_53 = arith.constant 0 : index
    %c0_54 = arith.constant 0 : index
    %140 = vector.load %arg6[%c1, %c0_53, %c0_54] : memref<7x4x112xf32, #tpu.memory_space<vmem>>, vector<1x4x112xf32>
    %141 = vector.shape_cast %140 : vector<1x4x112xf32> to vector<4x112xf32>
    %cst_55 = arith.constant dense<0.000000e+00> : vector<4x256xf32>
    %142 = tpu.matmul %141, %139, %cst_55 {dimension_numbers = #tpu.dot_dimension_numbers<[1], [0], [0], [1], [0, 0, 1, 1], [], []>} : vector<4x112xf32>, vector<112x256xf32>, vector<4x256xf32> -> vector<4x256xf32>
    %143 = arith.addf %136, %142 : vector<4x256xf32>
    %cst_56 = arith.constant 0.000000e+00 : f32
    %144 = vector.broadcast %cst_56 : f32 to vector<112x16xf32>
    %145 = vector.extract_strided_slice %128 {offsets = [0, 0], sizes = [112, 240], strides = [1, 1]} : vector<112x256xf32> to vector<112x240xf32>
    %146 = tpu.concatenate %144, %145 in 1 : vector<112x16xf32>, vector<112x240xf32> -> vector<112x256xf32>
    %c2 = arith.constant 2 : index
    %c0_57 = arith.constant 0 : index
    %c0_58 = arith.constant 0 : index
    %147 = vector.load %arg6[%c2, %c0_57, %c0_58] : memref<7x4x112xf32, #tpu.memory_space<vmem>>, vector<1x4x112xf32>
    %148 = vector.shape_cast %147 : vector<1x4x112xf32> to vector<4x112xf32>
    %cst_59 = arith.constant dense<0.000000e+00> : vector<4x256xf32>
    %149 = tpu.matmul %148, %146, %cst_59 {dimension_numbers = #tpu.dot_dimension_numbers<[1], [0], [0], [1], [0, 0, 1, 1], [], []>} : vector<4x112xf32>, vector<112x256xf32>, vector<4x256xf32> -> vector<4x256xf32>
    %150 = arith.addf %143, %149 : vector<4x256xf32>
    %c3 = arith.constant 3 : index
    %c0_60 = arith.constant 0 : index
    %c0_61 = arith.constant 0 : index
    %151 = vector.load %arg6[%c3, %c0_60, %c0_61] : memref<7x4x112xf32, #tpu.memory_space<vmem>>, vector<1x4x112xf32>
    %152 = vector.shape_cast %151 : vector<1x4x112xf32> to vector<4x112xf32>
    %cst_62 = arith.constant dense<0.000000e+00> : vector<4x256xf32>
    %153 = tpu.matmul %152, %128, %cst_62 {dimension_numbers = #tpu.dot_dimension_numbers<[1], [0], [0], [1], [0, 0, 1, 1], [], []>} : vector<4x112xf32>, vector<112x256xf32>, vector<4x256xf32> -> vector<4x256xf32>
    %154 = arith.addf %150, %153 : vector<4x256xf32>
    %cst_63 = arith.constant 0.000000e+00 : f32
    %155 = vector.broadcast %cst_63 : f32 to vector<112x16xf32>
    %156 = vector.extract_strided_slice %128 {offsets = [0, 16], sizes = [112, 240], strides = [1, 1]} : vector<112x256xf32> to vector<112x240xf32>
    %157 = tpu.concatenate %156, %155 in 1 : vector<112x240xf32>, vector<112x16xf32> -> vector<112x256xf32>
    %c4 = arith.constant 4 : index
    %c0_64 = arith.constant 0 : index
    %c0_65 = arith.constant 0 : index
    %158 = vector.load %arg6[%c4, %c0_64, %c0_65] : memref<7x4x112xf32, #tpu.memory_space<vmem>>, vector<1x4x112xf32>
    %159 = vector.shape_cast %158 : vector<1x4x112xf32> to vector<4x112xf32>
    %cst_66 = arith.constant dense<0.000000e+00> : vector<4x256xf32>
    %160 = tpu.matmul %159, %157, %cst_66 {dimension_numbers = #tpu.dot_dimension_numbers<[1], [0], [0], [1], [0, 0, 1, 1], [], []>} : vector<4x112xf32>, vector<112x256xf32>, vector<4x256xf32> -> vector<4x256xf32>
    %161 = arith.addf %154, %160 : vector<4x256xf32>
    %cst_67 = arith.constant 0.000000e+00 : f32
    %162 = vector.broadcast %cst_67 : f32 to vector<112x32xf32>
    %163 = vector.extract_strided_slice %128 {offsets = [0, 32], sizes = [112, 224], strides = [1, 1]} : vector<112x256xf32> to vector<112x224xf32>
    %164 = tpu.concatenate %163, %162 in 1 : vector<112x224xf32>, vector<112x32xf32> -> vector<112x256xf32>
    %c5 = arith.constant 5 : index
    %c0_68 = arith.constant 0 : index
    %c0_69 = arith.constant 0 : index
    %165 = vector.load %arg6[%c5, %c0_68, %c0_69] : memref<7x4x112xf32, #tpu.memory_space<vmem>>, vector<1x4x112xf32>
    %166 = vector.shape_cast %165 : vector<1x4x112xf32> to vector<4x112xf32>
    %cst_70 = arith.constant dense<0.000000e+00> : vector<4x256xf32>
    %167 = tpu.matmul %166, %164, %cst_70 {dimension_numbers = #tpu.dot_dimension_numbers<[1], [0], [0], [1], [0, 0, 1, 1], [], []>} : vector<4x112xf32>, vector<112x256xf32>, vector<4x256xf32> -> vector<4x256xf32>
    %168 = arith.addf %161, %167 : vector<4x256xf32>
    %cst_71 = arith.constant 0.000000e+00 : f32
    %169 = vector.broadcast %cst_71 : f32 to vector<112x48xf32>
    %170 = vector.extract_strided_slice %128 {offsets = [0, 48], sizes = [112, 208], strides = [1, 1]} : vector<112x256xf32> to vector<112x208xf32>
    %171 = tpu.concatenate %170, %169 in 1 : vector<112x208xf32>, vector<112x48xf32> -> vector<112x256xf32>
    %c6 = arith.constant 6 : index
    %c0_72 = arith.constant 0 : index
    %c0_73 = arith.constant 0 : index
    %172 = vector.load %arg6[%c6, %c0_72, %c0_73] : memref<7x4x112xf32, #tpu.memory_space<vmem>>, vector<1x4x112xf32>
    %173 = vector.shape_cast %172 : vector<1x4x112xf32> to vector<4x112xf32>
    %cst_74 = arith.constant dense<0.000000e+00> : vector<4x256xf32>
    %174 = tpu.matmul %173, %171, %cst_74 {dimension_numbers = #tpu.dot_dimension_numbers<[1], [0], [0], [1], [0, 0, 1, 1], [], []>} : vector<4x112xf32>, vector<112x256xf32>, vector<4x256xf32> -> vector<4x256xf32>
    %175 = arith.addf %168, %174 : vector<4x256xf32>
    %c0_75 = arith.constant 0 : index
    %c0_76 = arith.constant 0 : index
    %176 = vector.load %arg7[%c0_75, %c0_76] : memref<4x1xf32, #tpu.memory_space<vmem>>, vector<4x1xf32>
    %177 = vector.broadcast %176 : vector<4x1xf32> to vector<4x256xf32>
    %178 = arith.addf %175, %177 : vector<4x256xf32>
    %cst_77 = arith.constant 0.000000e+00 : f32
    %179 = vector.broadcast %cst_77 : f32 to vector<4x256xf32>
    %180 = arith.maximumf %178, %179 : vector<4x256xf32>
    %cst_78 = arith.constant 0.000000e+00 : f32
    %181 = vector.broadcast %cst_78 : f32 to vector<4x3xf32>
    %182 = vector.extract_strided_slice %180 {offsets = [0, 0], sizes = [4, 253], strides = [1, 1]} : vector<4x256xf32> to vector<4x253xf32>
    %183 = tpu.concatenate %181, %182 in 1 : vector<4x3xf32>, vector<4x253xf32> -> vector<4x256xf32>
    %cst_79 = arith.constant 0.000000e+00 : f32
    %184 = vector.shape_cast %40 : vector<1x256xi1> to vector<1x256xi1>
    %185 = vector.broadcast %184 : vector<1x256xi1> to vector<4x256xi1>
    %186 = vector.broadcast %cst_79 : f32 to vector<4x256xf32>
    %187 = arith.select %185, %183, %186 : vector<4x256xi1>, vector<4x256xf32>
    %cst_80 = arith.constant 0.000000e+00 : f32
    %188 = vector.broadcast %cst_80 : f32 to vector<4x2xf32>
    %189 = vector.extract_strided_slice %180 {offsets = [0, 0], sizes = [4, 254], strides = [1, 1]} : vector<4x256xf32> to vector<4x254xf32>
    %190 = tpu.concatenate %188, %189 in 1 : vector<4x2xf32>, vector<4x254xf32> -> vector<4x256xf32>
    %cst_81 = arith.constant 0.000000e+00 : f32
    %191 = vector.shape_cast %49 : vector<1x256xi1> to vector<1x256xi1>
    %192 = vector.broadcast %191 : vector<1x256xi1> to vector<4x256xi1>
    %193 = vector.broadcast %cst_81 : f32 to vector<4x256xf32>
    %194 = arith.select %192, %190, %193 : vector<4x256xi1>, vector<4x256xf32>
    %cst_82 = arith.constant 0.000000e+00 : f32
    %195 = vector.broadcast %cst_82 : f32 to vector<4x1xf32>
    %196 = vector.extract_strided_slice %180 {offsets = [0, 0], sizes = [4, 255], strides = [1, 1]} : vector<4x256xf32> to vector<4x255xf32>
    %197 = tpu.concatenate %195, %196 in 1 : vector<4x1xf32>, vector<4x255xf32> -> vector<4x256xf32>
    %cst_83 = arith.constant 0.000000e+00 : f32
    %198 = vector.shape_cast %58 : vector<1x256xi1> to vector<1x256xi1>
    %199 = vector.broadcast %198 : vector<1x256xi1> to vector<4x256xi1>
    %200 = vector.broadcast %cst_83 : f32 to vector<4x256xf32>
    %201 = arith.select %199, %197, %200 : vector<4x256xi1>, vector<4x256xf32>
    %cst_84 = arith.constant 0.000000e+00 : f32
    %202 = vector.broadcast %cst_84 : f32 to vector<4x1xf32>
    %203 = vector.extract_strided_slice %180 {offsets = [0, 1], sizes = [4, 255], strides = [1, 1]} : vector<4x256xf32> to vector<4x255xf32>
    %204 = tpu.concatenate %203, %202 in 1 : vector<4x255xf32>, vector<4x1xf32> -> vector<4x256xf32>
    %cst_85 = arith.constant 0.000000e+00 : f32
    %205 = vector.shape_cast %67 : vector<1x256xi1> to vector<1x256xi1>
    %206 = vector.broadcast %205 : vector<1x256xi1> to vector<4x256xi1>
    %207 = vector.broadcast %cst_85 : f32 to vector<4x256xf32>
    %208 = arith.select %206, %204, %207 : vector<4x256xi1>, vector<4x256xf32>
    %cst_86 = arith.constant 0.000000e+00 : f32
    %209 = vector.broadcast %cst_86 : f32 to vector<4x2xf32>
    %210 = vector.extract_strided_slice %180 {offsets = [0, 2], sizes = [4, 254], strides = [1, 1]} : vector<4x256xf32> to vector<4x254xf32>
    %211 = tpu.concatenate %210, %209 in 1 : vector<4x254xf32>, vector<4x2xf32> -> vector<4x256xf32>
    %cst_87 = arith.constant 0.000000e+00 : f32
    %212 = vector.shape_cast %76 : vector<1x256xi1> to vector<1x256xi1>
    %213 = vector.broadcast %212 : vector<1x256xi1> to vector<4x256xi1>
    %214 = vector.broadcast %cst_87 : f32 to vector<4x256xf32>
    %215 = arith.select %213, %211, %214 : vector<4x256xi1>, vector<4x256xf32>
    %cst_88 = arith.constant 0.000000e+00 : f32
    %216 = vector.broadcast %cst_88 : f32 to vector<4x3xf32>
    %217 = vector.extract_strided_slice %180 {offsets = [0, 3], sizes = [4, 253], strides = [1, 1]} : vector<4x256xf32> to vector<4x253xf32>
    %218 = tpu.concatenate %217, %216 in 1 : vector<4x253xf32>, vector<4x3xf32> -> vector<4x256xf32>
    %cst_89 = arith.constant 0.000000e+00 : f32
    %219 = vector.shape_cast %85 : vector<1x256xi1> to vector<1x256xi1>
    %220 = vector.broadcast %219 : vector<1x256xi1> to vector<4x256xi1>
    %221 = vector.broadcast %cst_89 : f32 to vector<4x256xf32>
    %222 = arith.select %220, %218, %221 : vector<4x256xi1>, vector<4x256xf32>
    %223 = tpu.concatenate %187, %194, %201, %180, %208, %215, %222 in 0 : vector<4x256xf32>, vector<4x256xf32>, vector<4x256xf32>, vector<4x256xf32>, vector<4x256xf32>, vector<4x256xf32>, vector<4x256xf32> -> vector<28x256xf32>
    %cst_90 = arith.constant 0.000000e+00 : f32
    %224 = vector.broadcast %cst_90 : f32 to vector<16x256xf32>
    %cst_91 = arith.constant 0.000000e+00 : f32
    %225 = vector.broadcast %cst_91 : f32 to vector<28x48xf32>
    %226 = vector.extract_strided_slice %223 {offsets = [0, 0], sizes = [28, 208], strides = [1, 1]} : vector<28x256xf32> to vector<28x208xf32>
    %227 = tpu.concatenate %225, %226 in 1 : vector<28x48xf32>, vector<28x208xf32> -> vector<28x256xf32>
    %c0_92 = arith.constant 0 : index
    %c0_93 = arith.constant 0 : index
    %c0_94 = arith.constant 0 : index
    %228 = vector.load %arg8[%c0_92, %c0_93, %c0_94] : memref<7x16x28xf32, #tpu.memory_space<vmem>>, vector<1x16x28xf32>
    %229 = vector.shape_cast %228 : vector<1x16x28xf32> to vector<16x28xf32>
    %cst_95 = arith.constant dense<0.000000e+00> : vector<16x256xf32>
    %230 = tpu.matmul %229, %227, %cst_95 {dimension_numbers = #tpu.dot_dimension_numbers<[1], [0], [0], [1], [0, 0, 1, 1], [], []>} : vector<16x28xf32>, vector<28x256xf32>, vector<16x256xf32> -> vector<16x256xf32>
    %231 = arith.addf %224, %230 : vector<16x256xf32>
    %cst_96 = arith.constant 0.000000e+00 : f32
    %232 = vector.broadcast %cst_96 : f32 to vector<28x32xf32>
    %233 = vector.extract_strided_slice %223 {offsets = [0, 0], sizes = [28, 224], strides = [1, 1]} : vector<28x256xf32> to vector<28x224xf32>
    %234 = tpu.concatenate %232, %233 in 1 : vector<28x32xf32>, vector<28x224xf32> -> vector<28x256xf32>
    %c1_97 = arith.constant 1 : index
    %c0_98 = arith.constant 0 : index
    %c0_99 = arith.constant 0 : index
    %235 = vector.load %arg8[%c1_97, %c0_98, %c0_99] : memref<7x16x28xf32, #tpu.memory_space<vmem>>, vector<1x16x28xf32>
    %236 = vector.shape_cast %235 : vector<1x16x28xf32> to vector<16x28xf32>
    %cst_100 = arith.constant dense<0.000000e+00> : vector<16x256xf32>
    %237 = tpu.matmul %236, %234, %cst_100 {dimension_numbers = #tpu.dot_dimension_numbers<[1], [0], [0], [1], [0, 0, 1, 1], [], []>} : vector<16x28xf32>, vector<28x256xf32>, vector<16x256xf32> -> vector<16x256xf32>
    %238 = arith.addf %231, %237 : vector<16x256xf32>
    %cst_101 = arith.constant 0.000000e+00 : f32
    %239 = vector.broadcast %cst_101 : f32 to vector<28x16xf32>
    %240 = vector.extract_strided_slice %223 {offsets = [0, 0], sizes = [28, 240], strides = [1, 1]} : vector<28x256xf32> to vector<28x240xf32>
    %241 = tpu.concatenate %239, %240 in 1 : vector<28x16xf32>, vector<28x240xf32> -> vector<28x256xf32>
    %c2_102 = arith.constant 2 : index
    %c0_103 = arith.constant 0 : index
    %c0_104 = arith.constant 0 : index
    %242 = vector.load %arg8[%c2_102, %c0_103, %c0_104] : memref<7x16x28xf32, #tpu.memory_space<vmem>>, vector<1x16x28xf32>
    %243 = vector.shape_cast %242 : vector<1x16x28xf32> to vector<16x28xf32>
    %cst_105 = arith.constant dense<0.000000e+00> : vector<16x256xf32>
    %244 = tpu.matmul %243, %241, %cst_105 {dimension_numbers = #tpu.dot_dimension_numbers<[1], [0], [0], [1], [0, 0, 1, 1], [], []>} : vector<16x28xf32>, vector<28x256xf32>, vector<16x256xf32> -> vector<16x256xf32>
    %245 = arith.addf %238, %244 : vector<16x256xf32>
    %c3_106 = arith.constant 3 : index
    %c0_107 = arith.constant 0 : index
    %c0_108 = arith.constant 0 : index
    %246 = vector.load %arg8[%c3_106, %c0_107, %c0_108] : memref<7x16x28xf32, #tpu.memory_space<vmem>>, vector<1x16x28xf32>
    %247 = vector.shape_cast %246 : vector<1x16x28xf32> to vector<16x28xf32>
    %cst_109 = arith.constant dense<0.000000e+00> : vector<16x256xf32>
    %248 = tpu.matmul %247, %223, %cst_109 {dimension_numbers = #tpu.dot_dimension_numbers<[1], [0], [0], [1], [0, 0, 1, 1], [], []>} : vector<16x28xf32>, vector<28x256xf32>, vector<16x256xf32> -> vector<16x256xf32>
    %249 = arith.addf %245, %248 : vector<16x256xf32>
    %cst_110 = arith.constant 0.000000e+00 : f32
    %250 = vector.broadcast %cst_110 : f32 to vector<28x16xf32>
    %251 = vector.extract_strided_slice %223 {offsets = [0, 16], sizes = [28, 240], strides = [1, 1]} : vector<28x256xf32> to vector<28x240xf32>
    %252 = tpu.concatenate %251, %250 in 1 : vector<28x240xf32>, vector<28x16xf32> -> vector<28x256xf32>
    %c4_111 = arith.constant 4 : index
    %c0_112 = arith.constant 0 : index
    %c0_113 = arith.constant 0 : index
    %253 = vector.load %arg8[%c4_111, %c0_112, %c0_113] : memref<7x16x28xf32, #tpu.memory_space<vmem>>, vector<1x16x28xf32>
    %254 = vector.shape_cast %253 : vector<1x16x28xf32> to vector<16x28xf32>
    %cst_114 = arith.constant dense<0.000000e+00> : vector<16x256xf32>
    %255 = tpu.matmul %254, %252, %cst_114 {dimension_numbers = #tpu.dot_dimension_numbers<[1], [0], [0], [1], [0, 0, 1, 1], [], []>} : vector<16x28xf32>, vector<28x256xf32>, vector<16x256xf32> -> vector<16x256xf32>
    %256 = arith.addf %249, %255 : vector<16x256xf32>
    %cst_115 = arith.constant 0.000000e+00 : f32
    %257 = vector.broadcast %cst_115 : f32 to vector<28x32xf32>
    %258 = vector.extract_strided_slice %223 {offsets = [0, 32], sizes = [28, 224], strides = [1, 1]} : vector<28x256xf32> to vector<28x224xf32>
    %259 = tpu.concatenate %258, %257 in 1 : vector<28x224xf32>, vector<28x32xf32> -> vector<28x256xf32>
    %c5_116 = arith.constant 5 : index
    %c0_117 = arith.constant 0 : index
    %c0_118 = arith.constant 0 : index
    %260 = vector.load %arg8[%c5_116, %c0_117, %c0_118] : memref<7x16x28xf32, #tpu.memory_space<vmem>>, vector<1x16x28xf32>
    %261 = vector.shape_cast %260 : vector<1x16x28xf32> to vector<16x28xf32>
    %cst_119 = arith.constant dense<0.000000e+00> : vector<16x256xf32>
    %262 = tpu.matmul %261, %259, %cst_119 {dimension_numbers = #tpu.dot_dimension_numbers<[1], [0], [0], [1], [0, 0, 1, 1], [], []>} : vector<16x28xf32>, vector<28x256xf32>, vector<16x256xf32> -> vector<16x256xf32>
    %263 = arith.addf %256, %262 : vector<16x256xf32>
    %cst_120 = arith.constant 0.000000e+00 : f32
    %264 = vector.broadcast %cst_120 : f32 to vector<28x48xf32>
    %265 = vector.extract_strided_slice %223 {offsets = [0, 48], sizes = [28, 208], strides = [1, 1]} : vector<28x256xf32> to vector<28x208xf32>
    %266 = tpu.concatenate %265, %264 in 1 : vector<28x208xf32>, vector<28x48xf32> -> vector<28x256xf32>
    %c6_121 = arith.constant 6 : index
    %c0_122 = arith.constant 0 : index
    %c0_123 = arith.constant 0 : index
    %267 = vector.load %arg8[%c6_121, %c0_122, %c0_123] : memref<7x16x28xf32, #tpu.memory_space<vmem>>, vector<1x16x28xf32>
    %268 = vector.shape_cast %267 : vector<1x16x28xf32> to vector<16x28xf32>
    %cst_124 = arith.constant dense<0.000000e+00> : vector<16x256xf32>
    %269 = tpu.matmul %268, %266, %cst_124 {dimension_numbers = #tpu.dot_dimension_numbers<[1], [0], [0], [1], [0, 0, 1, 1], [], []>} : vector<16x28xf32>, vector<28x256xf32>, vector<16x256xf32> -> vector<16x256xf32>
    %270 = arith.addf %263, %269 : vector<16x256xf32>
    %c0_125 = arith.constant 0 : index
    %c0_126 = arith.constant 0 : index
    %271 = vector.load %arg9[%c0_125, %c0_126] : memref<16x1xf32, #tpu.memory_space<vmem>>, vector<16x1xf32>
    %272 = vector.broadcast %271 : vector<16x1xf32> to vector<16x256xf32>
    %273 = arith.addf %270, %272 : vector<16x256xf32>
    %274 = arith.negf %273 : vector<16x256xf32>
    %275 = math.exp %274 : vector<16x256xf32>
    %cst_127 = arith.constant 1.000000e+00 : f32
    %276 = vector.broadcast %cst_127 : f32 to vector<16x256xf32>
    %277 = arith.addf %276, %275 : vector<16x256xf32>
    %278 = arith.divf %276, %277 : vector<16x256xf32>
    %279 = arith.mulf %14, %278 : vector<16x256xf32>
    %c0_128 = arith.constant 0 : index
    %c0_129 = arith.constant 0 : index
    %c0_130 = arith.constant 0 : index
    %280 = vector.load %arg10[%c0_128, %c0_129, %c0_130] : memref<1x16x256xf32, #tpu.memory_space<vmem>>, vector<1x16x256xf32>
    %281 = vector.shape_cast %280 : vector<1x16x256xf32> to vector<16x256xf32>
    %282 = vector.shape_cast %279 : vector<16x256xf32> to vector<1x16x256xf32>
    tpu.vector_store %arg10[%c0_128, %c0_129, %c0_130], %282 {strides = array<i32>} : memref<1x16x256xf32, #tpu.memory_space<vmem>>, vector<1x16x256xf32>,
    return
  }
  func.func @transform_0(%arg0: i32) -> (i32, i32, i32) {
    %c0_i32 = arith.constant 0 : i32
    %c0_i32_0 = arith.constant 0 : i32
    %c0_i32_1 = arith.constant 0 : i32
    return %arg0, %c0_i32, %c0_i32_0 : i32, i32, i32
  }
  func.func @transform_1(%arg0: i32) -> (i32, i32) {
    %c0_i32 = arith.constant 0 : i32
    %c0_i32_0 = arith.constant 0 : i32
    %c0_i32_1 = arith.constant 0 : i32
    return %c0_i32, %c0_i32_0 : i32, i32
  }
  func.func @transform_2(%arg0: i32) -> (i32, i32) {
    %c0_i32 = arith.constant 0 : i32
    %c0_i32_0 = arith.constant 0 : i32
    %c0_i32_1 = arith.constant 0 : i32
    return %c0_i32, %c0_i32_0 : i32, i32
  }
  func.func @transform_3(%arg0: i32) -> (i32, i32) {
    %c0_i32 = arith.constant 0 : i32
    %c0_i32_0 = arith.constant 0 : i32
    %c0_i32_1 = arith.constant 0 : i32
    return %c0_i32, %c0_i32_0 : i32, i32
  }
  func.func @transform_4(%arg0: i32) -> (i32, i32) {
    %c0_i32 = arith.constant 0 : i32
    %c0_i32_0 = arith.constant 0 : i32
    %c0_i32_1 = arith.constant 0 : i32
    return %c0_i32, %c0_i32_0 : i32, i32
  }
  func.func @transform_5(%arg0: i32) -> (i32, i32, i32) {
    %c0_i32 = arith.constant 0 : i32
    %c0_i32_0 = arith.constant 0 : i32
    %c0_i32_1 = arith.constant 0 : i32
    %c0_i32_2 = arith.constant 0 : i32
    return %c0_i32, %c0_i32_0, %c0_i32_1 : i32, i32, i32
  }
  func.func @transform_6(%arg0: i32) -> (i32, i32) {
    %c0_i32 = arith.constant 0 : i32
    %c0_i32_0 = arith.constant 0 : i32
    %c0_i32_1 = arith.constant 0 : i32
    return %c0_i32, %c0_i32_0 : i32, i32
  }
  func.func @transform_7(%arg0: i32) -> (i32, i32, i32) {
    %c0_i32 = arith.constant 0 : i32
    %c0_i32_0 = arith.constant 0 : i32
    %c0_i32_1 = arith.constant 0 : i32
    %c0_i32_2 = arith.constant 0 : i32
    return %c0_i32, %c0_i32_0, %c0_i32_1 : i32, i32, i32
  }
  func.func @transform_8(%arg0: i32) -> (i32, i32) {
    %c0_i32 = arith.constant 0 : i32
    %c0_i32_0 = arith.constant 0 : i32
    %c0_i32_1 = arith.constant 0 : i32
    return %c0_i32, %c0_i32_0 : i32, i32
  }
  func.func @transform_9(%arg0: i32) -> (i32, i32, i32) {
    %c0_i32 = arith.constant 0 : i32
    %c0_i32_0 = arith.constant 0 : i32
    %c0_i32_1 = arith.constant 0 : i32
    return %arg0, %c0_i32, %c0_i32_0 : i32, i32, i32
  }
}

</mosaic_0001>

<bundles_post_ra>
// kernel: tpu_custom_call.1
= control target key start
LH: loop header
LB: loop body
LE: loop exit
PB: predicated region body
PF: predicated region fallthrough
CT: control target
= control target key end

     0   :  { %s5315_s0 = inlined_call_operand.hbm [shape: f32[2,16,256], index: 0, kind: input, shape index: {}]   ;;  %s5316_s1 = inlined_call_operand.vmem [shape: f32[4,16], index: 1, kind: input, shape index: {}]   ;;  %s5317_s2 = inlined_call_operand.vmem [shape: f32[4,1], index: 2, kind: input, shape index: {}]   ;;  %s5318_s3 = inlined_call_operand.vmem [shape: f32[16,4], index: 3, kind: input, shape index: {}]   ;;  %s5319_s4 = inlined_call_operand.vmem [shape: f32[16,1], index: 4, kind: input, shape index: {}]   ;;  %s5320_s5 = inlined_call_operand.vmem [shape: f32[7,4,112], index: 5, kind: input, shape index: {}]   ;;  %s5321_s6 = inlined_call_operand.vmem [shape: f32[4,1], index: 6, kind: input, shape index: {}]   ;;  %s5322_s7 = inlined_call_operand.hbm [shape: f32[7,16,28], index: 7, kind: input, shape index: {}]   ;;  %s5323_s8 = inlined_call_operand.vmem [shape: f32[16,1], index: 8, kind: input, shape index: {}]   ;;  %s5324_s9 = inlined_call_operand.hbm [shape: f32[2,16,256], index: 9, kind: output, shape index: {}]  }
   0x1   :  { %5416 = sst [smem:[#allocation77_spill]] %s5322_s7 }
   0x2   :  { %14 = vsyncpa [#allocation3], 0 }
   0x3   :  { %16 = vsyncpa [#allocation3 + $0x1], 0 }
   0x4   :  { %17 = vsyncpa [#allocation6], 0 }
   0x5   :  { %18 = vsyncpa [#allocation4], 0 }
   0x6   :  { %20 = vsyncpa [#allocation4 + $0x1], 0  ;;  %s3489_s30 = smov 0   ;;  %s3491_s10 = smov 0  }
   0x7   :  { %s3493_s11 = smov 0   ;;  %s3495_s12 = smov 0  }
   0x8 LB: > { %5417 = sst [smem:[#allocation11_spill]] %s3414_s11  ;;  %s3510_s13 = sadd.s32 4294967295, %s3418_s12   ;;  %s3418_s12 = sphi %s3495_s12, %s5638_s12   ;;  %s3414_s11 = sphi %s3493_s11, %s5637_s11   ;;  %s3410_s10 = sphi %s3491_s10, %s5636_s10   ;;  %s3406_s30 = sphi %s3489_s30, %s5635_s30  }
   0x9   : > { %s2685_s14 = sadd.s32 4294967294, %s3418_s12   ;;  %p46_p0 = scmp.ne.s32.totalorder %s3410_s10, %s3406_s30 }
   0xa   : > { %p47_p1 = scmp.eq.s32.totalorder %s3510_s13, 0  ;;  %p238_p2 = scmp.eq.s32.totalorder %s3510_s13, 1 }
   0xb   : > { %p244_p3 = scmp.eq.s32.totalorder %s2685_s14, 1  ;;  %p2686_p5 = scmp.ge.s32.totalorder %s3418_s12, 1 }
   0xc   : > { %p3519_p4 = por %p47_p1, %p46_p0  ;;  %p251_p7 = scmp.lt.s32.totalorder %s3418_s12, 3 }
   0xd   : > { %p3524_p6 = por %p244_p3, %p46_p0  ;;  %s5420_s7 = sld [smem:[#allocation77_spill]] }
   0xe   : > { %p3532_p8 = pnand %p2686_p5, %p251_p7  ;;  %s3420_s21 = smov [#allocation5]  }
   0xf   : > { %s282_s22 = sshll.u32 %s3420_s21, 4  ;;  %s3542_s23 = sadd.s32 1, %s3418_s12   ;;  %s283_s22 = int_to_ptr.vmem [resolvable:$true] %s282_s22 }
  0x10   : > { %p2962_p9 = pneg %p3532_p8  ;;  %s3421_s24 = smov 128  }
  0x11   : > { %s3422_s25 = smov 8   ;;  %s30_s26 = ssub.s32 %s3418_s12, %s3542_s23 }
  0x12   : > { %p2963_p10 = pnand %p2962_p9, %p47_p1  ;;  %s33_s27 = sadd.s32 1, %s3414_s11 }
  0x13   : > { %s280_s19 = sshll.u32 %s5420_s7, 4  ;;  %p31_p12 = scmp.eq.s32.totalorder %s30_s26, 0  ;;  %s281_s19 = int_to_ptr.hbm [resolvable:$true] %s280_s19 }
  0x14   : > { %2965 = dma.hbm_to_vmem [thread:$0]  (!%p2963_p10), %s281_s19, 1792, %s283_s22, [#allocation6], %s3421_s24, %s3421_s24, %s3422_s25  }
  0x15   : > { %p40_p13 = scmp.ne.s32.totalorder %s3414_s11, %s3410_s10  ;;  %p41_p0 = scmp.eq.s32.totalorder %s3418_s12, 0 }
  0x16   : > { %p2975_p3 = scmp.lt.s32.totalorder %s3418_s12, 2  ;;  %s299_s14 = sand.u32 1, %s3414_s11  }
  0x17   : > { %s3552_s28 = scalar_select %p31_p12, %s3414_s11, %s33_s27  }
  0x18   : > { %p42_p5 = por %p41_p0, %p40_p13  ;;  %p3556_p7 = por %p238_p2, %p40_p13 }
  0x19   : > { %5422 = sst [smem:[#allocation12_spill]] %s3552_s28  ;;  %s2952_s17 = sshll.u32 %s3418_s12, 5 }
  0x1a   : > { %s2689_s18 = sshll.u32 %s299_s14, 5  ;;  %s308_s22 = scalar_lea.hbm %s5315_s0, %s2952_s17 }
  0x1b   : > { %s309_s24 = sshll.u32 %s308_s22, 4  ;;  %s303_s25 = scalar_lea.vmem [#allocation2], %s2689_s18  ;;  %s310_s24 = int_to_ptr.hbm [resolvable:$true] %s309_s24 }
  0x1c   : > { %s311_s26 = sshll.u32 %s303_s25, 4  ;;  %p3567_p9 = pnand %p2975_p3, %p42_p5  ;;  %s312_s26 = int_to_ptr.vmem [resolvable:$true] %s311_s26 }
  0x1d   : > { %s300_s7 = scalar_lea.sflag [#allocation3], %s299_s14  ;;  %s3318_s28 = sshra.s32 %s310_s24, 4  ;;  %s3319_s28 = int_to_ptr.hbm [resolvable:$true] %s3318_s28 }
  0x1e   : > { %s3320_s11 = scalar_lea.hbm %s3319_s28, 32  ;;  %p3322_p10 = pneg %p3567_p9 }
  0x1f   : > { %p3321_p2 = scmp.ne.s32.totalorder %s3319_s28, %s3320_s11  ;;  %s3325_s21 = scalar_lea.hbm %s5315_s0, 64 }
  0x20   : > { %p3326_p0 = scmp.lt.s32.totalorder %s3319_s28, %s5315_s0  ;;  %p3327_p3 = scmp.lt.s32.totalorder %s3325_s21, %s3320_s11 }
  0x21   : > { %p3323_p12 = pnand %p3322_p10, %p3321_p2 }
  0x22   : > { %p3328_p5 = por %p3327_p3, %p3326_p0 }
  0x23   : > { %p3324_p13 = pneg %p3323_p12 }
  0x25   : > { %p3329_p11 = pnand %p3328_p5, %p3324_p13 }
  0x27   : > { %3332 = shalt.err (!%p3329_p11)
}
  0x28   : > { %s3423_s14 = smov 256   ;;  %s3424_s25 = smov 16  }
  0x29   : > { %2969 = dma.hbm_to_vmem [thread:$0]  (!%p3567_p9), %s310_s24, 512, %s312_s26, %s300_s7, %s3423_s14, %s3423_s14, %s3424_s25  }
  0x2a   : > { %323 = sbr.rel (%p3532_p8) target bundleno = 1520 (0x5f0), region = 56 }
  0x2f   : > { %s3584_s17 = sand.u32 1, %s3410_s10  }
  0x30   : > { %s5408_s28 = sshll.u32 %s3584_s17, 5  ;;  %s326_s11 = scalar_lea.sflag [#allocation3], %s3584_s17 }
  0x31   : > { %s329_s18 = scalar_lea.vmem [#allocation2], %s5408_s28 }
  0x32   : > { %3393 = dma.done.wait (%p3519_p4), %s326_s11, 512  }
  0x33   : > { %3395 = vsyncadd (%p3519_p4), %s326_s11, 4294966784 }
  0x34   : > { %3397 = dma.done.wait (%p47_p1), [#allocation6], 1792  }
  0x35   : > { %3399 = vsyncadd (%p47_p1), [#allocation6], 4294965504  ;;  %v3425_v0 = vmov 0   ;;  %v3598_v1 = vld [vmem:[%s329_s18 + $0x10] sm:$0xff]  ;;  %v3600_v2 = vld [vmem:[%s329_s18 + $0x18] sm:$0xff]  ;;  %vm5327_vm0 = vcmask 130048   ;;  %v505_v37 = vlaneseq }
  0x36   : > { %3029 = vset.pattern.permute.xlu0 %v3425_v0  ;;  %3030 = vset.pattern.permute.xlu1 %v3425_v0  ;;  %v370_v3 = vld [vmem:[%s329_s18] sm:$0xff]  ;;  %v371_v4 = vld [vmem:[%s329_s18 + $0x8] sm:$0xff]  ;;  %vm5326_vm1 = vcmask 1043456   ;;  %vm441_vm2 = vcmask 31744   ;;  %s3426_s18 = smov 1   ;;  %s3427_s7 = smov 3  }
  0x37   : > { %3271 = vset.pattern.permute.xlu2 %v3425_v0  ;;  %399 = vmatpush.msra.mxu0 %v3598_v1  ;;  %v374_v5 = vld [vmem:[%s5316_s1] sm:$0xf]  ;;  %v430_v8 = vld [vmem:[%s5319_s4 + $0x8] sm:$0xff]  ;;  %s3428_s15 = smov 2   ;;  %s3429_s20 = smov 127   ;;  %v506_v38 = vand.u32 127, %v505_v37 }
  0x38   : > { %419 = vmatpush.msra.mxu1 %v3600_v2  ;;  %v375_v6 = vld [vmem:[%s5317_s2] sm:$0xf]  ;;  %438 = vperm.xlu1 %3030, %v430_v8   ;;  %v428_v17 = vld [vmem:[%s5318_s3 + $0x8] sm:$0xff]  ;;  %s3430_s24 = smov 125   ;;  %s3431_s26 = smov 48   ;;  %vm5364_vm3 = vcmask 23552  }
  0x39   : > { %378 = vperm.xlu0 %3029, %v375_v6   ;;  %400 = vmatpush.msra.mxu0 %v370_v3  ;;  %v429_v7 = vld [vmem:[%s5319_s4] sm:$0xff]  ;;  %s3432_s27 = smov 126   ;;  %s3433_s21 = smov 32   ;;  %v512_v40 = vand.u32 15, %v506_v38  ;;  %vm5395_vm5 = vcmask 15360   ;;  %vm5405_vm7 = vcmask 7168  }
  0x3a   : > { %420 = vmatpush.msra.mxu1 %v371_v4  ;;  %2696 = vmatmul.msk.f32.vlgmr.msra.gmra.mxu0 %vm5327_vm0, %v374_v5  ;;  %v427_v16 = vld [vmem:[%s5318_s3] sm:$0xff]  ;;  %s5411_s19 = smov 96   ;;  %s3435_s22 = smov 112   ;;  %vm717_vm8 = vcmask 1022976   ;;  %vm5390_vm11 = vcmask 1039360   ;;  %vm5391_vm14 = vcmask 1031168  }
  0x3b   : > { %2697 = vmatmul.msk.f32.vlgmr.msra.gmra.mxu1 %vm5327_vm0, %v374_v5  ;;  %s3436_s14 = smov 16   ;;  %s5413_s25 = smov 80   ;;  %v3725_v41 = vadd.s32 4294967293, %v512_v40  ;;  %v3746_v47 = vadd.s32 4294967294, %v512_v40  ;;  %v3760_v53 = vadd.s32 3, %v512_v40  ;;  %v3762_v54 = vadd.s32 4294967295, %v512_v40 }
  0x3c   : > { %v3791_v62 = vadd.s32 1, %v512_v40  ;;  %v3795_v63 = vadd.s32 2, %v512_v40 }
  0x3d   : > { %5426 = vst [vmem:[#allocation14_spill] sm:$0xff] %v3725_v41  ;;  %vm534_vm4 = vcmp.ge.s32.totalorder %v3725_v41, 0  ;;  %vm542_vm6 = vcmp.ge.s32.totalorder %v3746_v47, 0  ;;  %vm5407_vm9 = vcmp.lt.s32.totalorder %v3760_v53, 16  ;;  %vm550_vm10 = vcmp.ge.s32.totalorder %v3762_v54, 0 }
  0x3e   : > { %5428 = vst [vmem:[#allocation16_spill] sm:$0xff] %v3746_v47  ;;  %vm5328_vm12 = vcmp.lt.s32.totalorder %v3791_v62, 16  ;;  %vm5329_vm13 = vcmp.lt.s32.totalorder %v3795_v63, 16 }
  0x3f   : > { %5430 = vst [vmem:[#allocation18_spill] sm:$0xff] %v3762_v54 }
  0x41   : > { %433 = vperm.xlu0 %3029, %v429_v7   ;;  %v507_v7 = vadd.s32 128, %v506_v38 }
  0xaa   : > { %v439_v25 = vpop.permute.xlu1 %438 }
  0xab   : > { %v379_v9 = vpop.permute.xlu0 %378 }
  0xb3   : > { %v434_v18 = vpop.permute.xlu0 %433 }
  0xb7   : > { %v402_v10 = vpop.f32.mrf.mxu0 }
  0xb8   : > { %v422_v11 = vpop.f32.mrf.mxu1  ;;  %v403_v12 = vadd.f32 %v402_v10, %v379_v9  ;;  %v519_v10 = vand.u32 15, %v507_v7 }
  0xb9   : > { %v423_v13 = vadd.f32 %v422_v11, %v379_v9 }
  0xba   : > { %v425_v14 = vmax.f32 %v403_v12, 0.0  ;;  %v3830_v11 = vadd.s32 1, %v519_v10 }
  0xbb   : > { %v426_v15 = vmax.f32 %v423_v13, 0.0 }
  0xbc   : > { %2698 = vmatpush.msk.msrb.mxu0 %vm5326_vm1, %v425_v14  ;;  %vm561_vm15 = vcmp.lt.s32.totalorder %v3830_v11, 16 }
  0xbd   : > { %2701 = vmatpush.msk.msrb.mxu1 %vm5326_vm1, %v426_v15  ;;  %2699 = vmatmul.msk.f32.vlgmr.msrb.gmra.mxu0 %vm441_vm2, %v427_v16 }
  0xbe   : > { %2702 = vmatmul.msk.f32.vlgmr.msrb.gmra.mxu1 %vm441_vm2, %v427_v16 }
  0xc5   : > { %2700 = vmatmul.msk.f32.gmra.mxu0 %vm441_vm2, %v428_v17 }
  0xc6   : > { %2703 = vmatmul.msk.f32.gmra.mxu1 %vm441_vm2, %v428_v17  ;;  %v3853_v17 = vadd.s32 3, %v519_v10 }
  0xc8   : > { %vm577_vm2 = vcmp.lt.s32.totalorder %v3853_v17, 16 }
 0x13a   : > { %v472_v19 = vpop.f32.mrf.mxu0 }
 0x13b   : > { %v495_v20 = vpop.f32.mrf.mxu1  ;;  %v473_v21 = vadd.f32 %v472_v19, %v434_v18 }
 0x13c   : > { %v496_v22 = vadd.f32 %v495_v20, %v434_v18 }
 0x13d   : > { %v3626_v23 = vmul.f32 %v473_v21, %v370_v3 }
 0x13e   : > { %v3628_v24 = vmul.f32 %v496_v22, %v371_v4  ;;  %v3870_v22 = vadd.s32 2, %v519_v10 }
 0x13f   : > { %584 = vrot.lane.b32.xlu1 %v3626_v23, %s3427_s7 }
 0x140   : > { %5425 = vst [vmem:[#allocation13_spill] sm:$0xff] %v3628_v24  ;;  %636 = vrot.lane.b32.xlu0 %v3628_v24, %s3426_s18  ;;  %586 = vrot.lane.b32.xlu2 %v3628_v24, %s3427_s7  ;;  %vm569_vm1 = vcmp.lt.s32.totalorder %v3870_v22, 16 }
 0x142   : > { %v475_v29 = vpop.f32.mrf.mxu0 }
 0x143   : > { %v498_v26 = vpop.f32.mrf.mxu1  ;;  %v476_v30 = vadd.f32 %v475_v29, %v439_v25 }
 0x144   : > { %v499_v27 = vadd.f32 %v498_v26, %v439_v25 }
 0x145   : > { %v3670_v31 = vmul.f32 %v476_v30, %v3598_v1 }
 0x146   : > { %v3661_v28 = vmul.f32 %v499_v27, %v3600_v2 }
 0x147   : > { %609 = vrot.lane.b32.xlu1 %v3626_v23, %s3428_s15  ;;  %v3046_v33 = vpack.i.bf16 %v3626_v23, %v3670_v31 }
 0x148   : > { %611 = vrot.lane.b32.xlu2 %v3628_v24, %s3428_s15  ;;  %659 = vrot.lane.b32.xlu0 %v3626_v23, %s3429_s20  ;;  %v3031_v32 = vpack.i.bf16 %v3661_v28, %v3628_v24  ;;  %v3041_v34 = vpack.i.bf16 %v3628_v24, %v3661_v28 }
 0x14f   : > { %661 = vrot.lane.b32.xlu1 %v3628_v24, %s3429_s20 }
 0x150   : > { %711 = vrot.lane.b32.xlu0 %v3628_v24, %s3430_s24  ;;  %634 = vrot.lane.b32.xlu2 %v3626_v23, %s3426_s18 }
 0x157   : > { %684 = vrot.lane.b32.xlu1 %v3626_v23, %s3432_s27 }
 0x158   : > { %782 = vrot.lane.b32.xlu0 %v3626_v23, %s3431_s26  ;;  %686 = vrot.lane.b32.xlu2 %v3628_v24, %s3432_s27 }
 0x15f   : > { %1465 = vrot.lane.b32.xlu1 %v3628_v24, %s5411_s19 }
 0x160   : > { %896 = vrot.lane.b32.xlu0 %v3626_v23, %s3433_s21  ;;  %709 = vrot.lane.b32.xlu2 %v3626_v23, %s3430_s24 }
 0x167   : > { %615 = vrot.lane.b32.xlu1 %v3661_v28, %s3428_s15 }
 0x168   : > { %1306 = vrot.lane.b32.xlu0 %v3628_v24, %s3435_s22  ;;  %1098 = vrot.lane.b32.xlu2 %v3626_v23, %s3436_s14 }
 0x16f   : > { %638 = vrot.lane.b32.xlu1 %v3670_v31, %s3426_s18 }
 0x170   : > { %590 = vrot.lane.b32.xlu0 %v3661_v28, %s3427_s7  ;;  %1625 = vrot.lane.b32.xlu2 %v3628_v24, %s5413_s25 }
 0x177   : > { %690 = vrot.lane.b32.xlu1 %v3661_v28, %s3432_s27 }
 0x178   : > { %613 = vrot.lane.b32.xlu0 %v3670_v31, %s3428_s15  ;;  %588 = vrot.lane.b32.xlu2 %v3670_v31, %s3427_s7 }
 0x17f   : > { %713 = vrot.lane.b32.xlu1 %v3670_v31, %s3430_s24 }
 0x180   : > { %665 = vrot.lane.b32.xlu0 %v3661_v28, %s3429_s20  ;;  %640 = vrot.lane.b32.xlu2 %v3661_v28, %s3426_s18 }
 0x187   : > { %3032 = vrot.lane.b32.xlu1 %v3031_v32, %s3431_s26 }
 0x188   : > { %688 = vrot.lane.b32.xlu0 %v3670_v31, %s3432_s27  ;;  %663 = vrot.lane.b32.xlu2 %v3670_v31, %s3429_s20 }
 0x18f   : > { %3037 = vrot.lane.b32.xlu1 %v3031_v32, %s3433_s21 }
 0x190   : > { %1102 = vrot.lane.b32.xlu0 %v3670_v31, %s3436_s14  ;;  %715 = vrot.lane.b32.xlu2 %v3661_v28, %s3430_s24 }
 0x197   : > { %3042 = vrot.lane.b32.xlu1 %v3041_v34, %s3436_s14  ;;  %v3904_v34 = vadd.s32 4294967295, %v519_v10 }
 0x198   : > { %3047 = vrot.lane.b32.xlu0 %v3046_v33, %s3435_s22  ;;  %786 = vrot.lane.b32.xlu2 %v3670_v31, %s3431_s26 }
 0x199   : > { %5437 = vst [vmem:[#allocation25_spill] sm:$0xff] %v3904_v34  ;;  %vm551_vm0 = vcmp.ge.s32.totalorder %v3904_v34, 0 }
 0x19a   : > { %v3710_v35 = vpop.permute.xlu2 %586 }
 0x19f   : > { %1310 = vrot.lane.b32.xlu1 %v3661_v28, %s3435_s22 }
 0x1a0   : > { %1469 = vrot.lane.b32.xlu0 %v3661_v28, %s5411_s19  ;;  %900 = vrot.lane.b32.xlu2 %v3670_v31, %s3433_s21 }
 0x1a2   : > { %v3718_v36 = vpop.permute.xlu2 %611 }
 0x1a7   : > { %3052 = vrot.lane.b32.xlu1 %v3046_v33, %s5413_s25 }
 0x1a8   : > { %1629 = vrot.lane.b32.xlu2 %v3661_v28, %s5413_s25 }
 0x1aa   : > { %v3723_v39 = vpop.permute.xlu2 %634 }
 0x1ab   : > { %v3770_v55 = vsel %vm5405_vm7, 0.0, %v3723_v39 }
 0x1ac   : > { %5431 = vst [vmem:[#allocation19_spill] sm:$0xff] %v3770_v55  ;;  %v3785_v61 = vsel %vm550_vm10, %v3770_v55, 0.0 }
 0x1b0   : > { %3057 = vrot.lane.b32.xlu2 %v3046_v33, %s5411_s19 }
 0x1b1   : > { %v3733_v44 = vpop.permute.xlu1 %584 }
 0x1b2   : > { %v3728_v42 = vpop.permute.xlu0 %636  ;;  %v3730_v43 = vpop.permute.xlu2 %686  ;;  %v3737_v45 = vsel %vm5364_vm3, 0.0, %v3733_v44 }
 0x1b3   : > { %5427 = vst [vmem:[#allocation15_spill] sm:$0xff] %v3737_v45  ;;  %v3742_v46 = vsel %vm534_vm4, %v3737_v45, 0.0  ;;  %v3883_v26 = vsel %vm5391_vm14, %v3730_v43, 0.0  ;;  %v3918_v38 = vsel %vm5405_vm7, %v3723_v39, %v3728_v42 }
 0x1b4   : > { %758 = vrot.lane.b32.xlu0 %v3742_v46, %s3431_s26  ;;  %v3890_v29 = vsel %vm569_vm1, %v3883_v26, 0.0  ;;  %5438 = vst [vmem:[#allocation26_spill] sm:$0xff] %v3918_v38 }
 0x1b9   : > { %v3749_v50 = vpop.permute.xlu1 %609 }
 0x1ba   : > { %v660_v48 = vpop.permute.xlu0 %659  ;;  %v710_v49 = vpop.permute.xlu2 %709  ;;  %v3753_v51 = vsel %vm5395_vm5, 0.0, %v3749_v50  ;;  %v3939_v39 = vsel %vm5395_vm5, %v3749_v50, %v3718_v36  ;;  %v3966_v36 = vsel %vm5364_vm3, %v3733_v44, %v3710_v35 }
 0x1bb   : > { %5429 = vst [vmem:[#allocation17_spill] sm:$0xff] %v3753_v51  ;;  %v3758_v52 = vsel %vm542_vm6, %v3753_v51, 0.0 }
 0x1bc   : > { %766 = vrot.lane.b32.xlu0 %v3758_v52, %s3431_s26  ;;  %5440 = vst [vmem:[#allocation28_spill] sm:$0xff] %v3939_v39 }
 0x1bd   : > { %5444 = vst [vmem:[#allocation32_spill] sm:$0xff] %v3966_v36 }
 0x1c1   : > { %v662_v59 = vpop.permute.xlu1 %661 }
 0x1c2   : > { %v712_v56 = vpop.permute.xlu0 %711  ;;  %v3772_v57 = vpop.permute.xlu2 %1098  ;;  %v3799_v0 = vsel %vm5390_vm11, %v660_v48, %v662_v59  ;;  %v3842_v13 = vsel %vm5390_vm11, %v662_v59, 0.0  ;;  %v3927_v48 = vadd.s32 4294967294, %v519_v10 }
 0x1c3   : > { %5432 = vst [vmem:[#allocation20_spill] sm:$0xff] %v3772_v57  ;;  %v3775_v58 = vsel %vm717_vm8, %v710_v49, %v712_v56  ;;  %v3813_v5 = vsel %vm5328_vm12, %v3799_v0, 0.0  ;;  %v3851_v16 = vsel %vm561_vm15, %v3842_v13, 0.0  ;;  %v3863_v19 = vsel %vm717_vm8, %v712_v56, 0.0 }
 0x1c4   : > { %v3780_v60 = vsel %vm5407_vm9, %v3775_v58, 0.0  ;;  %774 = vrot.lane.b32.xlu0 %v3785_v61, %s3431_s26  ;;  %v3868_v20 = vsel %vm577_vm2, %v3863_v19, 0.0  ;;  %5439 = vst [vmem:[#allocation27_spill] sm:$0xff] %v3927_v48  ;;  %vm543_vm12 = vcmp.ge.s32.totalorder %v3927_v48, 0  ;;  %v3943_v56 = vadd.s32 4294967293, %v519_v10 }
 0x1c5   : > { %1122 = vrot.lane.b32.xlu2 %v3780_v60, %s3436_s14  ;;  %920 = vrot.lane.b32.xlu1 %v3780_v60, %s3433_s21 }
 0x1c6   : > { %5441 = vst [vmem:[#allocation29_spill] sm:$0xff] %v3943_v56 }
 0x1c9   : > { %v685_v3 = vpop.permute.xlu1 %684 }
 0x1ca   : > { %v3801_v1 = vpop.permute.xlu0 %782  ;;  %v3803_v2 = vpop.permute.xlu2 %1625  ;;  %v3808_v4 = vsel %vm5391_vm14, %v685_v3, %v3730_v43  ;;  %v3925_v43 = vsel %vm551_vm0, %v3918_v38, 0.0  ;;  %v3950_v3 = vsel %vm543_vm12, %v3939_v39, 0.0 }
 0x1cb   : > { %5433 = vst [vmem:[#allocation21_spill] sm:$0xff] %v3803_v2  ;;  %v3818_v6 = vsel %vm5329_vm13, %v3808_v4, 0.0  ;;  %vm5409_vm13 = vcmp.ge.s32.totalorder %v3943_v56, 0 }
 0x1cc   : > { %790 = vrot.lane.b32.xlu0 %v3813_v5, %s3431_s26 }
 0x1cd   : > { %1082 = vrot.lane.b32.xlu1 %v3758_v52, %s3436_s14  ;;  %1114 = vrot.lane.b32.xlu2 %v3818_v6, %s3436_s14 }
 0x1d1   : > { %v3832_v12 = vpop.permute.xlu1 %1465 }
 0x1d2   : > { %v3826_v8 = vpop.permute.xlu0 %896  ;;  %v3828_v9 = vpop.permute.xlu2 %588  ;;  %5435 = vst [vmem:[#allocation23_spill] sm:$0xff] %v3832_v12 }
 0x1d3   : > { %5434 = vst [vmem:[#allocation22_spill] sm:$0xff] %v3826_v8  ;;  %v4050_v45 = vsel %vm5364_vm3, 0.0, %v3828_v9 }
 0x1d4   : > { %798 = vrot.lane.b32.xlu0 %v3818_v6, %s3431_s26  ;;  %5456 = vst [vmem:[#allocation44_spill] sm:$0xff] %v4050_v45 }
 0x1d5   : > { %1074 = vrot.lane.b32.xlu1 %v3742_v46, %s3436_s14  ;;  %1106 = vrot.lane.b32.xlu2 %v3813_v5, %s3436_s14 }
 0x1d9   : > { %v616_v18 = vpop.permute.xlu1 %615 }
 0x1da   : > { %v3844_v14 = vpop.permute.xlu0 %1306  ;;  %v3846_v15 = vpop.permute.xlu2 %640 }
 0x1db   : > { %5436 = vst [vmem:[#allocation24_spill] sm:$0xff] %v3844_v14 }
 0x1dc   : > { %806 = vrot.lane.b32.xlu0 %v3780_v60, %s3431_s26 }
 0x1dd   : > { %1314 = vrot.lane.b32.xlu1 %v3851_v16, %s3435_s22  ;;  %1090 = vrot.lane.b32.xlu2 %v3785_v61, %s3436_s14 }
 0x1e1   : > { %v3885_v27 = vpop.permute.xlu1 %638 }
 0x1e2   : > { %v591_v21 = vpop.permute.xlu0 %590  ;;  %v3872_v25 = vpop.permute.xlu2 %663 }
 0x1e3   : > { %v3954_v7 = vsel %vm5364_vm3, %v3828_v9, %v591_v21  ;;  %v3978_v21 = vsel %vm5409_vm13, %v3966_v36, 0.0  ;;  %vm5462_vm3 = vcmp.lt.s32.totalorder %v3795_v63, 16 }
 0x1e4   : > { %872 = vrot.lane.b32.xlu0 %v3742_v46, %s3433_s21  ;;  %5443 = vst [vmem:[#allocation31_spill] sm:$0xff] %v3954_v7  ;;  %v3973_v10 = vsel %vm5409_vm13, %v3954_v7, 0.0 }
 0x1e5   : > { %1489 = vrot.lane.b32.xlu1 %v3868_v20, %s5411_s19  ;;  %1330 = vrot.lane.b32.xlu2 %v3868_v20, %s3435_s22  ;;  %5445 = vst [vmem:[#allocation33_spill] sm:$0xff] %v3978_v21  ;;  %v3982_v2 = vpack.i.bf16 %v3973_v10, %v3978_v21 }
 0x1e9   : > { %v3902_v33 = vpop.permute.xlu1 %690 }
 0x1ea   : > { %v3894_v30 = vpop.permute.xlu0 %613  ;;  %v3900_v32 = vpop.permute.xlu2 %715 }
 0x1eb   : > { %v3988_v35 = vsel %vm5395_vm5, %v3894_v30, %v616_v18  ;;  %v4101_v38 = vsel %vm717_vm8, %v3900_v32, 0.0 }
 0x1ec   : > { %880 = vrot.lane.b32.xlu0 %v3758_v52, %s3433_s21  ;;  %5447 = vst [vmem:[#allocation35_spill] sm:$0xff] %v3988_v35  ;;  %v4001_v14 = vsel %vm543_vm12, %v3988_v35, 0.0  ;;  %v4065_v35 = vsel %vm5391_vm14, %v3902_v33, 0.0 }
 0x1ed   : > { %1481 = vrot.lane.b32.xlu1 %v3890_v29, %s5411_s19  ;;  %1322 = vrot.lane.b32.xlu2 %v3890_v29, %s3435_s22  ;;  %v3066_v18 = vpack.i.bf16 %v4001_v14, %v3950_v3 }
 0x1f1   : > { %v714_v49 = vpop.permute.xlu1 %713 }
 0x1f2   : > { %v3912_v37 = vpop.permute.xlu0 %665  ;;  %v3920_v40 = vpop.permute.xlu2 %786  ;;  %v4054_v39 = vsel %vm717_vm8, %v714_v49, %v3900_v32  ;;  %v4082_v49 = vsel %vm569_vm1, %v4065_v35, 0.0 }
 0x1f3   : > { %v4070_v9 = vsel %vm5407_vm9, %v4054_v39, 0.0  ;;  %v3081_v8 = vpack.i.bf16 %v4082_v49, %v3890_v29  ;;  %v4154_v34 = vsel %vm5390_vm11, %v3872_v25, %v3912_v37 }
 0x1f4   : > { %888 = vrot.lane.b32.xlu0 %v3785_v61, %s3433_s21 }
 0x1f5   : > { %1473 = vrot.lane.b32.xlu1 %v3851_v16, %s5411_s19  ;;  %1649 = vrot.lane.b32.xlu2 %v3868_v20, %s5413_s25 }
 0x1f9   : > { %v3968_v50 = vpop.permute.xlu1 %3032 }
 0x1fa   : > { %v3941_v42 = vpop.permute.xlu0 %688  ;;  %v3945_v59 = vpop.permute.xlu2 %900 }
 0x1fb   : > { %5442 = vst [vmem:[#allocation30_spill] sm:$0xff] %v3945_v59  ;;  %v4126_v32 = vsel %vm5391_vm14, %v3941_v42, %v3902_v33 }
 0x1fc   : > { %904 = vrot.lane.b32.xlu0 %v3813_v5, %s3433_s21 }
 0x1fd   : > { %1457 = vrot.lane.b32.xlu1 %v3925_v43, %s5411_s19  ;;  %1641 = vrot.lane.b32.xlu2 %v3890_v29, %s5413_s25 }
 0x201   : > { %v4003_v57 = vpop.permute.xlu1 %3037 }
 0x202   : > { %v3984_v12 = vpop.permute.xlu0 %1102  ;;  %v3990_v44 = vpop.permute.xlu2 %1629  ;;  %5449 = vst [vmem:[#allocation37_spill] sm:$0xff] %v4003_v57 }
 0x203   : > { %5446 = vst [vmem:[#allocation34_spill] sm:$0xff] %v3984_v12 }
 0x204   : > { %912 = vrot.lane.b32.xlu0 %v3818_v6, %s3433_s21  ;;  %5448 = vst [vmem:[#allocation36_spill] sm:$0xff] %v3990_v44  ;;  %v4010_v44 = vsel %vm5405_vm7, %v3885_v27, %v3846_v15 }
 0x205   : > { %1449 = vrot.lane.b32.xlu1 %v3950_v3, %s5411_s19  ;;  %1633 = vrot.lane.b32.xlu2 %v3851_v16, %s5413_s25  ;;  %5450 = vst [vmem:[#allocation38_spill] sm:$0xff] %v4010_v44  ;;  %v4024_v57 = vsel %vm551_vm0, %v4010_v44, 0.0 }
 0x206   : > { %v3071_v15 = vpack.i.bf16 %v4024_v57, %v3925_v43 }
 0x209   : > { %v4026_v56 = vpop.permute.xlu1 %3042 }
 0x20a   : > { %v4013_v12 = vpop.permute.xlu0 %3047  ;;  %v4019_v36 = vpop.permute.xlu2 %3057  ;;  %5453 = vst [vmem:[#allocation41_spill] sm:$0xff] %v4026_v56 }
 0x20b   : > { %5451 = vst [vmem:[#allocation39_spill] sm:$0xff] %v4013_v12  ;;  %v4032_v12 = vsel %vm5390_vm11, %v3912_v37, 0.0  ;;  %vm5410_vm11 = vcmask 261120  }
 0x20c   : > { %1298 = vrot.lane.b32.xlu0 %v3925_v43, %s3435_s22  ;;  %5452 = vst [vmem:[#allocation40_spill] sm:$0xff] %v4019_v36  ;;  %v4044_v56 = vsel %vm561_vm15, %v4032_v12, 0.0  ;;  %vm4317_vm14 = vmneg %vm5410_vm11 }
 0x20d   : > { %3062 = vrot.lane.b32.xlu1 %v3982_v2, %s3431_s26  ;;  %1617 = vrot.lane.b32.xlu2 %v3925_v43, %s5413_s25  ;;  %v3076_v48 = vpack.i.bf16 %v4044_v56, %v3851_v16 }
 0x212   : > { %v4046_v7 = vpop.permute.xlu0 %1469 }
 0x213   : > { %5455 = vst [vmem:[#allocation43_spill] sm:$0xff] %v4046_v7  ;;  %v4072_v7 = vpop.permute.xlu1 %1310 }
 0x214   : > { %1290 = vrot.lane.b32.xlu0 %v3950_v3, %s3435_s22  ;;  %5457 = vst [vmem:[#allocation45_spill] sm:$0xff] %v4072_v7  ;;  %v4090_v7 = vsel %vm5395_vm5, 0.0, %v3894_v30 }
 0x215   : > { %3067 = vrot.lane.b32.xlu1 %v3066_v18, %s3431_s26  ;;  %1609 = vrot.lane.b32.xlu2 %v3950_v3, %s5413_s25  ;;  %5459 = vst [vmem:[#allocation47_spill] sm:$0xff] %v4090_v7  ;;  %v4097_v51 = vsel %vm542_vm6, %v4090_v7, 0.0 }
 0x21b   : > { %v4108_v30 = vpop.permute.xlu1 %3052 }
 0x21c   : > { %1282 = vrot.lane.b32.xlu0 %v3978_v21, %s3435_s22  ;;  %5460 = vst [vmem:[#allocation48_spill] sm:$0xff] %v4108_v30 }
 0x21d   : > { %3072 = vrot.lane.b32.xlu1 %v3071_v15, %s3431_s26  ;;  %1601 = vrot.lane.b32.xlu2 %v3978_v21, %s5413_s25 }
 0x21f   : > { %v4039_v36 = vpop.permute.xlu2 %1122 }
 0x220   : > { %5454 = vst [vmem:[#allocation42_spill] sm:$0xff] %v4039_v36  ;;  %v4061_v36 = vsel %vm534_vm4, %v4050_v45, 0.0 }
 0x224   : > { %924 = vrot.lane.b32.xlu0 %v4070_v9, %s3433_s21 }
 0x225   : > { %3077 = vrot.lane.b32.xlu1 %v3076_v48, %s3431_s26  ;;  %762 = vrot.lane.b32.xlu2 %v4061_v36, %s3431_s26 }
 0x226   : > { %v4084_v41 = vpop.permute.xlu0 %758 }
 0x227   : > { %v4086_v45 = vpop.permute.xlu2 %1114 }
 0x228   : > { %5458 = vst [vmem:[#allocation46_spill] sm:$0xff] %v4086_v45  ;;  %v4113_v45 = vsel %vm577_vm2, %v4101_v38, 0.0 }
 0x229   : > { %v3086_v30 = vpack.i.bf16 %v4113_v45, %v3868_v20 }
 0x22c   : > { %1126 = vrot.lane.b32.xlu0 %v4070_v9, %s3436_s14 }
 0x22d   : > { %3082 = vrot.lane.b32.xlu1 %v3081_v8, %s3431_s26  ;;  %770 = vrot.lane.b32.xlu2 %v4097_v51, %s3431_s26  ;;  %v4121_v8 = vsel %vm5405_vm7, 0.0, %v3885_v27  ;;  %vm5495_vm7 = vcmp.lt.s32.totalorder %v3795_v63, 16 }
 0x22e   : > { %v4115_v59 = vpop.permute.xlu0 %766  ;;  %v4133_v7 = vsel %vm550_vm10, %v4121_v8, 0.0 }
 0x22f   : > { %v4117_v47 = vpop.permute.xlu2 %1106 }
 0x230   : > { %5461 = vst [vmem:[#allocation49_spill] sm:$0xff] %v4117_v47  ;;  %v4138_v47 = vsel %vm5462_vm3, %v4126_v32, 0.0  ;;  %vm5465_vm3 = vcmp.lt.s32.totalorder %v3791_v62, 16 }
 0x234   : > { %1118 = vrot.lane.b32.xlu0 %v4138_v47, %s3436_s14 }
 0x235   : > { %3087 = vrot.lane.b32.xlu1 %v3086_v30, %s3431_s26  ;;  %778 = vrot.lane.b32.xlu2 %v4133_v7, %s3431_s26  ;;  %v682_v30 = vsel %vm5465_vm3, %v4154_v34, 0.0  ;;  %vm5406_vm3 = vcmask 392192  }
 0x236   : > { %v4147_v33 = vpop.permute.xlu0 %774  ;;  %vm4346_vm5 = vmneg %vm5406_vm3 }
 0x237   : > { %v4145_v27 = vpop.permute.xlu1 %920  ;;  %v4149_v42 = vpop.permute.xlu2 %1090 }
 0x238   : > { %5463 = vst [vmem:[#allocation50_spill] sm:$0xff] %v4145_v27 }
 0x239   : > { %5464 = vst [vmem:[#allocation51_spill] sm:$0xff] %v4149_v42 }
 0x23c   : > { %1110 = vrot.lane.b32.xlu0 %v682_v30, %s3436_s14 }
 0x23d   : > { %3092 = vrot.lane.b32.xlu1 %v3982_v2, %s3433_s21  ;;  %794 = vrot.lane.b32.xlu2 %v682_v30, %s3431_s26 }
 0x23e   : > { %v4165_v55 = vpop.permute.xlu0 %790 }
 0x23f   : > { %v4163_v44 = vpop.permute.xlu1 %1082  ;;  %v4167_v42 = vpop.permute.xlu2 %1330 }
 0x240   : > { %5466 = vst [vmem:[#allocation52_spill] sm:$0xff] %v4163_v44 }
 0x241   : > { %5467 = vst [vmem:[#allocation53_spill] sm:$0xff] %v4167_v42 }
 0x244   : > { %1094 = vrot.lane.b32.xlu0 %v4133_v7, %s3436_s14 }
 0x245   : > { %3097 = vrot.lane.b32.xlu1 %v3066_v18, %s3433_s21  ;;  %802 = vrot.lane.b32.xlu2 %v4138_v47, %s3431_s26 }
 0x246   : > { %v4178_v37 = vpop.permute.xlu0 %798 }
 0x247   : > { %v4174_v25 = vpop.permute.xlu1 %1074  ;;  %v4176_v2 = vpop.permute.xlu2 %1322 }
 0x248   : > { %5468 = vst [vmem:[#allocation54_spill] sm:$0xff] %v4174_v25 }
 0x249   : > { %5469 = vst [vmem:[#allocation55_spill] sm:$0xff] %v4176_v2 }
 0x24c   : > { %1086 = vrot.lane.b32.xlu0 %v4097_v51, %s3436_s14 }
 0x24d   : > { %3102 = vrot.lane.b32.xlu1 %v3071_v15, %s3433_s21  ;;  %810 = vrot.lane.b32.xlu2 %v4070_v9, %s3431_s26 }
 0x24e   : > { %v4189_v44 = vpop.permute.xlu0 %806 }
 0x24f   : > { %v4185_v18 = vpop.permute.xlu1 %1314  ;;  %v4187_v42 = vpop.permute.xlu2 %1649 }
 0x250   : > { %5470 = vst [vmem:[#allocation56_spill] sm:$0xff] %v4185_v18  ;;  %v3111_v18 = vpack.i.bf16 %v4113_v45, %v3890_v29 }
 0x251   : > { %5471 = vst [vmem:[#allocation57_spill] sm:$0xff] %v4187_v42 }
 0x254   : > { %1334 = vrot.lane.b32.xlu0 %v4113_v45, %s3435_s22 }
 0x255   : > { %3107 = vrot.lane.b32.xlu1 %v3076_v48, %s3433_s21  ;;  %876 = vrot.lane.b32.xlu2 %v4061_v36, %s3433_s21 }
 0x256   : > { %v4200_v25 = vpop.permute.xlu0 %872 }
 0x257   : > { %v4196_v15 = vpop.permute.xlu1 %1489  ;;  %v4198_v2 = vpop.permute.xlu2 %1641  ;;  %5474 = vst [vmem:[#allocation60_spill] sm:$0xff] %v4200_v25 }
 0x258   : > { %5472 = vst [vmem:[#allocation58_spill] sm:$0xff] %v4196_v15 }
 0x259   : > { %5473 = vst [vmem:[#allocation59_spill] sm:$0xff] %v4198_v2  ;;  %v3121_v2 = vpack.i.bf16 %v3868_v20, %v4113_v45 }
 0x25c   : > { %1078 = vrot.lane.b32.xlu0 %v4061_v36, %s3436_s14 }
 0x25d   : > { %3112 = vrot.lane.b32.xlu1 %v3111_v18, %s3433_s21  ;;  %884 = vrot.lane.b32.xlu2 %v4097_v51, %s3433_s21 }
 0x25e   : > { %v4213_v15 = vpop.permute.xlu0 %880 }
 0x25f   : > { %v4209_v48 = vpop.permute.xlu1 %1481  ;;  %v4211_v42 = vpop.permute.xlu2 %1633  ;;  %5477 = vst [vmem:[#allocation63_spill] sm:$0xff] %v4213_v15  ;;  %v4231_v15 = vpack.i.bf16 %v3813_v5, %v682_v30 }
 0x260   : > { %5475 = vst [vmem:[#allocation61_spill] sm:$0xff] %v4209_v48 }
 0x261   : > { %5476 = vst [vmem:[#allocation62_spill] sm:$0xff] %v4211_v42  ;;  %v3126_v42 = vpack.i.bf16 %v3890_v29, %v4082_v49 }
 0x264   : > { %1326 = vrot.lane.b32.xlu0 %v4082_v49, %s3435_s22 }
 0x265   : > { %3122 = vrot.lane.b32.xlu1 %v3121_v2, %s3436_s14  ;;  %892 = vrot.lane.b32.xlu2 %v4133_v7, %s3433_s21 }
 0x266   : > { %v4226_v48 = vpop.permute.xlu0 %888 }
 0x267   : > { %v4222_v18 = vpop.permute.xlu1 %1473  ;;  %v4224_v25 = vpop.permute.xlu2 %1617  ;;  %5480 = vst [vmem:[#allocation66_spill] sm:$0xff] %v4226_v48  ;;  %v3131_v48 = vpack.i.bf16 %v3851_v16, %v4044_v56  ;;  %v3116_v16 = vpack.i.bf16 %v4082_v49, %v3868_v20  ;;  %v3141_v20 = vpack.i.bf16 %v3950_v3, %v4001_v14  ;;  %v3156_v3 = vpack.i.bf16 %v3818_v6, %v4138_v47 }
 0x268   : > { %5478 = vst [vmem:[#allocation64_spill] sm:$0xff] %v4222_v18 }
 0x269   : > { %5479 = vst [vmem:[#allocation65_spill] sm:$0xff] %v4224_v25 }
 0x26c   : > { %3162 = vrot.lane.b32.xlu0 %v4231_v15, %s3435_s22 }
 0x26d   : > { %3127 = vrot.lane.b32.xlu1 %v3126_v42, %s3436_s14  ;;  %908 = vrot.lane.b32.xlu2 %v682_v30, %s3433_s21  ;;  %v3136_v30 = vpack.i.bf16 %v3925_v43, %v4024_v57 }
 0x26e   : > { %v4241_v25 = vpop.permute.xlu0 %904 }
 0x26f   : > { %v4237_v2 = vpop.permute.xlu1 %1457  ;;  %v4239_v18 = vpop.permute.xlu2 %1609  ;;  %5483 = vst [vmem:[#allocation69_spill] sm:$0xff] %v4241_v25 }
 0x270   : > { %5481 = vst [vmem:[#allocation67_spill] sm:$0xff] %v4237_v2 }
 0x271   : > { %5482 = vst [vmem:[#allocation68_spill] sm:$0xff] %v4239_v18 }
 0x274   : > { %1653 = vrot.lane.b32.xlu0 %v4113_v45, %s5413_s25 }
 0x275   : > { %3132 = vrot.lane.b32.xlu1 %v3131_v48, %s3436_s14  ;;  %916 = vrot.lane.b32.xlu2 %v4138_v47, %s3433_s21  ;;  %v1927_v47 = vld [vmem:[#allocation5 + $0x18] sm:$0xff] }
 0x276   : > { %v4254_v42 = vpop.permute.xlu0 %912 }
 0x277   : > { %v4250_v5 = vpop.permute.xlu1 %1449  ;;  %v4252_v29 = vpop.permute.xlu2 %1601 }
 0x278   : > { %5484 = vst [vmem:[#allocation70_spill] sm:$0xff] %v4250_v5 }
 0x279   : > { %5485 = vst [vmem:[#allocation71_spill] sm:$0xff] %v4252_v29 }
 0x27c   : > { %1493 = vrot.lane.b32.xlu0 %v4113_v45, %s5411_s19  ;;  %v4279_v45 = vpack.i.bf16 %v3785_v61, %v4133_v7  ;;  %v3151_v61 = vpack.i.bf16 %v3978_v21, %v3973_v10 }
 0x27d   : > { %3137 = vrot.lane.b32.xlu1 %v3136_v30, %s3436_s14  ;;  %3117 = vrot.lane.b32.xlu2 %v3116_v16, %s3433_s21  ;;  %v3146_v30 = vpack.i.bf16 %v3780_v60, %v4070_v9 }
 0x27e   : > { %v4268_v29 = vpop.permute.xlu0 %1298 }
 0x27f   : > { %v4264_v48 = vpop.permute.xlu1 %3062  ;;  %v4266_v5 = vpop.permute.xlu2 %762  ;;  %5486 = vst [vmem:[#allocation72_spill] sm:$0xff] %v4268_v29  ;;  %v4337_v29 = vpack.i.bf16 %v3742_v46, %v4061_v36 }
 0x280   : > { %v3065_v18 = vunpack.i.h.bf16 %v4264_v48 }
 0x282   : > { %v4273_v43 = vsel %vm5406_vm3, %v4266_v5, %v3065_v18 }
 0x284   : > { %3182 = vrot.lane.b32.xlu0 %v4279_v45, %s3435_s22 }
 0x285   : > { %3142 = vrot.lane.b32.xlu1 %v3141_v20, %s3436_s14  ;;  %3147 = vrot.lane.b32.xlu2 %v3146_v30, %s3435_s22  ;;  %v4309_v20 = vpack.i.bf16 %v3758_v52, %v4097_v51 }
 0x286   : > { %v4291_v2 = vpop.permute.xlu0 %1290 }
 0x287   : > { %v4287_v16 = vpop.permute.xlu1 %3067  ;;  %v4289_v18 = vpop.permute.xlu2 %770  ;;  %5487 = vst [vmem:[#allocation73_spill] sm:$0xff] %v4291_v2 }
 0x28c   : > { %1485 = vrot.lane.b32.xlu0 %v4082_v49, %s5411_s19 }
 0x28d   : > { %3152 = vrot.lane.b32.xlu1 %v3151_v61, %s3436_s14  ;;  %3157 = vrot.lane.b32.xlu2 %v3156_v3, %s3435_s22 }
 0x28e   : > { %v4303_v7 = vpop.permute.xlu0 %1282 }
 0x28f   : > { %v4301_v60 = vpop.permute.xlu1 %3072  ;;  %5488 = vst [vmem:[#allocation74_spill] sm:$0xff] %v4303_v7  ;;  %v4305_v9 = vpop.permute.xlu2 %778 }
 0x294   : > { %3197 = vrot.lane.b32.xlu0 %v4309_v20, %s3435_s22 }
 0x295   : > { %1318 = vrot.lane.b32.xlu1 %v4044_v56, %s3435_s22  ;;  %3167 = vrot.lane.b32.xlu2 %v3146_v30, %s5413_s25 }
 0x296   : > { %v4321_v7 = vpop.permute.xlu0 %924 }
 0x297   : > { %v3078_v6 = vpop.permute.xlu1 %3077  ;;  %v795_v61 = vpop.permute.xlu2 %794  ;;  %2706 = vmatpush.msk.msra.mxu2 %vm4317_vm14, %v4321_v7 }
 0x299   : > { %2708 = vmatpush.msk.msra.mxu2 %vm4317_vm14, %v4145_v27 }
 0x29c   : > { %1477 = vrot.lane.b32.xlu0 %v4044_v56, %s5411_s19 }
 0x29d   : > { %3177 = vrot.lane.b32.xlu1 %v3156_v3, %s5413_s25  ;;  %3172 = vrot.lane.b32.xlu2 %v3146_v30, %s5411_s19 }
 0x29e   : > { %v4333_v2 = vpop.permute.xlu0 %1126 }
 0x29f   : > { %v3083_v51 = vpop.permute.xlu1 %3082  ;;  %v803_v52 = vpop.permute.xlu2 %802  ;;  %5491 = vst [vmem:[#allocation75_spill] sm:$0xff] %v4333_v2 }
 0x2a4   : > { %3207 = vrot.lane.b32.xlu0 %v4337_v29, %s3435_s22 }
 0x2a5   : > { %1302 = vrot.lane.b32.xlu1 %v4024_v57, %s3435_s22  ;;  %1645 = vrot.lane.b32.xlu2 %v4082_v49, %s5413_s25  ;;  %v3085_v49 = vunpack.i.h.bf16 %v3083_v51 }
 0x2a6   : > { %v4350_v2 = vpop.permute.xlu0 %1118 }
 0x2a7   : > { %v3088_v21 = vpop.permute.xlu1 %3087  ;;  %5494 = vst [vmem:[#allocation76_spill] sm:$0xff] %v4350_v2  ;;  %v811_v27 = vpop.permute.xlu2 %810  ;;  %v3084_v2 = vunpack.i.l.bf16 %v3083_v51  ;;  %v826_v54 = vsel %vm5406_vm3, %v803_v52, %v3085_v49 }
 0x2a8   : > { %v3090_v46 = vunpack.i.h.bf16 %v3088_v21  ;;  %2736 = vmatpush.msk.msra.mxu0 %vm4346_vm5, %v811_v27  ;;  %v3089_v36 = vunpack.i.l.bf16 %v3088_v21 }
 0x2aa   : > { %v828_v25 = vsel %vm5406_vm3, %v811_v27, %v3090_v46  ;;  %2738 = vmatpush.msk.msra.mxu0 %vm4346_vm5, %v4189_v44  ;;  %v827_v21 = vsel %vm5406_vm3, %v4189_v44, %v3089_v36  ;;  %v3079_v44 = vunpack.i.l.bf16 %v3078_v6 }
 0x2ab   : > { %1056 = vmatpush.msra.mxu1 %v828_v25  ;;  %v3080_v25 = vunpack.i.h.bf16 %v3078_v6 }
 0x2ac   : > { %2740 = vmatpush.msk.msra.mxu0 %vm4346_vm5, %v803_v52  ;;  %3217 = vrot.lane.b32.xlu0 %v4279_v45, %s5411_s19 }
 0x2ad   : > { %3192 = vrot.lane.b32.xlu1 %v4231_v15, %s5413_s25  ;;  %3187 = vrot.lane.b32.xlu2 %v3156_v3, %s5411_s19  ;;  %v825_v3 = vsel %vm5406_vm3, %v4178_v37, %v3084_v2  ;;  %v823_v2 = vsel %vm5406_vm3, %v4165_v55, %v3079_v44 }
 0x2ae   : > { %1057 = vmatpush.msra.mxu1 %v827_v21  ;;  %2742 = vmatpush.msk.msra.mxu0 %vm4346_vm5, %v4178_v37  ;;  %v4372_v46 = vpop.permute.xlu0 %1110  ;;  %v3035_v21 = vunpack.i.h.bf16 %v3968_v50  ;;  %v3034_v37 = vunpack.i.l.bf16 %v3968_v50 }
 0x2af   : > { %v4370_v27 = vpop.permute.xlu1 %3092  ;;  %v4374_v24 = vpop.permute.xlu2 %876 }
 0x2b0   : > { %v3095_v51 = vunpack.i.h.bf16 %v4370_v27  ;;  %1058 = vmatpush.msra.mxu1 %v826_v54  ;;  %2744 = vmatpush.msk.msra.mxu0 %vm4346_vm5, %v795_v61  ;;  %v824_v54 = vsel %vm5406_vm3, %v795_v61, %v3080_v25  ;;  %v3075_v61 = vunpack.i.h.bf16 %v4301_v60  ;;  %v822_v49 = vsel %vm5406_vm3, %v3920_v40, %v3035_v21  ;;  %v5509_v21 = vld [vmem:[#allocation50_spill] sm:$0xff] }
 0x2b2   : > { %v4384_v36 = vsel %vm5410_vm11, %v4374_v24, %v3095_v51  ;;  %1059 = vmatpush.msra.mxu1 %v825_v3  ;;  %2746 = vmatpush.msk.msra.mxu0 %vm4346_vm5, %v4165_v55  ;;  %v821_v55 = vsel %vm5406_vm3, %v3801_v1, %v3034_v37  ;;  %v820_v25 = vsel %vm5406_vm3, %v4305_v9, %v3075_v61  ;;  %v5508_v3 = vld [vmem:[#allocation26_spill] sm:$0xff]  ;;  %v5510_v37 = vld [vmem:[#allocation17_spill] sm:$0xff] }
 0x2b3   : > { %v5511_v61 = vld [vmem:[#allocation22_spill] sm:$0xff] }
 0x2b4   : > { %1060 = vmatpush.msra.mxu1 %v824_v54  ;;  %2748 = vmatpush.msk.msra.mxu0 %vm4346_vm5, %v3920_v40  ;;  %v3070_v40 = vunpack.i.h.bf16 %v4287_v16 }
 0x2b5   : > { %1294 = vrot.lane.b32.xlu1 %v4001_v14, %s3435_s22  ;;  %1613 = vrot.lane.b32.xlu0 %v4001_v14, %s5413_s25 }
 0x2b6   : > { %1637 = vrot.lane.b32.xlu2 %v4044_v56, %s5413_s25  ;;  %1061 = vmatpush.msra.mxu1 %v823_v2  ;;  %v4409_v50 = vpop.permute.xlu0 %1094  ;;  %v3074_v56 = vunpack.i.l.bf16 %v4301_v60 }
 0x2b7   : > { %v4403_v6 = vpop.permute.xlu1 %3097  ;;  %2750 = vmatpush.msk.msra.mxu0 %vm4346_vm5, %v3801_v1  ;;  %v4411_v52 = vpop.permute.xlu2 %884  ;;  %v3069_v1 = vunpack.i.l.bf16 %v4287_v16  ;;  %v818_v16 = vsel %vm5406_vm3, %v4289_v18, %v3070_v40 }
 0x2b8   : > { %1062 = vmatpush.msra.mxu1 %v822_v49  ;;  %v819_v60 = vsel %vm5406_vm3, %v4147_v33, %v3074_v56  ;;  %v5512_v49 = vld [vmem:[#allocation35_spill] sm:$0xff]  ;;  %v5514_v56 = vld [vmem:[#allocation44_spill] sm:$0xff] }
 0x2b9   : > { %2752 = vmatpush.msk.msra.mxu0 %vm4346_vm5, %v4305_v9 }
 0x2ba   : > { %1063 = vmatpush.msra.mxu1 %v821_v55 }
 0x2bb   : > { %2754 = vmatpush.msk.msra.mxu0 %vm4346_vm5, %v4147_v33  ;;  %v3064_v33 = vunpack.i.l.bf16 %v4264_v48 }
 0x2bc   : > { %1064 = vmatpush.msra.mxu1 %v820_v25 }
 0x2bd   : > { %2756 = vmatpush.msk.msra.mxu0 %vm4346_vm5, %v4289_v18  ;;  %1286 = vrot.lane.b32.xlu1 %v3973_v10, %s3435_s22  ;;  %v5505_v18 = vld [vmem:[#allocation47_spill] sm:$0xff] }
 0x2be   : > { %3227 = vrot.lane.b32.xlu0 %v4309_v20, %s5411_s19  ;;  %3202 = vrot.lane.b32.xlu2 %v4231_v15, %s5411_s19  ;;  %v4444_v51 = vpop.permute.xlu0 %1086  ;;  %v817_v15 = vsel %vm5406_vm3, %v4115_v59, %v3069_v1  ;;  %v5516_v1 = vld [vmem:[#allocation28_spill] sm:$0xff] }
 0x2bf   : > { %v4439_v9 = vpop.permute.xlu1 %3102  ;;  %1065 = vmatpush.msra.mxu1 %v819_v60  ;;  %2758 = vmatpush.msk.msra.mxu0 %vm4346_vm5, %v4115_v59  ;;  %v4446_v44 = vpop.permute.xlu2 %892  ;;  %v815_v59 = vsel %vm5406_vm3, %v4084_v41, %v3064_v33  ;;  %vm5496_vm3 = vmmov %vm5495_vm7  ;;  %v5517_v33 = vld [vmem:[#allocation33_spill] sm:$0xff] }
 0x2c1   : > { %1066 = vmatpush.msra.mxu1 %v818_v16  ;;  %2760 = vmatpush.msk.msra.mxu0 %vm4346_vm5, %v4266_v5 }
 0x2c3   : > { %1067 = vmatpush.msra.mxu1 %v817_v15  ;;  %2762 = vmatpush.msk.msra.mxu0 %vm4346_vm5, %v4084_v41 }
 0x2c5   : > { %2797 = vmatpush.msk.msrb.mxu0 %vm5407_vm9, %v4054_v39  ;;  %1068 = vmatpush.msra.mxu1 %v4273_v43 }
 0x2c6   : > { %3212 = vrot.lane.b32.xlu1 %v4279_v45, %s5413_s25  ;;  %1605 = vrot.lane.b32.xlu0 %v3973_v10, %s5413_s25  ;;  %v4476_v39 = vpop.permute.xlu0 %1334 }
 0x2c7   : > { %1621 = vrot.lane.b32.xlu2 %v4024_v57, %s5413_s25  ;;  %v4471_v5 = vpop.permute.xlu1 %3107  ;;  %1069 = vmatpush.msra.mxu1 %v815_v59  ;;  %v4478_v48 = vpop.permute.xlu2 %908 }
 0x2c8   : > { %2798 = vmatpush.msk.msrb.mxu0 %vm5407_vm9, %v3775_v58  ;;  %vm5497_vm9 = vcmp.lt.s32.totalorder %v3791_v62, 16  ;;  %v3110_v40 = vunpack.i.h.bf16 %v4471_v5  ;;  %v3109_v59 = vunpack.i.l.bf16 %v4471_v5 }
 0x2c9   : > { %2810 = vmatpush.msk.msrb.mxu1 %vm577_vm2, %v4101_v38  ;;  %v5501_v38 = vld [vmem:[#allocation19_spill] sm:$0xff] }
 0x2ca   : > { %2799 = vmatpush.msk.msrb.mxu0 %vm5495_vm7, %v4126_v32  ;;  %vm5498_vm7 = vmmov %vm5497_vm9  ;;  %v5503_v32 = vld [vmem:[#allocation38_spill] sm:$0xff]  ;;  %v938_v5 = vsel %vm5410_vm11, %v4478_v48, %v3110_v40  ;;  %v3099_v40 = vunpack.i.l.bf16 %v4403_v6 }
 0x2cb   : > { %2811 = vmatpush.msk.msrb.mxu1 %vm577_vm2, %v3863_v19 }
 0x2cc   : > { %2800 = vmatpush.msk.msrb.mxu0 %vm5496_vm3, %v3808_v4  ;;  %vm5525_vm3 = vcmask 130048  }
 0x2cd   : > { %2812 = vmatpush.msk.msrb.mxu1 %vm569_vm1, %v4065_v35 }
 0x2ce   : > { %2801 = vmatpush.msk.msrb.mxu0 %vm5497_vm9, %v4154_v34  ;;  %1461 = vrot.lane.b32.xlu1 %v4024_v57, %s5411_s19  ;;  %v4510_v58 = vpop.permute.xlu0 %1078  ;;  %v871_v34 = vld [vmem:[%s5320_s5] sm:$0xf]  ;;  %vm987_vm9 = vcmask 916480  }
 0x2cf   : > { %2813 = vmatpush.msk.msrb.mxu1 %vm569_vm1, %v3883_v26  ;;  %3237 = vrot.lane.b32.xlu0 %v4337_v29, %s5411_s19  ;;  %v3113_v41 = vpop.permute.xlu1 %3112  ;;  %v917_v4 = vpop.permute.xlu2 %916 }
 0x2d0   : > { %3222 = vrot.lane.b32.xlu2 %v4309_v20, %s5413_s25  ;;  %2802 = vmatpush.msk.msrb.mxu0 %vm5498_vm7, %v3799_v0  ;;  %v3115_v19 = vunpack.i.h.bf16 %v3113_v41  ;;  %v1759_v0 = vld [vmem:[%s5321_s6] sm:$0xf]  ;;  %v5507_v20 = vld [vmem:[#allocation30_spill] sm:$0xff]  ;;  %v3114_v2 = vunpack.i.l.bf16 %v3113_v41  ;;  %vm4635_vm7 = vmneg %vm5525_vm3  ;;  %vm1495_vm3 = vcmask 785408  }
 0x2d1   : > { %2814 = vmatpush.msk.msrb.mxu1 %vm561_vm15, %v4032_v12  ;;  %2710 = vmatpush.msk.msra.mxu2 %vm4317_vm14, %v917_v4  ;;  %v5518_v41 = vld [vmem:[#allocation15_spill] sm:$0xff] }
 0x2d2   : > { %1246 = vmatpush.msrb.mxu0 %v3670_v31  ;;  %v942_v57 = vsel %vm5410_vm11, %v4321_v7, %v3115_v19  ;;  %2764 = vmatmul.msk.f32.vlgmr.msra.gmra.mxu1 %vm987_vm9, %v871_v34  ;;  %v5519_v19 = vld [vmem:[#allocation66_spill] sm:$0xff] }
 0x2d3   : > { %2815 = vmatpush.msk.msrb.mxu1 %vm561_vm15, %v3842_v13  ;;  %2712 = vmatpush.msk.msra.mxu2 %vm4317_vm14, %v4254_v42  ;;  %v5500_v13 = vld [vmem:[#allocation13_spill] sm:$0xff] }
 0x2d4   : > { %1247 = vmatpush.msrb.mxu0 %v3626_v23  ;;  %1013 = vmatpush.msra.mxu3 %v942_v57  ;;  %v5520_v57 = vld [vmem:[#allocation31_spill] sm:$0xff] }
 0x2d5   : > { %1266 = vmatpush.msrb.mxu1 %v3661_v28  ;;  %2714 = vmatpush.msk.msra.mxu2 %vm4317_vm14, %v4478_v48 }
 0x2d6   : > { %2803 = vmatpush.msk.msrb.mxu0 %vm550_vm10, %v4121_v8  ;;  %1453 = vrot.lane.b32.xlu1 %v4001_v14, %s5411_s19  ;;  %v4550_v35 = vpop.permute.xlu0 %1326  ;;  %v5502_v14 = vld [vmem:[#allocation69_spill] sm:$0xff] }
 0x2d7   : > { %1267 = vmatpush.msrb.mxu1 %v5500_v13  ;;  %1762 = vperm.xlu0 %3029, %v1759_v0   ;;  %v4540_v26 = vpop.permute.xlu1 %3122  ;;  %v3118_v8 = vpop.permute.xlu2 %3117  ;;  %v5521_v0 = vld [vmem:[#allocation29_spill] sm:$0xff] }
 0x2d8   : > { %3232 = vrot.lane.b32.xlu2 %v4337_v29, %s5413_s25  ;;  %2804 = vmatpush.msk.msrb.mxu0 %vm550_vm10, %v5501_v38  ;;  %v3119_v45 = vunpack.i.l.bf16 %v3118_v8  ;;  %v3120_v29 = vunpack.i.h.bf16 %v3118_v8  ;;  %v5522_v38 = vld [vmem:[#allocation37_spill] sm:$0xff] }
 0x2d9   : > { %2716 = vmatpush.msk.msra.mxu2 %vm4317_vm14, %v5502_v14  ;;  %2816 = vmatpush.msk.msrb.mxu1 %vm551_vm0, %v5503_v32  ;;  %v3040_v8 = vunpack.i.h.bf16 %v5522_v38  ;;  %v5523_v32 = vld [vmem:[#allocation32_spill] sm:$0xff] }
 0x2da   : > { %2805 = vmatpush.msk.msrb.mxu0 %vm542_vm6, %v5505_v18  ;;  %v941_v54 = vsel %vm5410_vm11, %v5509_v21, %v3119_v45  ;;  %v940_v60 = vsel %vm5410_vm11, %v917_v4, %v3120_v29  ;;  %v939_v4 = vsel %vm5410_vm11, %v4254_v42, %v3114_v2  ;;  %v3039_v42 = vunpack.i.l.bf16 %v5522_v38  ;;  %v5524_v45 = vld [vmem:[#allocation63_spill] sm:$0xff] }
 0x2db   : > { %2718 = vmatpush.msk.msra.mxu2 %vm4317_vm14, %v5507_v20  ;;  %2817 = vmatpush.msk.msrb.mxu1 %vm551_vm0, %v5508_v3  ;;  %v937_v18 = vsel %vm5410_vm11, %v5502_v14, %v3109_v59  ;;  %v3105_v29 = vunpack.i.h.bf16 %v4439_v9  ;;  %v936_v48 = vsel %vm5410_vm11, %v5507_v20, %v3040_v8  ;;  %v5529_v2 = vld [vmem:[#allocation75_spill] sm:$0xff] }
 0x2dc   : > { %2806 = vmatpush.msk.msrb.mxu0 %vm542_vm6, %v5510_v37  ;;  %1014 = vmatpush.msra.mxu3 %v941_v54  ;;  %v2704_v54 = vld [vmem:[%s5320_s5 + $0x4] sm:$0xf]  ;;  %v5528_v37 = vld [vmem:[#allocation60_spill] sm:$0xff]  ;;  %v935_v20 = vsel %vm5410_vm11, %v5511_v61, %v3039_v42 }
 0x2dd   : > { %2720 = vmatpush.msk.msra.mxu2 %vm4317_vm14, %v5511_v61  ;;  %2818 = vmatpush.msk.msrb.mxu1 %vm543_vm12, %v5512_v49  ;;  %v3100_v49 = vunpack.i.h.bf16 %v4403_v6  ;;  %v5537_v42 = vld [vmem:[#allocation20_spill] sm:$0xff] }
 0x2de   : > { %2807 = vmatpush.msk.msrb.mxu0 %vm534_vm4, %v5514_v56  ;;  %1445 = vrot.lane.b32.xlu1 %v3973_v10, %s5411_s19  ;;  %v4596_v15 = vpop.permute.xlu0 %3162  ;;  %v934_v56 = vsel %vm5410_vm11, %v4446_v44, %v3105_v29 }
 0x2df   : > { %2722 = vmatpush.msk.msra.mxu2 %vm4317_vm14, %v4446_v44  ;;  %2819 = vmatpush.msk.msrb.mxu1 %vm543_vm12, %v5516_v1  ;;  %v4592_v16 = vpop.permute.xlu1 %3127  ;;  %v4598_v10 = vpop.permute.xlu2 %3147  ;;  %v5531_v1 = vld [vmem:[#allocation76_spill] sm:$0xff]  ;;  %v932_v44 = vsel %vm5410_vm11, %v4411_v52, %v3100_v49  ;;  %v5540_v49 = vld [vmem:[#allocation51_spill] sm:$0xff] }
 0x2e0   : > { %1441 = vrot.lane.b32.xlu2 %v5517_v33, %s5411_s19  ;;  %1015 = vmatpush.msra.mxu3 %v940_v60  ;;  %v5532_v33 = vld [vmem:[#allocation46_spill] sm:$0xff]  ;;  %v3129_v8 = vunpack.i.l.bf16 %v4592_v16 }
 0x2e1   : > { %2808 = vmatpush.msk.msrb.mxu0 %vm534_vm4, %v5518_v41  ;;  %2724 = vmatpush.msk.msra.mxu2 %vm4317_vm14, %v5519_v19  ;;  %v3094_v41 = vunpack.i.l.bf16 %v4370_v27  ;;  %v5534_v27 = vld [vmem:[#allocation49_spill] sm:$0xff] }
 0x2e2   : > { %2820 = vmatpush.msk.msrb.mxu1 %vm5409_vm13, %v5520_v57  ;;  %1016 = vmatpush.msra.mxu3 %v939_v4  ;;  %v5533_v4 = vld [vmem:[#allocation58_spill] sm:$0xff]  ;;  %v3125_v57 = vunpack.i.h.bf16 %v4540_v26 }
 0x2e3   : > { %2726 = vmatpush.msk.msra.mxu2 %vm4317_vm14, %v4411_v52  ;;  %2763 = vmatmul.msk.f32.vlgmr.msra.gmra.mxu0 %vm987_vm9, %v871_v34  ;;  %v3124_v52 = vunpack.i.l.bf16 %v4540_v26  ;;  %v929_v38 = vsel %vm5410_vm11, %v5528_v37, %v3094_v41 }
 0x2e4   : > { %2821 = vmatpush.msk.msrb.mxu1 %vm5409_vm13, %v5523_v32  ;;  %1017 = vmatpush.msra.mxu3 %v938_v5  ;;  %v5535_v5 = vld [vmem:[#allocation34_spill] sm:$0xff]  ;;  %vm5536_vm13 = vcmask 130048  }
 0x2e5   : > { %2728 = vmatpush.msk.msra.mxu2 %vm4317_vm14, %v5524_v45  ;;  %v1143_v32 = vsel %vm5536_vm13, %v5529_v2, %v3124_v52 }
 0x2e6   : > { %1018 = vmatpush.msra.mxu3 %v937_v18  ;;  %v4641_v21 = vpop.permute.xlu0 %1653 }
 0x2e7   : > { %2730 = vmatpush.msk.msra.mxu2 %vm4317_vm14, %v4374_v24  ;;  %v4639_v3 = vpop.permute.xlu1 %3132  ;;  %v4643_v14 = vpop.permute.xlu2 %3157  ;;  %v3104_v24 = vunpack.i.l.bf16 %v4439_v9  ;;  %v5530_v9 = vld [vmem:[#allocation42_spill] sm:$0xff] }
 0x2e8   : > { %1019 = vmatpush.msra.mxu3 %v936_v48 }
 0x2e9   : > { %2732 = vmatpush.msk.msra.mxu2 %vm4317_vm14, %v5528_v37  ;;  %v933_v61 = vsel %vm5410_vm11, %v5519_v19, %v3104_v24  ;;  %v931_v19 = vsel %vm5410_vm11, %v5524_v45, %v3099_v40  ;;  %vm5538_vm11 = vmmov %vm5536_vm13  ;;  %v3134_v37 = vunpack.i.l.bf16 %v4639_v3 }
 0x2ea   : > { %1020 = vmatpush.msra.mxu3 %v935_v20  ;;  %2733 = vmatmul.msk.f32.vlgmr.msra.gmra.mxu2 %vm987_vm9, %v2704_v54  ;;  %v1142_v45 = vsel %vm5538_vm11, %v5530_v9, %v3125_v57  ;;  %vm5539_vm13 = vmmov %vm5538_vm11  ;;  %v5545_v57 = vld [vmem:[#allocation61_spill] sm:$0xff] }
 0x2eb   : > { %2767 = vmatpush.msk.msrb.mxu2 %vm4635_vm7, %v5529_v2  ;;  %v3135_v2 = vunpack.i.h.bf16 %v4639_v3 }
 0x2ec   : > { %1021 = vmatpush.msra.mxu3 %v934_v56 }
 0x2ed   : > { %2769 = vmatpush.msk.msrb.mxu2 %vm4635_vm7, %v5530_v9  ;;  %v5541_v9 = vld [vmem:[#allocation41_spill] sm:$0xff] }
 0x2ee   : > { %1022 = vmatpush.msra.mxu3 %v933_v61  ;;  %v1494_v59 = vpop.permute.xlu0 %1493  ;;  %v3044_v40 = vunpack.i.l.bf16 %v5541_v9 }
 0x2ef   : > { %2771 = vmatpush.msk.msrb.mxu2 %vm4635_vm7, %v5531_v1  ;;  %v4672_v60 = vpop.permute.xlu1 %3137  ;;  %v4677_v6 = vpop.permute.xlu2 %3167  ;;  %2842 = vmatpush.msk.msra.mxu1 %vm1495_vm3, %v1494_v59 }
 0x2f0   : > { %1023 = vmatpush.msra.mxu3 %v932_v44  ;;  %v3149_v44 = vunpack.i.l.bf16 %v4598_v10  ;;  %v3139_v52 = vunpack.i.l.bf16 %v4672_v60 }
 0x2f1   : > { %2773 = vmatpush.msk.msrb.mxu2 %vm4635_vm7, %v5532_v33  ;;  %2843 = vmatpush.msk.msra.mxu1 %vm1495_vm3, %v5533_v4 }
 0x2f2   : > { %1024 = vmatpush.msra.mxu3 %v931_v19 }
 0x2f3   : > { %2775 = vmatpush.msk.msrb.mxu2 %vm4635_vm7, %v4372_v46 }
 0x2f4   : > { %1025 = vmatpush.msra.mxu3 %v4384_v36  ;;  %v3130_v36 = vunpack.i.h.bf16 %v4592_v16  ;;  %v1141_v16 = vsel %vm5539_vm13, %v5531_v1, %v3129_v8  ;;  %vm5542_vm13 = vmmov %vm5538_vm11  ;;  %v3045_v1 = vunpack.i.h.bf16 %v5541_v9  ;;  %v5546_v8 = vld [vmem:[#allocation54_spill] sm:$0xff] }
 0x2f5   : > { %2777 = vmatpush.msk.msrb.mxu2 %vm4635_vm7, %v5534_v27  ;;  %v1139_v3 = vsel %vm5542_vm13, %v4372_v46, %v3134_v37  ;;  %v3150_v46 = vunpack.i.h.bf16 %v4598_v10  ;;  %vm5544_vm13 = vmmov %vm5538_vm11  ;;  %v3140_v10 = vunpack.i.h.bf16 %v4672_v60  ;;  %v3164_v37 = vunpack.i.l.bf16 %v4596_v15 }
 0x2f6   : > { %1026 = vmatpush.msra.mxu3 %v929_v38  ;;  %v4710_v18 = vpop.permute.xlu0 %3182  ;;  %v3159_v38 = vunpack.i.l.bf16 %v4643_v14 }
 0x2f7   : > { %2779 = vmatpush.msk.msrb.mxu2 %vm4635_vm7, %v5535_v5  ;;  %v4702_v26 = vpop.permute.xlu1 %3142  ;;  %v3173_v29 = vpop.permute.xlu2 %3172  ;;  %2734 = vmatmul.msk.f32.vlgmr.msra.gmra.mxu3 %vm987_vm9, %v2704_v54  ;;  %v1140_v54 = vsel %vm5538_vm11, %v5532_v33, %v3130_v36  ;;  %v5543_v33 = vld [vmem:[#allocation52_spill] sm:$0xff] }
 0x2f8   : > { %1213 = vmatpush.msrb.mxu3 %v1143_v32  ;;  %v3175_v48 = vunpack.i.h.bf16 %v3173_v29  ;;  %v3174_v24 = vunpack.i.l.bf16 %v3173_v29  ;;  %v1136_v32 = vsel %vm5538_vm11, %v5537_v42, %v3045_v1  ;;  %v2796_v36 = vld [vmem:[%s5320_s5 + $0xc] sm:$0xf]  ;;  %v3144_v60 = vunpack.i.l.bf16 %v4702_v26 }
 0x2f9   : > { %2781 = vmatpush.msk.msrb.mxu2 %vm4635_vm7, %v5537_v42  ;;  %2809 = vmatmul.msk.f32.vlgmr.msrb.gmra.mxu0 %vm987_vm9, %v2796_v36 }
 0x2fa   : > { %1214 = vmatpush.msrb.mxu3 %v1142_v45  ;;  %v1509_v20 = vsel %vm1495_vm3, %v3174_v24, %v1494_v59  ;;  %v1508_v56 = vsel %vm1495_vm3, %v3175_v48, %v5533_v4  ;;  %v1138_v59 = vsel %vm5538_vm11, %v5534_v27, %v3135_v2  ;;  %v1137_v4 = vsel %vm5544_vm13, %v5535_v5, %v3044_v40  ;;  %v2765_v27 = vld [vmem:[%s5320_s5 + $0x8] sm:$0xf]  ;;  %vm5547_vm13 = vmmov %vm5538_vm11  ;;  %v5548_v48 = vld [vmem:[#allocation53_spill] sm:$0xff] }
 0x2fb   : > { %2783 = vmatpush.msk.msrb.mxu2 %vm4635_vm7, %v4409_v50  ;;  %1559 = vmatpush.msra.mxu0 %v1509_v20  ;;  %v1349_v5 = vsel %vm987_vm9, %v3149_v44, %v4476_v39  ;;  %v3160_v45 = vunpack.i.h.bf16 %v4643_v14  ;;  %v1135_v29 = vsel %vm5547_vm13, %v4409_v50, %v3139_v52  ;;  %v1348_v24 = vsel %vm987_vm9, %v3150_v46, %v5548_v48  ;;  %vm5549_vm13 = vmmov %vm5538_vm11  ;;  %v5551_v46 = vld [vmem:[#allocation39_spill] sm:$0xff] }
 0x2fc   : > { %1215 = vmatpush.msrb.mxu3 %v1141_v16  ;;  %v3145_v16 = vunpack.i.h.bf16 %v4702_v26  ;;  %v1134_v14 = vsel %vm5538_vm11, %v5540_v49, %v3140_v10  ;;  %v1347_v50 = vsel %vm987_vm9, %v3159_v38, %v4550_v35  ;;  %2822 = vmatmul.msk.f32.vlgmr.msrb.gmra.mxu1 %vm987_vm9, %v2796_v36  ;;  %v1133_v26 = vsel %vm5549_vm13, %v4444_v51, %v3144_v60  ;;  %vm5552_vm13 = vmmov %vm5538_vm11  ;;  %v5553_v10 = vld [vmem:[#allocation56_spill] sm:$0xff] }
 0x2fd   : > { %2785 = vmatpush.msk.msrb.mxu2 %vm4635_vm7, %v5540_v49  ;;  %1560 = vmatpush.msra.mxu0 %v1508_v56  ;;  %v5550_v49 = vld [vmem:[#allocation55_spill] sm:$0xff]  ;;  %v3050_v52 = vunpack.i.h.bf16 %v5551_v46  ;;  %v3185_v60 = vunpack.i.h.bf16 %v4710_v18 }
 0x2fe   : > { %1216 = vmatpush.msrb.mxu3 %v1140_v54  ;;  %v1486_v41 = vpop.permute.xlu0 %1485  ;;  %v3165_v54 = vunpack.i.h.bf16 %v4596_v15 }
 0x2ff   : > { %2787 = vmatpush.msk.msrb.mxu2 %vm4635_vm7, %v4444_v51  ;;  %v4734_v61 = vpop.permute.xlu1 %3152  ;;  %v4743_v19 = vpop.permute.xlu2 %1645  ;;  %2844 = vmatpush.msk.msra.mxu1 %vm1495_vm3, %v1486_v41 }
 0x300   : > { %1217 = vmatpush.msrb.mxu3 %v1139_v3  ;;  %v3154_v40 = vunpack.i.l.bf16 %v4734_v61  ;;  %v1346_v3 = vsel %vm987_vm9, %v3160_v45, %v5550_v49  ;;  %v3155_v15 = vunpack.i.h.bf16 %v4734_v61 }
 0x301   : > { %2789 = vmatpush.msk.msrb.mxu2 %vm4635_vm7, %v5543_v33  ;;  %2845 = vmatpush.msk.msra.mxu1 %vm1495_vm3, %v5545_v57 }
 0x302   : > { %1218 = vmatpush.msrb.mxu3 %v1138_v59  ;;  %v1132_v59 = vsel %vm5538_vm11, %v5543_v33, %v3145_v16  ;;  %v1131_v38 = vsel %vm5552_vm13, %v4510_v58, %v3154_v40  ;;  %v1130_v33 = vsel %vm5538_vm11, %v5546_v8, %v3155_v15  ;;  %vm5415_vm13 = vcmask 654336  }
 0x303   : > { %2791 = vmatpush.msk.msrb.mxu2 %vm4635_vm7, %v4510_v58  ;;  %v5555_v58 = vld [vmem:[#allocation24_spill] sm:$0xff]  ;;  %vm5574_vm11 = vcmp.lt.s32.totalorder %v3760_v53, 16 }
 0x304   : > { %1219 = vmatpush.msrb.mxu3 %v1137_v4  ;;  %v3049_v4 = vunpack.i.l.bf16 %v5551_v46  ;;  %v1342_v45 = vsel %vm987_vm9, %v3050_v52, %v5555_v58 }
 0x305   : > { %2793 = vmatpush.msk.msrb.mxu2 %vm4635_vm7, %v5546_v8  ;;  %v5556_v8 = vld [vmem:[#allocation64_spill] sm:$0xff] }
 0x306   : > { %1220 = vmatpush.msrb.mxu3 %v1136_v32  ;;  %2794 = vmatmul.msk.f32.vlgmr.msrb.gmra.mxu2 %vm987_vm9, %v2765_v27  ;;  %v4784_v20 = vpop.permute.xlu0 %3197  ;;  %v5554_v32 = vld [vmem:[#allocation45_spill] sm:$0xff] }
 0x307   : > { %1399 = vmatpush.msra.mxu2 %v1349_v5  ;;  %v1319_v42 = vpop.permute.xlu1 %1318  ;;  %v3188_v2 = vpop.permute.xlu2 %3187 }
 0x308   : > { %1221 = vmatpush.msrb.mxu3 %v1135_v29  ;;  %v3190_v56 = vunpack.i.h.bf16 %v3188_v2  ;;  %v3189_v9 = vunpack.i.l.bf16 %v3188_v2  ;;  %v1345_v1 = vsel %vm987_vm9, %v3164_v37, %v1319_v42  ;;  %v3184_v29 = vunpack.i.l.bf16 %v4710_v18 }
 0x309   : > { %1400 = vmatpush.msra.mxu2 %v1348_v24 }
 0x30a   : > { %1222 = vmatpush.msrb.mxu3 %v1134_v14  ;;  %v1507_v44 = vsel %vm1495_vm3, %v3189_v9, %v1486_v41  ;;  %v1506_v51 = vsel %vm1495_vm3, %v3190_v56, %v5545_v57  ;;  %v1344_v41 = vsel %vm987_vm9, %v3165_v54, %v5553_v10  ;;  %v1343_v57 = vsel %vm987_vm9, %v3049_v4, %v5554_v32  ;;  %v5560_v54 = vld [vmem:[#allocation40_spill] sm:$0xff] }
 0x30b   : > { %1401 = vmatpush.msra.mxu2 %v1347_v50  ;;  %1561 = vmatpush.msra.mxu0 %v1507_v44  ;;  %v3060_v56 = vunpack.i.h.bf16 %v5560_v54  ;;  %v3059_v9 = vunpack.i.l.bf16 %v5560_v54  ;;  %v3199_v44 = vunpack.i.l.bf16 %v4784_v20  ;;  %v5566_v54 = vld [vmem:[#allocation62_spill] sm:$0xff] }
 0x30c   : > { %1223 = vmatpush.msrb.mxu3 %v1133_v26 }
 0x30d   : > { %1402 = vmatpush.msra.mxu2 %v1346_v3  ;;  %1562 = vmatpush.msra.mxu0 %v1506_v51  ;;  %v5561_v51 = vld [vmem:[#allocation73_spill] sm:$0xff] }
 0x30e   : > { %1224 = vmatpush.msrb.mxu3 %v1132_v59  ;;  %v1478_v5 = vpop.permute.xlu0 %1477 }
 0x30f   : > { %1403 = vmatpush.msra.mxu2 %v1345_v1  ;;  %v4806_v61 = vpop.permute.xlu1 %3177  ;;  %2846 = vmatpush.msk.msra.mxu1 %vm1495_vm3, %v1478_v5  ;;  %v3200_v1 = vunpack.i.h.bf16 %v4784_v20  ;;  %v3169_v20 = vunpack.i.l.bf16 %v4677_v6 }
 0x310   : > { %1225 = vmatpush.msrb.mxu3 %v1131_v38  ;;  %v4812_v36 = vpop.permute.xlu2 %1637 }
 0x311   : > { %1404 = vmatpush.msra.mxu2 %v1344_v41  ;;  %2847 = vmatpush.msk.msra.mxu1 %vm1495_vm3, %v5556_v8  ;;  %v1338_v46 = vsel %vm987_vm9, %v3200_v1, %v5561_v51  ;;  %v5568_v1 = vld [vmem:[#allocation21_spill] sm:$0xff] }
 0x312   : > { %1226 = vmatpush.msrb.mxu3 %v1130_v33  ;;  %v2823_v33 = vld [vmem:[%s5320_s5 + $0x10] sm:$0xf] }
 0x313   : > { %1405 = vmatpush.msra.mxu2 %v1343_v57  ;;  %2795 = vmatmul.msk.f32.vlgmr.msrb.gmra.mxu3 %vm987_vm9, %v2765_v27  ;;  %v5558_v27 = vld [vmem:[#allocation23_spill] sm:$0xff]  ;;  %v5562_v57 = vld [vmem:[#allocation74_spill] sm:$0xff] }
 0x314   : > { %2825 = vmatpush.msk.msra.mxu3 %vm987_vm9, %v4476_v39  ;;  %v5557_v39 = vld [vmem:[#allocation43_spill] sm:$0xff] }
 0x315   : > { %1406 = vmatpush.msra.mxu2 %v1342_v45  ;;  %2848 = vmatpush.msk.msra.mxu1 %vm1495_vm3, %v5557_v39  ;;  %v1503_v26 = vsel %vm1495_vm3, %v3059_v9, %v5557_v39  ;;  %v3179_v45 = vunpack.i.l.bf16 %v4806_v61 }
 0x316   : > { %2826 = vmatpush.msk.msra.mxu3 %vm987_vm9, %v5548_v48  ;;  %v3208_v16 = vpop.permute.xlu0 %3207 }
 0x317   : > { %v1303_v24 = vpop.permute.xlu1 %1302  ;;  %2849 = vmatpush.msk.msra.mxu1 %vm1495_vm3, %v5558_v27  ;;  %v3210_v4 = vunpack.i.h.bf16 %v3208_v16  ;;  %v3209_v38 = vunpack.i.l.bf16 %v3208_v16  ;;  %v5565_v16 = vld [vmem:[#allocation48_spill] sm:$0xff] }
 0x318   : > { %2827 = vmatpush.msk.msra.mxu3 %vm987_vm9, %v4550_v35  ;;  %v1341_v48 = vsel %vm987_vm9, %v3184_v29, %v1303_v24  ;;  %v3203_v37 = vpop.permute.xlu2 %3202  ;;  %v5559_v35 = vld [vmem:[#allocation72_spill] sm:$0xff] }
 0x319   : > { %1407 = vmatpush.msra.mxu2 %v1341_v48  ;;  %v3205_v14 = vunpack.i.h.bf16 %v3203_v37  ;;  %v3204_v18 = vunpack.i.l.bf16 %v3203_v37  ;;  %v1340_v50 = vsel %vm987_vm9, %v3185_v60, %v5559_v35  ;;  %v5563_v60 = vld [vmem:[#allocation57_spill] sm:$0xff]  ;;  %v5564_v48 = vld [vmem:[#allocation59_spill] sm:$0xff] }
 0x31a   : > { %2828 = vmatpush.msk.msra.mxu3 %vm987_vm9, %v5550_v49  ;;  %v1502_v49 = vsel %vm1495_vm3, %v3060_v56, %v5558_v27 }
 0x31b   : > { %1408 = vmatpush.msra.mxu2 %v1340_v50  ;;  %v1505_v2 = vsel %vm1495_vm3, %v3204_v18, %v1478_v5  ;;  %v1336_v5 = vsel %vm987_vm9, %v3210_v4, %v5562_v57 }
 0x31c   : > { %2829 = vmatpush.msk.msra.mxu3 %vm987_vm9, %v1319_v42  ;;  %1563 = vmatpush.msra.mxu0 %v1505_v2  ;;  %v1504_v42 = vsel %vm1495_vm3, %v3205_v14, %v5556_v8  ;;  %v3180_v8 = vunpack.i.h.bf16 %v4806_v61  ;;  %v3054_v14 = vunpack.i.l.bf16 %v5565_v16 }
 0x31e   : > { %2830 = vmatpush.msk.msra.mxu3 %vm987_vm9, %v5553_v10  ;;  %1564 = vmatpush.msra.mxu0 %v1504_v42  ;;  %v4856_v3 = vpop.permute.xlu0 %3217  ;;  %v1666_v37 = vsel %vm5415_vm13, %v3180_v8, %v5564_v48  ;;  %v5572_v8 = vld [vmem:[#allocation70_spill] sm:$0xff] }
 0x31f   : > { %v4847_v40 = vpop.permute.xlu1 %3192  ;;  %v3220_v50 = vunpack.i.h.bf16 %v4856_v3  ;;  %v3219_v2 = vunpack.i.l.bf16 %v4856_v3 }
 0x320   : > { %2831 = vmatpush.msk.msra.mxu3 %vm987_vm9, %v5554_v32  ;;  %1565 = vmatpush.msra.mxu0 %v1503_v26  ;;  %v3170_v32 = vunpack.i.h.bf16 %v4677_v6  ;;  %v1669_v6 = vsel %vm5415_vm13, %v3169_v20, %v4641_v21  ;;  %v3194_v27 = vunpack.i.l.bf16 %v4847_v40  ;;  %v3195_v61 = vunpack.i.h.bf16 %v4847_v40  ;;  %v5567_v40 = vld [vmem:[#allocation36_spill] sm:$0xff]  ;;  %v5570_v20 = vld [vmem:[#allocation65_spill] sm:$0xff] }
 0x322   : > { %2832 = vmatpush.msk.msra.mxu3 %vm987_vm9, %v5555_v58  ;;  %1566 = vmatpush.msra.mxu0 %v1502_v49  ;;  %v1622_v58 = vpop.permute.xlu2 %1621  ;;  %v1668_v29 = vsel %vm5415_vm13, %v3170_v32, %v5563_v60  ;;  %v1665_v18 = vsel %vm5415_vm13, %v3194_v27, %v4812_v36  ;;  %v1664_v56 = vsel %vm5415_vm13, %v3195_v61, %v5566_v54  ;;  %v5573_v61 = vld [vmem:[#allocation71_spill] sm:$0xff] }
 0x324   : > { %2833 = vmatpush.msk.msra.mxu3 %vm987_vm9, %v1303_v24 }
 0x326   : > { %2834 = vmatpush.msk.msra.mxu3 %vm987_vm9, %v5559_v35 }
 0x327   : > { %v1295_v15 = vpop.permute.xlu1 %1294  ;;  %v4868_v52 = vpop.permute.xlu0 %1613 }
 0x328   : > { %2835 = vmatpush.msk.msra.mxu3 %vm987_vm9, %v1295_v15  ;;  %v1339_v59 = vsel %vm987_vm9, %v3199_v44, %v1295_v15  ;;  %v5569_v44 = vld [vmem:[#allocation67_spill] sm:$0xff] }
 0x329   : > { %1409 = vmatpush.msra.mxu2 %v1339_v59  ;;  %v1500_v59 = vsel %vm1495_vm3, %v3220_v50, %v5569_v44 }
 0x32a   : > { %2836 = vmatpush.msk.msra.mxu3 %vm987_vm9, %v5561_v51  ;;  %v3223_v35 = vpop.permute.xlu2 %3222 }
 0x32b   : > { %1410 = vmatpush.msra.mxu2 %v1338_v46  ;;  %v3224_v51 = vunpack.i.l.bf16 %v3223_v35  ;;  %v3225_v4 = vunpack.i.h.bf16 %v3223_v35 }
 0x32f   : > { %v1287_v10 = vpop.permute.xlu1 %1286 }
 0x330   : > { %2837 = vmatpush.msk.msra.mxu3 %vm987_vm9, %v1287_v10  ;;  %v1337_v41 = vsel %vm987_vm9, %v3209_v38, %v1287_v10  ;;  %v4893_v39 = vpop.permute.xlu0 %3227 }
 0x331   : > { %1411 = vmatpush.msra.mxu2 %v1337_v41  ;;  %v3230_v38 = vunpack.i.h.bf16 %v4893_v39  ;;  %v3229_v10 = vunpack.i.l.bf16 %v4893_v39 }
 0x332   : > { %2838 = vmatpush.msk.msra.mxu3 %vm987_vm9, %v5562_v57  ;;  %v1659_v57 = vsel %vm5415_vm13, %v3224_v51, %v4868_v52 }
 0x333   : > { %1412 = vmatpush.msra.mxu2 %v1336_v5  ;;  %2839 = vmatmul.msk.f32.vlgmr.msra.gmra.mxu3 %vm987_vm9, %v2823_v33 }
 0x334   : > { %2859 = vmatpush.msk.msrb.mxu3 %vm5415_vm13, %v4641_v21  ;;  %2824 = vmatmul.msk.f32.vlgmr.msra.gmra.mxu2 %vm987_vm9, %v2823_v33  ;;  %v1667_v21 = vsel %vm5415_vm13, %v3179_v45, %v4743_v19  ;;  %v3233_v33 = vpop.permute.xlu2 %3232 }
 0x335   : > { %1719 = vmatpush.msrb.mxu2 %v1669_v6  ;;  %v3234_v45 = vunpack.i.l.bf16 %v3233_v33  ;;  %v5571_v6 = vld [vmem:[#allocation68_spill] sm:$0xff] }
 0x336   : > { %2860 = vmatpush.msk.msrb.mxu3 %vm5415_vm13, %v5563_v60  ;;  %v1658_v60 = vsel %vm5415_vm13, %v3225_v4, %v5571_v6 }
 0x337   : > { %1720 = vmatpush.msrb.mxu2 %v1668_v29  ;;  %v1498_v29 = vsel %vm1495_vm3, %v3230_v38, %v5572_v8 }
 0x338   : > { %v3213_v24 = vpop.permute.xlu1 %3212  ;;  %2861 = vmatpush.msk.msrb.mxu3 %vm5415_vm13, %v4743_v19  ;;  %v3055_v19 = vunpack.i.h.bf16 %v5565_v16  ;;  %v1606_v49 = vpop.permute.xlu0 %1605 }
 0x339   : > { %1721 = vmatpush.msrb.mxu2 %v1667_v21  ;;  %v3214_v42 = vunpack.i.l.bf16 %v3213_v24  ;;  %v3215_v3 = vunpack.i.h.bf16 %v3213_v24  ;;  %v2857_v24 = vld [vmem:[%s5320_s5 + $0x18] sm:$0xf] }
 0x33a   : > { %2862 = vmatpush.msk.msrb.mxu3 %vm5415_vm13, %v5564_v48  ;;  %v1662_v15 = vsel %vm5415_vm13, %v3055_v19, %v5568_v1 }
 0x33b   : > { %1722 = vmatpush.msrb.mxu2 %v1666_v37  ;;  %v1661_v46 = vsel %vm5415_vm13, %v3214_v42, %v1622_v58  ;;  %v1660_v41 = vsel %vm5415_vm13, %v3215_v3, %v5570_v20 }
 0x33c   : > { %2863 = vmatpush.msk.msrb.mxu3 %vm5415_vm13, %v4812_v36  ;;  %v1663_v36 = vsel %vm5415_vm13, %v3054_v14, %v5567_v40  ;;  %v2840_v14 = vld [vmem:[%s5320_s5 + $0x14] sm:$0xf] }
 0x33d   : > { %1723 = vmatpush.msrb.mxu2 %v1665_v18  ;;  %v1442_v18 = vpop.permute.xlu2 %1441 }
 0x33e   : > { %2864 = vmatpush.msk.msrb.mxu3 %vm5415_vm13, %v5566_v54 }
 0x33f   : > { %1724 = vmatpush.msrb.mxu2 %v1664_v56 }
 0x340   : > { %v1462_v9 = vpop.permute.xlu1 %1461  ;;  %2865 = vmatpush.msk.msrb.mxu3 %vm5415_vm13, %v5567_v40 }
 0x341   : > { %2850 = vmatpush.msk.msra.mxu1 %vm1495_vm3, %v1462_v9  ;;  %v1501_v26 = vsel %vm1495_vm3, %v3219_v2, %v1462_v9  ;;  %1725 = vmatpush.msrb.mxu2 %v1663_v36  ;;  %v3238_v39 = vpop.permute.xlu0 %3237 }
 0x342   : > { %1567 = vmatpush.msra.mxu0 %v1501_v26  ;;  %2866 = vmatpush.msk.msrb.mxu3 %vm5415_vm13, %v5568_v1  ;;  %v3240_v27 = vunpack.i.h.bf16 %v3238_v39  ;;  %v3239_v21 = vunpack.i.l.bf16 %v3238_v39 }
 0x343   : > { %2851 = vmatpush.msk.msra.mxu1 %vm1495_vm3, %v5569_v44  ;;  %1726 = vmatpush.msrb.mxu2 %v1662_v15 }
 0x344   : > { %1568 = vmatpush.msra.mxu0 %v1500_v59  ;;  %2867 = vmatpush.msk.msrb.mxu3 %vm5415_vm13, %v1622_v58  ;;  %v3235_v58 = vunpack.i.h.bf16 %v3233_v33  ;;  %v1496_v35 = vsel %vm1495_vm3, %v3240_v27, %v1442_v18 }
 0x345   : > { %1727 = vmatpush.msrb.mxu2 %v1661_v46 }
 0x346   : > { %2868 = vmatpush.msk.msrb.mxu3 %vm5415_vm13, %v5570_v20  ;;  %v1656_v48 = vsel %vm5415_vm13, %v3235_v58, %v5573_v61 }
 0x347   : > { %1728 = vmatpush.msrb.mxu2 %v1660_v41 }
 0x348   : > { %v1454_v32 = vpop.permute.xlu1 %1453  ;;  %2869 = vmatpush.msk.msrb.mxu3 %vm5415_vm13, %v4868_v52  ;;  %v1657_v52 = vsel %vm5415_vm13, %v3234_v45, %v1606_v49 }
 0x349   : > { %2852 = vmatpush.msk.msra.mxu1 %vm1495_vm3, %v1454_v32  ;;  %v1499_v5 = vsel %vm1495_vm3, %v3229_v10, %v1454_v32  ;;  %1729 = vmatpush.msrb.mxu2 %v1659_v57  ;;  %v1763_v38 = vpop.permute.xlu0 %1762 }
 0x34a   : > { %1569 = vmatpush.msra.mxu0 %v1499_v5  ;;  %2870 = vmatpush.msk.msrb.mxu3 %vm5415_vm13, %v5571_v6 }
 0x34b   : > { %2853 = vmatpush.msk.msra.mxu1 %vm1495_vm3, %v5572_v8  ;;  %1730 = vmatpush.msrb.mxu2 %v1658_v60 }
 0x34c   : > { %1570 = vmatpush.msra.mxu0 %v1498_v29  ;;  %2871 = vmatpush.msk.msrb.mxu3 %vm5415_vm13, %v1606_v49 }
 0x34d   : > { %1731 = vmatpush.msrb.mxu2 %v1657_v52 }
 0x34e   : > { %2872 = vmatpush.msk.msrb.mxu3 %vm5415_vm13, %v5573_v61  ;;  %vm5575_vm13 = vcmask 7168  }
 0x34f   : > { %1732 = vmatpush.msrb.mxu2 %v1656_v48  ;;  %2873 = vmatmul.msk.f32.vlgmr.msrb.gmra.mxu3 %vm987_vm9, %v2857_v24  ;;  %v1071_v9 = vpop.f32.mrf.mxu1 }
 0x350   : > { %v1446_v37 = vpop.permute.xlu1 %1445  ;;  %2858 = vmatmul.msk.f32.vlgmr.msrb.gmra.mxu2 %vm987_vm9, %v2857_v24 }
 0x351   : > { %2854 = vmatpush.msk.msra.mxu1 %vm1495_vm3, %v1446_v37  ;;  %v1497_v16 = vsel %vm1495_vm3, %v3239_v21, %v1446_v37 }
 0x352   : > { %1571 = vmatpush.msra.mxu0 %v1497_v16 }
 0x353   : > { %2855 = vmatpush.msk.msra.mxu1 %vm1495_vm3, %v1442_v18 }
 0x354   : > { %1572 = vmatpush.msra.mxu0 %v1496_v35  ;;  %2856 = vmatmul.msk.f32.vlgmr.msra.gmra.mxu1 %vm987_vm9, %v2840_v14 }
 0x355   : > { %2841 = vmatmul.msk.f32.vlgmr.msra.gmra.mxu0 %vm987_vm9, %v2840_v14 }
 0x360   : > { %v1051_v50 = vpop.f32.mrf.mxu0 }
 0x36d   : > { %v1008_v19 = vpop.f32.mrf.mxu2 }
 0x36e   : > { %v1052_v56 = vadd.f32 %v1051_v50, %v1008_v19 }
 0x376   : > { %v1255_v42 = vpop.f32.mrf.mxu0 }
 0x379   : > { %v1275_v44 = vpop.f32.mrf.mxu1 }
 0x37a   : > { %v1028_v2 = vpop.f32.mrf.mxu3 }
 0x37b   : > { %v1072_v3 = vadd.f32 %v1071_v9, %v1028_v2 }
 0x389   : > { %v1208_v54 = vpop.f32.mrf.mxu2 }
 0x38a   : > { %v1231_v40 = vadd.f32 %v1208_v54, %v1052_v56 }
 0x38c   : > { %v1278_v49 = vadd.f32 %v1255_v42, %v1231_v40 }
 0x396   : > { %v1228_v36 = vpop.f32.mrf.mxu3 }
 0x397   : > { %v1232_v46 = vadd.f32 %v1228_v36, %v1072_v3 }
 0x399   : > { %v1279_v41 = vadd.f32 %v1275_v44, %v1232_v46 }
 0x3b6   : > { %v1434_v10 = vpop.f32.mrf.mxu3 }
 0x3b7   : > { %v1414_v26 = vpop.f32.mrf.mxu2  ;;  %v1438_v57 = vadd.f32 %v1434_v10, %v1279_v41 }
 0x3b8   : > { %v1437_v1 = vadd.f32 %v1414_v26, %v1278_v49 }
 0x3d1   : > { %v1594_v32 = vpop.f32.mrf.mxu1 }
 0x3d2   : > { %v1574_v15 = vpop.f32.mrf.mxu0  ;;  %v1598_v5 = vadd.f32 %v1594_v32, %v1438_v57  ;;  %v1754_v58 = vpop.f32.mrf.mxu3 }
 0x3d3   : > { %v1597_v59 = vadd.f32 %v1574_v15, %v1437_v1  ;;  %v1734_v51 = vpop.f32.mrf.mxu2 }
 0x3d4   : > { %v1758_v45 = vadd.f32 %v1754_v58, %v1598_v5 }
 0x3d5   : > { %v1757_v4 = vadd.f32 %v1734_v51, %v1597_v59 }
 0x3d6   : > { %v1766_v6 = vadd.f32 %v1763_v38, %v1758_v45  ;;  %v2486_v45 = vld [vmem:[%s5323_s8] sm:$0xff] }
 0x3d7   : > { %v1765_v20 = vadd.f32 %v1763_v38, %v1757_v4 }
 0x3d8   : > { %v1768_v8 = vmax.f32 %v1766_v6, 0.0 }
 0x3d9   : > { %v1767_v33 = vmax.f32 %v1765_v20, 0.0 }
 0x3da   : > { %v1838_v1 = vrot.slane %v1768_v8, 4 }
 0x3db   : > { %1801 = vrot.lane.b32.xlu2 %v1767_v33, %s3429_s20  ;;  %1821 = vrot.lane.b32.xlu0 %v1767_v33, %s3430_s24  ;;  %v1837_v18 = vrot.slane %v1767_v33, 4 }
 0x3dc   : > { %1811 = vrot.lane.b32.xlu1 %v1767_v33, %s3432_s27 }
 0x3e3   : > { %1771 = vrot.lane.b32.xlu2 %v1767_v33, %s3427_s7  ;;  %1791 = vrot.lane.b32.xlu0 %v1767_v33, %s3426_s18 }
 0x3e4   : > { %1781 = vrot.lane.b32.xlu1 %v1767_v33, %s3428_s15 }
 0x3eb   : > { %1803 = vrot.lane.b32.xlu0 %v1768_v8, %s3429_s20  ;;  %1813 = vrot.lane.b32.xlu2 %v1768_v8, %s3432_s27  ;;  %s5631_s27 = sshll.u32 %s3584_s17, 5 }
 0x3ec   : > { %1823 = vrot.lane.b32.xlu1 %v1768_v8, %s3430_s24 }
 0x3f3   : > { %1773 = vrot.lane.b32.xlu0 %v1768_v8, %s3427_s7  ;;  %1783 = vrot.lane.b32.xlu2 %v1768_v8, %s3428_s15  ;;  %s5595_s7 = smov 96  }
 0x3f4   : > { %1793 = vrot.lane.b32.xlu1 %v1768_v8, %s3426_s18  ;;  %s5594_s18 = smov 80  }
 0x435   : > { %v1802_v24 = vpop.permute.xlu2 %1801 }
 0x43d   : > { %v1772_v17 = vpop.permute.xlu2 %1771 }
 0x445   : > { %v1814_v7 = vpop.permute.xlu2 %1813 }
 0x44d   : > { %v1822_v29 = vpop.permute.xlu0 %1821  ;;  %v1784_v4 = vpop.permute.xlu2 %1783 }
 0x44e   : > { %v1812_v60 = vpop.permute.xlu1 %1811 }
 0x455   : > { %v1792_v61 = vpop.permute.xlu0 %1791 }
 0x456   : > { %v1782_v39 = vpop.permute.xlu1 %1781  ;;  %v1798_v16 = vsel %vm5575_vm13, 0.0, %v1792_v61 }
 0x457   : > { %v1799_v53 = vsel %vm550_vm10, %v1798_v16, 0.0  ;;  %vm5578_vm10 = vcmask 23552  }
 0x458   : > { %v1778_v12 = vsel %vm5578_vm10, 0.0, %v1772_v17  ;;  %vm5585_vm10 = vcmp.lt.s32.totalorder %v3795_v63, 16 }
 0x459   : > { %v1779_v2 = vsel %vm534_vm4, %v1778_v12, 0.0 }
 0x45d   : > { %v1804_v9 = vpop.permute.xlu0 %1803 }
 0x45e   : > { %v1824_v52 = vpop.permute.xlu1 %1823 }
 0x45f   : > { %v1825_v27 = vsel %vm717_vm8, %v1822_v29, %v1824_v52  ;;  %v1828_v21 = vsel %vm717_vm8, %v1824_v52, 0.0  ;;  %vm5576_vm8 = vcmask 15360  }
 0x460   : > { %v4989_v48 = vsel %vm5574_vm11, %v1825_v27, 0.0  ;;  %v4993_v37 = vsel %vm577_vm2, %v1828_v21, 0.0  ;;  %v1788_v14 = vsel %vm5576_vm8, 0.0, %v1782_v39  ;;  %vm5577_vm2 = vcmask 1043456  }
 0x461   : > { %2057 = vrot.lane.b32.xlu0 %v4993_v37, %s3436_s14  ;;  %1906 = vrot.lane.b32.xlu1 %v4989_v48, %s3433_s21  ;;  %v5006_v35 = vsel %vm5577_vm2, %v1799_v53, %v1837_v18  ;;  %v1789_v19 = vsel %vm542_vm6, %v1788_v14, 0.0  ;;  %vm5579_vm13 = vmmov %vm5577_vm2  ;;  %vm5580_vm6 = vcmask 1031168   ;;  %vm5581_vm11 = vcmask 7168  }
 0x462   : > { %1908 = vrot.lane.b32.xlu2 %v4993_v37, %s3433_s21  ;;  %v1833_v50 = vrot.slane %v1789_v19, 4  ;;  %v1818_v42 = vsel %vm5580_vm6, %v1814_v7, 0.0  ;;  %vm5582_vm4 = vmmov %vm5580_vm6  ;;  %vm5583_vm8 = vcmask 1039360   ;;  %vm5589_vm6 = vcmask 15360  }
 0x463   : > { %v1815_v40 = vsel %vm5582_vm4, %v1812_v60, %v1814_v7  ;;  %v1808_v36 = vsel %vm5583_vm8, %v1804_v9, 0.0  ;;  %v1820_v26 = vsel %vm569_vm1, %v1818_v42, 0.0  ;;  %vm5584_vm2 = vmmov %vm5583_vm8  ;;  %vm5587_vm1 = vcmp.lt.s32.totalorder %v3791_v62, 16 }
 0x464   : > { %v5020_v54 = vsel %vm5579_vm13, %v1779_v2, %v1833_v50  ;;  %v1805_v3 = vsel %vm5584_vm2, %v1802_v24, %v1804_v9  ;;  %v1819_v44 = vsel %vm5585_vm10, %v1815_v40, 0.0  ;;  %v1810_v22 = vsel %vm561_vm15, %v1808_v36, 0.0  ;;  %v1926_v9 = vld [vmem:[#allocation5 + $0x10] sm:$0xff] }
 0x465   : > { %v1844_v43 = vrot.slane %v1820_v26, 4  ;;  %v1809_v59 = vsel %vm5587_vm1, %v1805_v3, 0.0  ;;  %v1843_v51 = vrot.slane %v1819_v44, 4  ;;  %v1774_v38 = vpop.permute.xlu0 %1773  ;;  %v1785_v10 = vsel %vm5589_vm6, %v1782_v39, %v1784_v4  ;;  %v2075_v4 = vld [vmem:[#allocation5 + $0x20] sm:$0xff] }
 0x466   : > { %v1794_v56 = vpop.permute.xlu1 %1793  ;;  %vm5591_vm15 = vcmask 23552   ;;  %v1790_v20 = vsel %vm543_vm12, %v1785_v10, 0.0  ;;  %vm5592_vm4 = vcmp.ge.s32.totalorder %v5521_v0, 0  ;;  %vm5596_vm12 = vcmask 130048  }
 0x467   : > { %v1795_v25 = vsel %vm5581_vm11, %v1792_v61, %v1794_v56  ;;  %v1775_v62 = vsel %vm5591_vm15, %v1772_v17, %v1774_v38  ;;  %v1834_v33 = vrot.slane %v1790_v20, 4  ;;  %vm5598_vm10 = vmmov %vm5596_vm12  ;;  %v1892_v20 = vld [vmem:[#allocation5] sm:$0xff] }
 0x468   : > { %v1800_v49 = vsel %vm551_vm0, %v1795_v25, 0.0  ;;  %vm5586_vm0 = vmmov %vm5579_vm13  ;;  %v1780_v41 = vsel %vm5592_vm4, %v1775_v62, 0.0  ;;  %vm1928_vm4 = vcmask 228352  }
 0x469   : > { %1873 = vrot.lane.b32.xlu0 %v4989_v48, %s3431_s26  ;;  %1875 = vrot.lane.b32.xlu1 %v4993_v37, %s3431_s26  ;;  %v5048_v15 = vsel %vm5586_vm0, %v1800_v49, %v1838_v1  ;;  %vm5588_vm13 = vmmov %vm5586_vm0 }
 0x46a   : > { %1898 = vrot.lane.b32.xlu2 %v5006_v35, %s3433_s21  ;;  %v5053_v46 = vsel %vm5588_vm13, %v1810_v22, %v1844_v43  ;;  %vm5590_vm11 = vmmov %vm5586_vm0 }
 0x46b   : > { %v3241_v63 = vpack.i.bf16 %v5048_v15, %v5053_v46  ;;  %v5059_v11 = vsel %vm5590_vm11, %v1809_v59, %v1843_v51  ;;  %vm5593_vm8 = vmmov %vm5586_vm0 }
 0x46c   : > { %v5072_v32 = vsel %vm5593_vm8, %v1780_v41, %v1834_v33  ;;  %v3256_v55 = vpack.i.bf16 %v5006_v35, %v5059_v11  ;;  %vm5597_vm2 = vmmov %vm5586_vm0  ;;  %vm5599_vm0 = vcmask 261120   ;;  %vm5605_vm8 = vcmask 392192   ;;  %v2076_v41 = vld [vmem:[#allocation5 + $0x28] sm:$0xff] }
 0x46d   : > { %vm5600_vm1 = vmmov %vm5599_vm0 }
 0x46e   : > { %vm5601_vm13 = vmmov %vm5597_vm2 }
 0x46f   : > { %vm5602_vm6 = vmmov %vm5597_vm2 }
 0x470   : > { %vm5603_vm11 = vmmov %vm5597_vm2 }
 0x471   : > { %1894 = vrot.lane.b32.xlu0 %v5020_v54, %s3433_s21  ;;  %1865 = vrot.lane.b32.xlu1 %v5006_v35, %s3431_s26  ;;  %vm5604_vm15 = vmmov %vm5599_vm0 }
 0x472   : > { %2055 = vrot.lane.b32.xlu2 %v4989_v48, %s3436_s14 }
 0x479   : > { %2201 = vrot.lane.b32.xlu0 %v5020_v54, %s3435_s22  ;;  %2213 = vrot.lane.b32.xlu1 %v4989_v48, %s3435_s22 }
 0x47a   : > { %2047 = vrot.lane.b32.xlu2 %v5006_v35, %s3436_s14 }
 0x481   : > { %1902 = vrot.lane.b32.xlu0 %v5059_v11, %s3433_s21  ;;  %3242 = vrot.lane.b32.xlu1 %v3241_v63, %s3433_s21 }
 0x482   : > { %2215 = vrot.lane.b32.xlu2 %v4993_v37, %s3435_s22 }
 0x489   : > { %2405 = vrot.lane.b32.xlu0 %v4993_v37, %s5594_s18  ;;  %1896 = vrot.lane.b32.xlu1 %v5072_v32, %s3433_s21  ;;  %s5272_s21 = scalar_lea.vmem [#allocation7], %s5631_s27 }
 0x48a   : > { %2207 = vrot.lane.b32.xlu2 %v5048_v15, %s3435_s22 }
 0x491   : > { %2308 = vrot.lane.b32.xlu0 %v4989_v48, %s5595_s7  ;;  %2051 = vrot.lane.b32.xlu1 %v5059_v11, %s3436_s14 }
 0x492   : > { %2043 = vrot.lane.b32.xlu2 %v5020_v54, %s3436_s14 }
 0x499   : > { %1869 = vrot.lane.b32.xlu0 %v5059_v11, %s3431_s26  ;;  %2310 = vrot.lane.b32.xlu1 %v4993_v37, %s5595_s7 }
 0x49a   : > { %1861 = vrot.lane.b32.xlu2 %v5020_v54, %s3431_s26 }
 0x4a1   : > { %2045 = vrot.lane.b32.xlu0 %v5072_v32, %s3436_s14  ;;  %3252 = vrot.lane.b32.xlu1 %v3241_v63, %s3431_s26 }
 0x4a2   : > { %3247 = vrot.lane.b32.xlu2 %v3241_v63, %s3436_s14 }
 0x4a9   : > { %1863 = vrot.lane.b32.xlu0 %v5072_v32, %s3431_s26  ;;  %2211 = vrot.lane.b32.xlu1 %v5053_v46, %s3435_s22  ;;  %s3368_s26 = scalar_lea.hbm %s5324_s9, 64 }
 0x4aa   : > { %2403 = vrot.lane.b32.xlu2 %v4989_v48, %s5594_s18 }
 0x4b1   : > { %3257 = vrot.lane.b32.xlu0 %v3256_v55, %s3435_s22  ;;  %2203 = vrot.lane.b32.xlu1 %v5072_v32, %s3435_s22  ;;  %s2953_s22 = sshll.u32 %s3510_s13, 5  ;;  %s2599_s13 = sshll.u32 %s5272_s21, 4  ;;  %s2600_s13 = int_to_ptr.vmem [resolvable:$true] %s2599_s13 }
 0x4b2   : > { %2397 = vrot.lane.b32.xlu2 %v5048_v15, %s5594_s18  ;;  %s2598_s19 = scalar_lea.hbm %s5324_s9, %s2953_s22 }
 0x4b3   : > { %s2601_s25 = sshll.u32 %s2598_s19, 4  ;;  %s2602_s25 = int_to_ptr.hbm [resolvable:$true] %s2601_s25 }
 0x4b9   : > { %3267 = vrot.lane.b32.xlu0 %v3256_v55, %s5595_s7  ;;  %3262 = vrot.lane.b32.xlu1 %v3256_v55, %s5594_s18 }
 0x4ba   : > { %2391 = vrot.lane.b32.xlu2 %v5020_v54, %s5594_s18 }
 0x4bc   : > { %v1909_v0 = vpop.permute.xlu2 %1908 }
 0x4c1   : > { %2393 = vrot.lane.b32.xlu0 %v5072_v32, %s5594_s18  ;;  %2306 = vrot.lane.b32.xlu1 %v5053_v46, %s5595_s7 }
 0x4c2   : > { %2401 = vrot.lane.b32.xlu2 %v5053_v46, %s5594_s18  ;;  %s2587_s18 = scalar_lea.sflag [#allocation4], %s3584_s17 }
 0x4c4   : > { %v1899_v57 = vpop.permute.xlu2 %1898 }
 0x4c9   : > { %2298 = vrot.lane.b32.xlu0 %v5072_v32, %s5595_s7  ;;  %2302 = vrot.lane.b32.xlu1 %v5048_v15, %s5595_s7 }
 0x4ca   : > { %2296 = vrot.lane.b32.xlu2 %v5020_v54, %s5595_s7  ;;  %s3362_s7 = sshra.s32 %s2602_s25, 4  ;;  %s3363_s7 = int_to_ptr.hbm [resolvable:$true] %s3362_s7 }
 0x4cb   : > { %s3364_s15 = scalar_lea.hbm %s3363_s7, 32  ;;  %p3369_p11 = scmp.lt.s32.totalorder %s3363_s7, %s5324_s9 }
 0x4cc   : > { %v2056_v5 = vpop.permute.xlu2 %2055  ;;  %p3365_p1 = scmp.ne.s32.totalorder %s3363_s7, %s3364_s15  ;;  %p3370_p9 = scmp.lt.s32.totalorder %s3368_s26, %s3364_s15 }
 0x4cd   : > { %v2073_v58 = vsel %vm5596_vm12, 0.0, %v2056_v5  ;;  %vm5606_vm12 = vmmov %vm5599_vm0 }
 0x4ce   : > { %2898 = vmatpush.msk.msra.mxu2 %vm5597_vm2, %v2073_v58  ;;  %v1893_v58 = vld [vmem:[#allocation5 + $0x8] sm:$0xff]  ;;  %p3366_p4 = pnand %p3365_p1, %p3556_p7  ;;  %p3371_p2 = por %p3370_p9, %p3369_p11 }
 0x4d0   : > { %p3367_p8 = pneg %p3366_p4 }
 0x4d1   : > { %2490 = vperm.xlu1 %3030, %v2486_v45  }
 0x4d2   : > { %p3372_p10 = pnand %p3371_p2, %p3367_p8 }
 0x4d3   : > { %v2058_v6 = vpop.permute.xlu0 %2057  ;;  %v1907_v8 = vpop.permute.xlu1 %1906 }
 0x4d4   : > { %v2062_v60 = vsel %vm5598_vm10, %v2056_v5, %v2058_v6  ;;  %v1913_v29 = vsel %vm5599_vm0, %v1907_v8, %v1909_v0  ;;  %v1924_v39 = vsel %vm5600_vm1, 0.0, %v1907_v8  ;;  %v2048_v52 = vpop.permute.xlu2 %2047  ;;  %vm5607_vm10 = vmmov %vm5599_vm0 }
 0x4d5   : > { %2874 = vmatpush.msk.msrb.mxu0 %vm5601_vm13, %v1924_v39  ;;  %2883 = vmatpush.msk.msrb.mxu1 %vm5602_vm6, %v1913_v29  ;;  %vm5608_vm0 = vmmov %vm5605_vm8 }
 0x4d6   : > { %2907 = vmatpush.msk.msra.mxu3 %vm5603_vm11, %v2062_v60  ;;  %vm5609_vm1 = vmmov %vm5597_vm2 }
 0x4d7   : > { %vm5612_vm6 = vmmov %vm5609_vm1 }
 0x4db   : > { %v1874_v24 = vpop.permute.xlu0 %1873  ;;  %v1876_v27 = vpop.permute.xlu1 %1875 }
 0x4dc   : > { %v5136_v21 = vpop.permute.xlu2 %2215  ;;  %v1891_v42 = vsel %vm5605_vm8, 0.0, %v1874_v24  ;;  %v1880_v49 = vsel %vm5608_vm0, %v1874_v24, %v1876_v27  ;;  %vm5617_vm8 = vmmov %vm5608_vm0 }
 0x4dd   : > { %v2231_v30 = vsel %vm987_vm9, %v5136_v21, 0.0 }
 0x4e3   : > { %v1895_v61 = vpop.permute.xlu0 %1894  ;;  %v5138_v16 = vpop.permute.xlu1 %1865 }
 0x4e4   : > { %v5140_v53 = vpop.permute.xlu2 %2207 }
 0x4eb   : > { %v5142_v14 = vpop.permute.xlu0 %2201  ;;  %v2214_v18 = vpop.permute.xlu1 %2213 }
 0x4ec   : > { %v2044_v17 = vpop.permute.xlu2 %2043  ;;  %v2220_v38 = vsel %vm987_vm9, %v2214_v18, %v5136_v21 }
 0x4f3   : > { %v1903_v19 = vpop.permute.xlu0 %1902  ;;  %v3243_v12 = vpop.permute.xlu1 %3242 }
 0x4f4   : > { %v3245_v50 = vunpack.i.h.bf16 %v3243_v12  ;;  %v3244_v2 = vunpack.i.l.bf16 %v3243_v12  ;;  %v5144_v7 = vpop.permute.xlu2 %1861  ;;  %2876 = vmatpush.msk.msrb.mxu0 %vm4317_vm14, %v1903_v19 }
 0x4f6   : > { %2878 = vmatpush.msk.msrb.mxu0 %vm4317_vm14, %v1899_v57  ;;  %v1912_v56 = vsel %vm5604_vm15, %v1903_v19, %v3244_v2  ;;  %v1911_v25 = vsel %vm5606_vm12, %v1899_v57, %v3245_v50  ;;  %vm5616_vm15 = vmmov %vm5608_vm0 }
 0x4f7   : > { %1976 = vmatpush.msrb.mxu1 %v1912_v56  ;;  %vm5618_vm12 = vmmov %vm5609_vm1 }
 0x4f8   : > { %2880 = vmatpush.msk.msrb.mxu0 %vm4317_vm14, %v1895_v61  ;;  %vm5610_vm14 = vcmask 130048  }
 0x4f9   : > { %1977 = vmatpush.msrb.mxu1 %v1911_v25  ;;  %2881 = vmatmul.msk.f32.vlgmr.msrb.gmra.mxu0 %vm1928_vm4, %v1926_v9  ;;  %vm5611_vm13 = vmmov %vm5610_vm14 }
 0x4fa   : > { %2886 = vmatpush.msk.msra.mxu0 %vm5597_vm2, %v1891_v42  ;;  %vm5614_vm11 = vmmov %vm5611_vm13 }
 0x4fb   : > { %v5157_v40 = vpop.permute.xlu0 %2405  ;;  %v1897_v36 = vpop.permute.xlu1 %1896  ;;  %vm5619_vm2 = vmmov %vm5608_vm0  ;;  %vm5621_vm0 = vcmask 654336  }
 0x4fc   : > { %v1910_v26 = vsel %vm5607_vm10, %v1895_v61, %v1897_v36  ;;  %v3248_v3 = vpop.permute.xlu2 %3247  ;;  %vm5620_vm10 = vmmov %vm5609_vm1  ;;  %v2140_v61 = vld [vmem:[#allocation5 + $0x38] sm:$0xff]  ;;  %v2423_v36 = vld [vmem:[#allocation5 + $0x60] sm:$0xff] }
 0x4fd   : > { %1978 = vmatpush.msrb.mxu1 %v1910_v26  ;;  %v3250_v1 = vunpack.i.h.bf16 %v3248_v3  ;;  %v3249_v44 = vunpack.i.l.bf16 %v3248_v3 }
 0x4fe   : > { %2884 = vmatmul.msk.f32.vlgmr.msrb.gmra.mxu1 %vm1928_vm4, %v1926_v9 }
 0x4ff   : > { %2895 = vmatpush.msk.msra.mxu1 %vm5609_vm1, %v1880_v49  ;;  %v2060_v51 = vsel %vm5611_vm13, %v2048_v52, %v3250_v1  ;;  %vm5623_vm13 = vmmov %vm5621_vm0  ;;  %v2328_v1 = vld [vmem:[#allocation5 + $0x50] sm:$0xff] }
 0x501   : > { %2882 = vmatmul.msk.f32.gmra.mxu0 %vm1928_vm4, %v1927_v47 }
 0x503   : > { %v2309_v22 = vpop.permute.xlu0 %2308  ;;  %v2052_v43 = vpop.permute.xlu1 %2051 }
 0x504   : > { %2900 = vmatpush.msk.msra.mxu2 %vm4635_vm7, %v2052_v43  ;;  %v2061_v59 = vsel %vm5610_vm14, %v2052_v43, %v3249_v44  ;;  %v5173_v63 = vpop.permute.xlu2 %2403  ;;  %vm5622_vm14 = vmmov %vm5609_vm1  ;;  %v2424_v43 = vld [vmem:[#allocation5 + $0x68] sm:$0xff] }
 0x505   : > { %2124 = vmatpush.msra.mxu3 %v2061_v59  ;;  %v2329_v59 = vld [vmem:[#allocation5 + $0x58] sm:$0xff] }
 0x506   : > { %2902 = vmatpush.msk.msra.mxu2 %vm4635_vm7, %v2048_v52  ;;  %2885 = vmatmul.msk.f32.gmra.mxu1 %vm1928_vm4, %v1927_v47  ;;  %v2421_v52 = vsel %vm5621_vm0, %v5157_v40, 0.0 }
 0x507   : > { %2125 = vmatpush.msra.mxu3 %v2060_v51 }
 0x508   : > { %2904 = vmatpush.msk.msra.mxu2 %vm4635_vm7, %v2044_v17  ;;  %vm5613_vm7 = vmmov %vm5609_vm1 }
 0x509   : > { %2905 = vmatmul.msk.f32.vlgmr.msra.gmra.mxu2 %vm1928_vm4, %v2075_v4 }
 0x50a   : > { %2916 = vmatpush.msk.msrb.mxu2 %vm5612_vm6, %v2220_v38  ;;  %vm5624_vm6 = vmmov %vm5621_vm0 }
 0x50b   : > { %v1870_v10 = vpop.permute.xlu0 %1869  ;;  %v2311_v62 = vpop.permute.xlu1 %2310 }
 0x50c   : > { %2888 = vmatpush.msk.msra.mxu0 %vm4346_vm5, %v1870_v10  ;;  %v5188_v34 = vpop.permute.xlu2 %2397  ;;  %v2315_v45 = vsel %vm1495_vm3, %v2309_v22, %v2311_v62 }
 0x50e   : > { %2890 = vmatpush.msk.msra.mxu0 %vm4346_vm5, %v5138_v16 }
 0x510   : > { %2892 = vmatpush.msk.msra.mxu0 %vm4346_vm5, %v5144_v7  ;;  %vm5615_vm5 = vmmov %vm5609_vm1 }
 0x511   : > { %2893 = vmatmul.msk.f32.vlgmr.msra.gmra.mxu0 %vm1928_vm4, %v1892_v20  ;;  %2906 = vmatmul.msk.f32.gmra.mxu2 %vm1928_vm4, %v2076_v41 }
 0x512   : > { %2910 = vmatpush.msk.msrb.mxu0 %vm5613_vm7, %v4989_v48  ;;  %vm5625_vm7 = vmmov %vm5621_vm0 }
 0x513   : > { %v2046_v33 = vpop.permute.xlu0 %2045  ;;  %v3253_v55 = vpop.permute.xlu1 %3252 }
 0x514   : > { %v3255_v0 = vunpack.i.h.bf16 %v3253_v55  ;;  %v3254_v57 = vunpack.i.l.bf16 %v3253_v55  ;;  %2164 = vmatpush.msrb.mxu0 %v5059_v11  ;;  %v2059_v5 = vsel %vm5614_vm11, %v2044_v17, %v2046_v33  ;;  %v2392_v60 = vpop.permute.xlu2 %2391  ;;  %vm5626_vm11 = vmmov %vm5609_vm1 }
 0x515   : > { %2126 = vmatpush.msra.mxu3 %v2059_v5 }
 0x516   : > { %2165 = vmatpush.msrb.mxu0 %v5006_v35  ;;  %v1879_v48 = vsel %vm5616_vm15, %v1870_v10, %v3254_v57  ;;  %2908 = vmatmul.msk.f32.vlgmr.msra.gmra.mxu3 %vm1928_vm4, %v2075_v4  ;;  %v1878_v11 = vsel %vm5617_vm8, %v5138_v16, %v3255_v0  ;;  %vm5629_vm15 = vmmov %vm5621_vm0 }
 0x517   : > { %2919 = vmatpush.msk.msrb.mxu3 %vm5615_vm5, %v2231_v30  ;;  %2033 = vmatpush.msra.mxu1 %v1879_v48  ;;  %vm5627_vm5 = vmmov %vm5621_vm0 }
 0x518   : > { %2166 = vmatpush.msrb.mxu0 %v5020_v54  ;;  %v2139_v54 = vld [vmem:[#allocation5 + $0x30] sm:$0xff]  ;;  %vm5630_vm8 = vmmov %vm5621_vm0 }
 0x519   : > { %2034 = vmatpush.msra.mxu1 %v1878_v11  ;;  %2894 = vmatmul.msk.f32.gmra.mxu0 %vm1928_vm4, %v1893_v58 }
 0x51a   : > { %2925 = vmatpush.msk.msra.mxu0 %vm5618_vm12, %v2315_v45 }
 0x51b   : > { %v1864_v35 = vpop.permute.xlu0 %1863  ;;  %v2212_v6 = vpop.permute.xlu1 %2211 }
 0x51c   : > { %2920 = vmatpush.msk.msrb.mxu3 %vm987_vm9, %v2212_v6  ;;  %v1877_v8 = vsel %vm5619_vm2, %v5144_v7, %v1864_v35  ;;  %v2402_v21 = vpop.permute.xlu2 %2401  ;;  %v2234_v7 = vld [vmem:[#allocation5 + $0x48] sm:$0xff] }
 0x51d   : > { %2035 = vmatpush.msra.mxu1 %v1877_v8 }
 0x51e   : > { %2896 = vmatmul.msk.f32.vlgmr.msra.gmra.mxu1 %vm1928_vm4, %v1892_v20  ;;  %2921 = vmatpush.msk.msrb.mxu3 %vm987_vm9, %v5140_v53 }
 0x51f   : > { %2913 = vmatpush.msk.msrb.mxu1 %vm5620_vm10, %v4993_v37  ;;  %2909 = vmatmul.msk.f32.gmra.mxu3 %vm1928_vm4, %v2076_v41  ;;  %v2326_v37 = vsel %vm1495_vm3, %v2311_v62, 0.0 }
 0x521   : > { %2187 = vmatpush.msrb.mxu1 %v5053_v46  ;;  %2911 = vmatmul.msk.f32.vlgmr.msrb.gmra.mxu0 %vm1928_vm4, %v2139_v54 }
 0x523   : > { %2188 = vmatpush.msrb.mxu1 %v5048_v15  ;;  %v3258_v29 = vpop.permute.xlu0 %3257  ;;  %v2204_v39 = vpop.permute.xlu1 %2203  ;;  %v2233_v15 = vld [vmem:[#allocation5 + $0x40] sm:$0xff] }
 0x524   : > { %v3260_v24 = vunpack.i.h.bf16 %v3258_v29  ;;  %v3259_v27 = vunpack.i.l.bf16 %v3258_v29  ;;  %2922 = vmatpush.msk.msrb.mxu3 %vm987_vm9, %v2204_v39  ;;  %v2217_v18 = vsel %vm987_vm9, %v5142_v14, %v2204_v39  ;;  %v2297_v44 = vpop.permute.xlu2 %2296 }
 0x525   : > { %2189 = vmatpush.msrb.mxu1 %v5072_v32  ;;  %v2487_v32 = vld [vmem:[%s5323_s8 + $0x8] sm:$0xff] }
 0x526   : > { %2937 = vmatpush.msk.msra.mxu3 %vm5609_vm1, %v2421_v52  ;;  %v2219_v46 = vsel %vm987_vm9, %v3259_v27, %v2212_v6  ;;  %2897 = vmatmul.msk.f32.gmra.mxu1 %vm1928_vm4, %v1893_v58  ;;  %v2218_v16 = vsel %vm987_vm9, %v3260_v24, %v5140_v53  ;;  %v2410_v53 = vsel %vm5625_vm7, %v5173_v63, %v5157_v40  ;;  %vm5628_vm9 = vmmov %vm5621_vm0 }
 0x527   : > { %2928 = vmatpush.msk.msra.mxu1 %vm5622_vm14, %v2326_v37  ;;  %2259 = vmatpush.msrb.mxu2 %v2219_v46 }
 0x528   : > { %2938 = vmatpush.msk.msra.mxu3 %vm5623_vm13, %v2402_v21  ;;  %2495 = vperm.xlu2 %3271, %v2487_v32  }
 0x529   : > { %2260 = vmatpush.msrb.mxu2 %v2218_v16  ;;  %2923 = vmatmul.msk.f32.vlgmr.msrb.gmra.mxu3 %vm1928_vm4, %v2233_v15 }
 0x52a   : > { %2912 = vmatmul.msk.f32.gmra.mxu0 %vm1928_vm4, %v2140_v61  ;;  %2939 = vmatpush.msk.msra.mxu3 %vm5624_vm6, %v5188_v34 }
 0x52b   : > { %v3268_v17 = vpop.permute.xlu0 %3267  ;;  %v3263_v19 = vpop.permute.xlu1 %3262  ;;  %2261 = vmatpush.msrb.mxu2 %v2217_v18 }
 0x52c   : > { %v3265_v12 = vunpack.i.h.bf16 %v3263_v19  ;;  %v3264_v50 = vunpack.i.l.bf16 %v3263_v19  ;;  %2917 = vmatmul.msk.f32.vlgmr.msrb.gmra.mxu2 %vm1928_vm4, %v2233_v15  ;;  %v3269_v56 = vunpack.i.l.bf16 %v3268_v17  ;;  %v3270_v26 = vunpack.i.h.bf16 %v3268_v17 }
 0x52d   : > { %2934 = vmatpush.msk.msra.mxu2 %vm5626_vm11, %v2410_v53 }
 0x52e   : > { %v2409_v2 = vsel %vm5627_vm5, %v3264_v50, %v2402_v21  ;;  %2914 = vmatmul.msk.f32.vlgmr.msrb.gmra.mxu1 %vm1928_vm4, %v2139_v54  ;;  %v2408_v14 = vsel %vm5628_vm9, %v3265_v12, %v5188_v34 }
 0x52f   : > { %2449 = vmatpush.msra.mxu2 %v2409_v2 }
 0x531   : > { %2450 = vmatpush.msra.mxu2 %v2408_v14  ;;  %2924 = vmatmul.msk.f32.gmra.mxu3 %vm1928_vm4, %v2234_v7 }
 0x533   : > { %v2394_v9 = vpop.permute.xlu0 %2393  ;;  %v2307_v42 = vpop.permute.xlu1 %2306 }
 0x534   : > { %2918 = vmatmul.msk.f32.gmra.mxu2 %vm1928_vm4, %v2234_v7  ;;  %2929 = vmatpush.msk.msra.mxu1 %vm1495_vm3, %v2307_v42  ;;  %v2314_v25 = vsel %vm1495_vm3, %v3269_v56, %v2307_v42  ;;  %v2407_v40 = vsel %vm5629_vm15, %v2392_v60, %v2394_v9 }
 0x535   : > { %2940 = vmatpush.msk.msra.mxu3 %vm5630_vm8, %v2394_v9  ;;  %2354 = vmatpush.msra.mxu0 %v2314_v25 }
 0x536   : > { %2451 = vmatpush.msra.mxu2 %v2407_v40  ;;  %2915 = vmatmul.msk.f32.gmra.mxu1 %vm1928_vm4, %v2140_v61 }
 0x539   : > { %2941 = vmatmul.msk.f32.vlgmr.msra.gmra.mxu3 %vm1928_vm4, %v2423_v36 }
 0x53b   : > { %v2299_v49 = vpop.permute.xlu0 %2298  ;;  %v2303_v3 = vpop.permute.xlu1 %2302 }
 0x53c   : > { %2930 = vmatpush.msk.msra.mxu1 %vm1495_vm3, %v2303_v3  ;;  %2935 = vmatmul.msk.f32.vlgmr.msra.gmra.mxu2 %vm1928_vm4, %v2423_v36  ;;  %v2313_v47 = vsel %vm1495_vm3, %v3270_v26, %v2303_v3  ;;  %v2312_v22 = vsel %vm1495_vm3, %v2297_v44, %v2299_v49 }
 0x53d   : > { %2355 = vmatpush.msra.mxu0 %v2313_v47 }
 0x53e   : > { %2931 = vmatpush.msk.msra.mxu1 %vm1495_vm3, %v2299_v49 }
 0x53f   : > { %2356 = vmatpush.msra.mxu0 %v2312_v22  ;;  %2932 = vmatmul.msk.f32.vlgmr.msra.gmra.mxu1 %vm1928_vm4, %v2328_v1 }
 0x540   : > { %2926 = vmatmul.msk.f32.vlgmr.msra.gmra.mxu0 %vm1928_vm4, %v2328_v1 }
 0x541   : > { %2942 = vmatmul.msk.f32.gmra.mxu3 %vm1928_vm4, %v2424_v43 }
 0x543   : > { %v2491_v53 = vpop.permute.xlu1 %2490 }
 0x544   : > { %2936 = vmatmul.msk.f32.gmra.mxu2 %vm1928_vm4, %v2424_v43 }
 0x547   : > { %2933 = vmatmul.msk.f32.gmra.mxu1 %vm1928_vm4, %v2329_v59 }
 0x548   : > { %2927 = vmatmul.msk.f32.gmra.mxu0 %vm1928_vm4, %v2329_v59 }
 0x576   : > { %v1957_v51 = vpop.f32.mrf.mxu0 }
 0x57b   : > { %v1980_v4 = vpop.f32.mrf.mxu1 }
 0x57e   : > { %v1960_v38 = vpop.f32.mrf.mxu0 }
 0x582   : > { %v2496_v47 = vpop.permute.xlu2 %2495 }
 0x583   : > { %v1983_v63 = vpop.f32.mrf.mxu1 }
 0x58c   : > { %v2105_v41 = vpop.f32.mrf.mxu2 }
 0x58e   : > { %v2014_v10 = vpop.f32.mrf.mxu0 }
 0x58f   : > { %v2015_v45 = vadd.f32 %v2014_v10, %v1957_v51 }
 0x591   : > { %v2134_v29 = vadd.f32 %v2105_v41, %v2015_v45 }
 0x594   : > { %v2108_v0 = vpop.f32.mrf.mxu2 }
 0x596   : > { %v2017_v34 = vpop.f32.mrf.mxu0 }
 0x597   : > { %v2018_v27 = vadd.f32 %v2017_v34, %v1960_v38 }
 0x599   : > { %v2128_v62 = vpop.f32.mrf.mxu3  ;;  %v2136_v12 = vadd.f32 %v2108_v0, %v2018_v27 }
 0x59b   : > { %v2037_v20 = vpop.f32.mrf.mxu1 }
 0x59c   : > { %v2038_v58 = vadd.f32 %v2037_v20, %v1980_v4 }
 0x59e   : > { %v2168_v57 = vpop.f32.mrf.mxu0  ;;  %v2135_v6 = vadd.f32 %v2128_v62, %v2038_v58 }
 0x59f   : > { %v2197_v52 = vadd.f32 %v2168_v57, %v2134_v29 }
 0x5a2   : > { %v2131_v33 = vpop.f32.mrf.mxu3 }
 0x5a3   : > { %v2040_v55 = vpop.f32.mrf.mxu1 }
 0x5a4   : > { %v2041_v39 = vadd.f32 %v2040_v55, %v1983_v63 }
 0x5a6   : > { %v2137_v21 = vadd.f32 %v2131_v33, %v2041_v39 }
 0x5a7   : > { %v2171_v8 = vpop.f32.mrf.mxu0 }
 0x5a8   : > { %v2199_v7 = vadd.f32 %v2171_v8, %v2136_v12 }
 0x5ab   : > { %v2191_v5 = vpop.f32.mrf.mxu1 }
 0x5ac   : > { %v2286_v30 = vpop.f32.mrf.mxu3  ;;  %v2198_v60 = vadd.f32 %v2191_v5, %v2135_v6 }
 0x5ae   : > { %v2293_v24 = vadd.f32 %v2286_v30, %v2198_v60 }
 0x5af   : > { %v2263_v48 = vpop.f32.mrf.mxu2 }
 0x5b0   : > { %v2292_v37 = vadd.f32 %v2263_v48, %v2197_v52 }
 0x5b3   : > { %v2194_v11 = vpop.f32.mrf.mxu1 }
 0x5b4   : > { %v2289_v35 = vpop.f32.mrf.mxu3  ;;  %v2200_v18 = vadd.f32 %v2194_v11, %v2137_v21 }
 0x5b6   : > { %v2295_v56 = vadd.f32 %v2289_v35, %v2200_v18 }
 0x5b7   : > { %v2266_v54 = vpop.f32.mrf.mxu2 }
 0x5b8   : > { %v2294_v42 = vadd.f32 %v2266_v54, %v2199_v7 }
 0x5bc   : > { %v2381_v46 = vpop.f32.mrf.mxu1  ;;  %v2476_v15 = vpop.f32.mrf.mxu3 }
 0x5bd   : > { %v2388_v61 = vadd.f32 %v2381_v46, %v2293_v24  ;;  %v2358_v16 = vpop.f32.mrf.mxu0 }
 0x5be   : > { %v2387_v32 = vadd.f32 %v2358_v16, %v2292_v37 }
 0x5bf   : > { %v2483_v17 = vadd.f32 %v2476_v15, %v2388_v61  ;;  %v2453_v19 = vpop.f32.mrf.mxu2 }
 0x5c0   : > { %v2482_v50 = vadd.f32 %v2453_v19, %v2387_v32 }
 0x5c1   : > { %v2499_v2 = vadd.f32 %v2491_v53, %v2483_v17 }
 0x5c2   : > { %v2498_v14 = vadd.f32 %v2491_v53, %v2482_v50 }
 0x5c3   : > { %v2944_v9 = vmul.f32 -1.442695, %v2499_v2 }
 0x5c4   : > { %v2943_v25 = vmul.f32 -1.442695, %v2498_v14  ;;  %v2384_v40 = vpop.f32.mrf.mxu1  ;;  %v2479_v36 = vpop.f32.mrf.mxu3 }
 0x5c5   : > { %3272 = vpow2.f32 %v2944_v9  ;;  %v2390_v26 = vadd.f32 %v2384_v40, %v2295_v56  ;;  %v2361_v49 = vpop.f32.mrf.mxu0 }
 0x5c6   : > { %3274 = vpow2.f32 %v2943_v25  ;;  %v2389_v3 = vadd.f32 %v2361_v49, %v2294_v42 }
 0x5c7   : > { %v2485_v1 = vadd.f32 %v2479_v36, %v2390_v26  ;;  %v2456_v44 = vpop.f32.mrf.mxu2 }
 0x5c8   : > { %v2484_v22 = vadd.f32 %v2456_v44, %v2389_v3 }
 0x5c9   : > { %v2501_v43 = vadd.f32 %v2496_v47, %v2485_v1 }
 0x5ca   : > { %v2500_v59 = vadd.f32 %v2496_v47, %v2484_v22 }
 0x5cb   : > { %v3273_v51 = vpop.eup %3272  ;;  %v2946_v4 = vmul.f32 -1.442695, %v2501_v43 }
 0x5cc   : > { %v3275_v38 = vpop.eup %3274  ;;  %v2515_v63 = vadd.f32 1.0, %v3273_v51  ;;  %v2945_v10 = vmul.f32 -1.442695, %v2500_v59 }
 0x5cd   : > { %v2514_v62 = vadd.f32 1.0, %v3275_v38  ;;  %3276 = vpow2.f32 %v2946_v4 }
 0x5ce   : > { %3278 = vrcp.f32 %v2515_v63  ;;  %v2542_v48 = vand.u32 2147483647, %v2515_v63  ;;  %v2544_v58 = vand.u32 2147483648, %v2515_v63  ;;  %vm2538_vm12 = vweird.f32 %v2515_v63 }
 0x5cf   : > { %3280 = vrcp.f32 %v2514_v62  ;;  %v2529_v35 = vand.u32 2147483648, %v2514_v62  ;;  %v2527_v8 = vand.u32 2147483647, %v2514_v62  ;;  %vm2523_vm10 = vweird.f32 %v2514_v62 }
 0x5d0   : > { %3282 = vpow2.f32 %v2945_v10  ;;  %v2545_v29 = vor.u32 1.1754944e-38, %v2544_v58  ;;  %vm2543_vm0 = vcmp.eq.f32.partialorder %v2542_v48, 8.507059e+37 }
 0x5d1   : > { %v2530_v24 = vor.u32 1.1754944e-38, %v2529_v35  ;;  %vm2528_vm14 = vcmp.eq.f32.partialorder %v2527_v8, 8.507059e+37 }
 0x5d3   : > { %v3277_v20 = vpop.eup %3276 }
 0x5d4   : > { %v3279_v41 = vpop.eup %3278  ;;  %v2517_v34 = vadd.f32 1.0, %v3277_v20 }
 0x5d5   : > { %v3281_v33 = vpop.eup %3280  ;;  %v2534_v55 = vmul.f32 %v3279_v41, %v2515_v63  ;;  %vm2539_vm3 = vweird.f32 %v3279_v41 }
 0x5d6   : > { %v3283_v0 = vpop.eup %3282  ;;  %v2519_v57 = vmul.f32 %v3281_v33, %v2514_v62  ;;  %3284 = vrcp.f32 %v2517_v34  ;;  %vm2524_vm4 = vweird.f32 %v3281_v33  ;;  %vm2540_vm2 = vmor %vm2538_vm12, %vm2539_vm3  ;;  %v2574_v17 = vand.u32 2147483648, %v2517_v34 }
 0x5d7   : > { %v2535_v5 = vsub.f32 1.0, %v2534_v55  ;;  %v2516_v30 = vadd.f32 1.0, %v3283_v0  ;;  %vm2525_vm1 = vmor %vm2523_vm10, %vm2524_vm4  ;;  %v2572_v53 = vand.u32 2147483647, %v2517_v34  ;;  %vm2568_vm6 = vweird.f32 %v2517_v34 }
 0x5d8   : > { %v2520_v45 = vsub.f32 1.0, %v2519_v57  ;;  %v2575_v7 = vor.u32 1.1754944e-38, %v2574_v17 }
 0x5d9   : > { %v2536_v11 = vmul.f32 %v3279_v41, %v2535_v5  ;;  %3286 = vrcp.f32 %v2516_v30  ;;  %vm2573_vm5 = vcmp.eq.f32.partialorder %v2572_v53, 8.507059e+37  ;;  %vm2553_vm9 = vweird.f32 %v2516_v30 }
 0x5da   : > { %v2521_v6 = vmul.f32 %v3281_v33, %v2520_v45 }
 0x5db   : > { %v2537_v60 = vadd.f32 %v3279_v41, %v2536_v11 }
 0x5dc   : > { %v3285_v54 = vpop.eup %3284  ;;  %v2522_v39 = vadd.f32 %v3281_v33, %v2521_v6 }
 0x5dd   : > { %v2541_v52 = vsel %vm2540_vm2, %v3279_v41, %v2537_v60  ;;  %v2564_v27 = vmul.f32 %v3285_v54, %v2517_v34  ;;  %vm2569_vm13 = vweird.f32 %v3285_v54 }
 0x5de   : > { %v2546_v37 = vsel %vm2543_vm0, %v2545_v29, %v2541_v52  ;;  %v2526_v46 = vsel %vm2525_vm1, %v3281_v33, %v2522_v39  ;;  %vm2570_vm11 = vmor %vm2568_vm6, %vm2569_vm13 }
 0x5df   : > { %v3287_v15 = vpop.eup %3286  ;;  %v2579_v21 = vmul.f32 %v2546_v37, %v5500_v13  ;;  %v2531_v61 = vsel %vm2528_vm14, %v2530_v24, %v2526_v46  ;;  %v2565_v16 = vsub.f32 1.0, %v2564_v27  ;;  %v2559_v13 = vand.u32 2147483648, %v2516_v30 }
 0x5e0   : > { %v2578_v32 = vmul.f32 %v2531_v61, %v3626_v23  ;;  %v2549_v18 = vmul.f32 %v3287_v15, %v2516_v30  ;;  %vm2554_vm7 = vweird.f32 %v3287_v15  ;;  %v2557_v23 = vand.u32 2147483647, %v2516_v30 }
 0x5e1   : > { %v2566_v19 = vmul.f32 %v3285_v54, %v2565_v16  ;;  %2583 = vst [vmem:[%s5272_s21 + $0x8] sm:$0xff] %v2579_v21  ;;  %vm2555_vm15 = vmor %vm2553_vm9, %vm2554_vm7  ;;  %v2560_v42 = vor.u32 1.1754944e-38, %v2559_v13 }
 0x5e2   : > { %v2550_v12 = vsub.f32 1.0, %v2549_v18  ;;  %2582 = vst [vmem:[%s5272_s21] sm:$0xff] %v2578_v32  ;;  %vm2558_vm8 = vcmp.eq.f32.partialorder %v2557_v23, 8.507059e+37 }
 0x5e3   : > { %v2567_v50 = vadd.f32 %v3285_v54, %v2566_v19 }
 0x5e4   : > { %v2551_v2 = vmul.f32 %v3287_v15, %v2550_v12 }
 0x5e5   : > { %v2571_v14 = vsel %vm2570_vm11, %v3285_v54, %v2567_v50 }
 0x5e6   : > { %v2552_v56 = vadd.f32 %v3287_v15, %v2551_v2  ;;  %v2576_v9 = vsel %vm2573_vm5, %v2575_v7, %v2571_v14 }
 0x5e7   : > { %v2581_v25 = vmul.f32 %v2576_v9, %v3661_v28 }
 0x5e8   : > { %v2556_v40 = vsel %vm2555_vm15, %v3287_v15, %v2552_v56 }
 0x5e9   : > { %v2561_v36 = vsel %vm2558_vm8, %v2560_v42, %v2556_v40  ;;  %2585 = vst [vmem:[%s5272_s21 + $0x18] sm:$0xff] %v2581_v25 }
 0x5ea   : > { %v2580_v26 = vmul.f32 %v2561_v36, %v3670_v31 }
 0x5ec   : > { %2584 = vst [vmem:[%s5272_s21 + $0x10] sm:$0xff] %v2580_v26 }
 0x5ed   : > { %3375 = shalt.err (!%p3372_p10)
}
 0x5ee   : > { %s3438_s17 = smov 256  }
 0x5ef   : > { %2960 = dma.vmem_to_hbm [thread:$0]  (%p3556_p7), %s2600_s13, 512, %s2602_s25, %s2587_s18, %s3438_s17, %s3438_s17, %s3436_s14  }
 0x5f0 PF: > { %s2616_s21 = sand.u32 1, %s3406_s30   ;;  %p5632_p12 = scmp.ge.s32.totalorder %s3418_s12, 2 }
 0x5f1   : > { %s2617_s28 = scalar_lea.sflag [#allocation4], %s2616_s21 }
 0x5f2   : > { %p2971_p13 = pnand %p5632_p12, %p3524_p6 }
 0x5f4   : > { %p2972_p0 = pneg %p2971_p13 }
 0x5f6   : > { %3401 = dma.done.wait (%p2972_p0), %s2617_s28, 512  }
 0x5f7   : > { %3403 = vsyncadd (%p2972_p0), %s2617_s28, 4294966784  ;;  %s5633_s11 = sld [smem:[#allocation11_spill]]  ;;  %p23_p3 = scmp.ge.s32.totalorder %s3542_s23, 4  }
 0x5f8   : > { %s5634_s19 = sld [smem:[#allocation12_spill]]  ;;  %s5635_s30 = smov %s3410_s10 }
 0x5f9   : > { %s5638_s12 = smov %s3542_s23 }
 0x5fa   :  { %25 = sbr.rel (!%p23_p3) target bundleno = 8 (0x8), region = 117 }
 0x5fd   : > { %s5636_s10 = smov %s5633_s11 }
 0x5fe   : > { %s5637_s11 = smov %s5634_s19 }
 0x5ff   :  { %2623 = vsyncpa [#allocation3], 1 }
 0x600   :  { %2625 = vsyncpa [#allocation3 + $0x1], 1 }
 0x601   :  { %2626 = vsyncpa [#allocation6], 1 }
 0x602   :  { %2627 = vsyncpa [#allocation4], 1 }
 0x603   :  { %2629 = vsyncpa [#allocation4 + $0x1], 1 }

</bundles_post_ra>
